<compile_context>
chip_gen: v5e
topology: v5e:2x2
jax: 0.10.0
libtpu: 0.0.40
codegen_flags: <defaults>
</compile_context>

<pallas_src>
import functools

import jax
import jax.numpy as jnp
import numpy as np
from jax.experimental import pallas as pl
from jax.experimental.pallas import tpu as pltpu


# ----------------------------- kernel helpers --------------------------------

def _layernorm(x, g, b, eps=1e-6):
    # x: (M, D); g, b: (1, D) — f32 math
    mu = jnp.mean(x, axis=-1, keepdims=True)
    var = jnp.mean((x - mu) ** 2, axis=-1, keepdims=True)
    return (x - mu) * jax.lax.rsqrt(var + eps) * g + b


# --------------------------- fused encoder kernel -----------------------------

def encoder_stack_kernel(emb_ref, pos_ref, lng_ref, lnb_ref, bias_ref,
                         wqkv_ref, wo_ref, ln1g_ref, ln1b_ref,
                         w1_ref, b1_ref, w2_ref, b2_ref, ln2g_ref, ln2b_ref,
                         o_ref, x_sc, head_sc,
                         *, n_head, d_k, d_v, emb_scale):
    """Grid = (batch_tile, layer).

    The layer axis MUST remain the innermost, sequentially-executed
    ("arbitrary") grid axis: x_sc carries the (Bt*L, D) activation across
    layers and is re-initialized at layer == 0.  Reordering the grid or
    marking the layer axis parallel would silently corrupt results.
    """
    layer = pl.program_id(1)
    Bt, L, D = emb_ref.shape
    hk = n_head * d_k

    # ---- layer 0: embedding post-processing (scale, +pos, LayerNorm) ----
    @pl.when(layer == 0)
    def _():
        for b in range(Bt):                                   # static, small Bt
            x0 = emb_ref[b] * emb_scale + pos_ref[...]        # (L, D) f32
            x_sc[b * L:(b + 1) * L, :] = _layernorm(x0, lng_ref[...], lnb_ref[...])

    x = x_sc[...]                                             # (Bt*L, D) f32, VMEM
    x_bf = x.astype(jnp.bfloat16)

    # ---- fused QKV projection over the whole batch tile (lane-dense bf16) ----
    # 1/sqrt(d_k) is pre-folded into the wq columns of wqkv.
    qkv = jnp.dot(x_bf, wqkv_ref[0], preferred_element_type=jnp.float32)
    q = qkv[:, :hk].astype(jnp.bfloat16)
    k = qkv[:, hk:2 * hk].astype(jnp.bfloat16)
    v = qkv[:, 2 * hk:].astype(jnp.bfloat16)

    # ---- attention: per sequence in the tile, per head; no head concat ----
    for b in range(Bt):                                       # static unroll
        r0, r1 = b * L, (b + 1) * L
        bias_b = jnp.broadcast_to(bias_ref[b], (L, L))        # broadcast once/seq
        qb, kb, vb = q[r0:r1], k[r0:r1], v[r0:r1]
        for h in range(n_head):                               # static unroll
            qh = qb[:, h * d_k:(h + 1) * d_k]
            kh = kb[:, h * d_k:(h + 1) * d_k]
            vh = vb[:, h * d_v:(h + 1) * d_v]
            s = jax.lax.dot_general(qh, kh, (((1,), (1,)), ((), ())),
                                    preferred_element_type=jnp.float32) + bias_b
            s = s - jnp.max(s, axis=-1, keepdims=True)
            e = jnp.exp(s)
            p = e * pl.reciprocal(jnp.sum(e, axis=-1, keepdims=True), approx=True)
            head_sc[r0:r1, h * d_v:(h + 1) * d_v] = jnp.dot(
                p.astype(jnp.bfloat16), vh,
                preferred_element_type=jnp.float32).astype(jnp.bfloat16)

    attn = jnp.dot(head_sc[...], wo_ref[0],
                   preferred_element_type=jnp.float32)        # (Bt*L, D) f32
    y = _layernorm(attn + x, ln1g_ref[0], ln1b_ref[0])        # add & norm (f32)

    # ---- position-wise FFN over the whole batch tile ----
    h1 = jnp.maximum(
        jnp.dot(y.astype(jnp.bfloat16), w1_ref[0],
                preferred_element_type=jnp.float32) + b1_ref[0], 0.0)
    h2 = jnp.dot(h1.astype(jnp.bfloat16), w2_ref[0],
                 preferred_element_type=jnp.float32) + b2_ref[0]
    x_new = _layernorm(h2 + y, ln2g_ref[0], ln2b_ref[0])      # add & norm (f32)
    x_sc[...] = x_new                                         # carry to next layer

    @pl.when(layer == pl.num_programs(1) - 1)
    def _():
        for b in range(Bt):
            o_ref[b] = x_new[b * L:(b + 1) * L, :].astype(o_ref.dtype)


# ------------------------------ wrapper helpers --------------------------------

def prepare_encoder_params(params, *, n_head, d_k):
    """One-time weight prep: stack per-layer params on a leading layer axis,
    fuse wq|wk|wv, fold 1/sqrt(d_k) into the wq columns, cast matmul weights
    to bf16.  Call ONCE, not per forward pass."""
    del n_head  # layout is already (d_model, n_head * d_k)
    inv_scale = 1.0 / (float(d_k) ** 0.5)
    layers = params["layers"]

    def stack(name, dtype=jnp.float32):
        return jnp.stack([lp[name] for lp in layers]).astype(dtype)

    wqkv = jnp.stack([
        jnp.concatenate([lp["wq"] * inv_scale, lp["wk"], lp["wv"]], axis=-1)
        for lp in layers]).astype(jnp.bfloat16)               # (Nl, D, Wqkv)
    return {
        "emb": params["emb"], "pos": params["pos"],
        "ln_g": params["ln_g"], "ln_b": params["ln_b"],
        "wqkv": wqkv,
        "wo": stack("wo", jnp.bfloat16),
        "w1": stack("w1", jnp.bfloat16),
        "w2": stack("w2", jnp.bfloat16),
        "b1": stack("b1"), "b2": stack("b2"),
        "ln1_g": stack("ln1_g"), "ln1_b": stack("ln1_b"),
        "ln2_g": stack("ln2_g"), "ln2_b": stack("ln2_b"),
    }


def _pick_batch_tile(B, L, max_m=512):
    """Largest divisor Bt of B with Bt*L <= max_m: fills the MXU M-dim
    (target >= 128/256 rows at realistic B) while bounding the VMEM slab."""
    best = 1
    for bt in range(1, B + 1):
        if B % bt == 0 and bt * L <= max_m:
            best = bt
    return best


def _vmem_limit_bytes():
    # ~75% of physical VMEM, capped at 100 MiB (v5e/v6e: 128 MiB physical,
    # v7x: 64 MiB).  Default scoped limits (16/32 MiB) are too small for
    # double-buffered whole-layer weight blocks at realistic D / d_ff.
    try:
        cap = pltpu.get_tpu_info().vmem_capacity_bytes
        return int(min(100 * 2 ** 20, cap * 3 // 4))
    except Exception:
        return 48 * 2 ** 20


# ------------------------------ Pallas wrapper --------------------------------

def encoder_forward(prepped, src_seq, pad_mask, *, scale_emb, n_head, d_k, d_v):
    B, L = src_seq.shape
    D = prepped["emb"].shape[1]
    n_layer, _, Wqkv = prepped["wqkv"].shape
    d_ff = prepped["w1"].shape[2]
    Hdv = n_head * d_v

    Bt = _pick_batch_tile(B, L)
    # TODO(synk): on v7x keep B // Bt >= 2 (once B is large enough) so both
    #             TensorCores get a share of the parallel batch axis.

    # embedding lookup (gather) + additive key-pad bias stay in plain JAX glue
    emb = jnp.take(prepped["emb"], src_seq, axis=0)                  # (B, L, D) f32
    pos = prepped["pos"][:L]                                         # (L, D)
    bias = jnp.where(pad_mask > 0, 0.0, -1e9).astype(jnp.float32)    # (B, 1, L)

    emb_scale = float(D) ** 0.5 if scale_emb else 1.0
    kernel = functools.partial(encoder_stack_kernel, n_head=n_head, d_k=d_k,
                               d_v=d_v, emb_scale=emb_scale)

    def run(single_buffer_constants):
        def const_spec(shape, imap):
            # These blocks never change index along the inner layer axis, so a
            # single pipeline buffer suffices (2nd buffer is pure VMEM waste).
            if single_buffer_constants:
                return pl.BlockSpec(shape, imap, pipeline_mode=pl.Buffered(1))
            return pl.BlockSpec(shape, imap)

        return pl.pallas_call(
            kernel,
            out_shape=jax.ShapeDtypeStruct((B, L, D), jnp.float32),
            grid=(B // Bt, n_layer),
            in_specs=[
                const_spec((Bt, L, D), lambda b, l: (b, 0, 0)),       # emb
                const_spec((L, D), lambda b, l: (0, 0)),              # pos table
                const_spec((1, D), lambda b, l: (0, 0)),              # enc ln gamma
                const_spec((1, D), lambda b, l: (0, 0)),              # enc ln beta
                const_spec((Bt, 1, L), lambda b, l: (b, 0, 0)),       # pad bias
                pl.BlockSpec((1, D, Wqkv), lambda b, l: (l, 0, 0)),   # wqkv (fused)
                pl.BlockSpec((1, Hdv, D), lambda b, l: (l, 0, 0)),    # wo
                pl.BlockSpec((1, 1, D), lambda b, l: (l, 0, 0)),      # ln1 gamma
                pl.BlockSpec((1, 1, D), lambda b, l: (l, 0, 0)),      # ln1 beta
                pl.BlockSpec((1, D, d_ff), lambda b, l: (l, 0, 0)),   # w1
                pl.BlockSpec((1, 1, d_ff), lambda b, l: (l, 0, 0)),   # b1
                pl.BlockSpec((1, d_ff, D), lambda b, l: (l, 0, 0)),   # w2
                pl.BlockSpec((1, 1, D), lambda b, l: (l, 0, 0)),      # b2
                pl.BlockSpec((1, 1, D), lambda b, l: (l, 0, 0)),      # ln2 gamma
                pl.BlockSpec((1, 1, D), lambda b, l: (l, 0, 0)),      # ln2 beta
            ],
            out_specs=pl.BlockSpec((Bt, L, D), lambda b, l: (b, 0, 0)),
            scratch_shapes=[pltpu.VMEM((Bt * L, D), jnp.float32),     # activation carry
                            pltpu.VMEM((Bt * L, Hdv), jnp.bfloat16)], # head-output slab
            compiler_params=pltpu.CompilerParams(
                # layer axis must stay "arbitrary" (sequential, innermost):
                # x_sc is carried across it and reset at layer == 0.
                dimension_semantics=("parallel", "arbitrary"),
                vmem_limit_bytes=_vmem_limit_bytes()),
        )(emb, pos, prepped["ln_g"], prepped["ln_b"], bias,
          prepped["wqkv"], prepped["wo"], prepped["ln1_g"], prepped["ln1_b"],
          prepped["w1"], prepped["b1"], prepped["w2"], prepped["b2"],
          prepped["ln2_g"], prepped["ln2_b"])

    try:
        return run(single_buffer_constants=True)
    except Exception:
        # Fallback for jax versions without BlockSpec pipeline_mode support.
        return run(single_buffer_constants=False)


# ---------------------------- pure-JAX reference --------------------------------

def _ln_ref(x, g, b, eps=1e-6):
    mu = jnp.mean(x, axis=-1, keepdims=True)
    var = jnp.mean((x - mu) ** 2, axis=-1, keepdims=True)
    return (x - mu) / jnp.sqrt(var + eps) * g + b


def reference_forward(params, src_seq, pad_mask, *, scale_emb, n_head, d_k, d_v):
    D = params["emb"].shape[1]
    x = jnp.take(params["emb"], src_seq, axis=0)
    if scale_emb:
        x = x * (D ** 0.5)
    B, L = src_seq.shape
    x = x + params["pos"][None, :L]
    x = _ln_ref(x, params["ln_g"], params["ln_b"])
    mask = pad_mask[:, None, :, :]                     # (B, 1, 1, L)
    for lp in params["layers"]:
        q = (x @ lp["wq"]).reshape(B, L, n_head, d_k).transpose(0, 2, 1, 3)
        k = (x @ lp["wk"]).reshape(B, L, n_head, d_k).transpose(0, 2, 1, 3)
        v = (x @ lp["wv"]).reshape(B, L, n_head, d_v).transpose(0, 2, 1, 3)
        s = jnp.einsum("bhqd,bhkd->bhqk", q, k) / (d_k ** 0.5)
        s = jnp.where(mask == 0, -1e9, s)
        p = jax.nn.softmax(s, axis=-1)
        o = jnp.einsum("bhqk,bhkv->bhqv", p, v)
        o = o.transpose(0, 2, 1, 3).reshape(B, L, n_head * d_v)
        o = o @ lp["wo"]
        y = _ln_ref(o + x, lp["ln1_g"], lp["ln1_b"])
        h = jax.nn.relu(y @ lp["w1"] + lp["b1"])
        z = h @ lp["w2"] + lp["b2"]
        x = _ln_ref(z + y, lp["ln2_g"], lp["ln2_b"])
    return x


# ------------------------------- param init -------------------------------------

def sinusoid_table(n_position, d_hid):
    pos = np.arange(n_position)[:, None].astype(np.float64)
    hid = np.arange(d_hid)[None, :]
    angle = pos / np.power(10000.0, 2 * (hid // 2) / d_hid)
    table = np.zeros((n_position, d_hid), dtype=np.float64)
    table[:, 0::2] = np.sin(angle[:, 0::2])
    table[:, 1::2] = np.cos(angle[:, 1::2])
    return jnp.asarray(table, dtype=jnp.float32)


def init_params(key, *, vocab_size, d_model, n_layer, n_head, d_k, d_v, d_ff,
                pad_idx, n_position):
    keys = jax.random.split(key, 2 + n_layer)
    emb = 0.02 * jax.random.normal(keys[0], (vocab_size, d_model), jnp.float32)
    emb = emb.at[pad_idx].set(0.0)  # padding_idx row is zero
    params = {
        "emb": emb,
        "pos": sinusoid_table(n_position, d_model),
        "ln_g": jnp.ones((1, d_model), jnp.float32),
        "ln_b": jnp.zeros((1, d_model), jnp.float32),
        "layers": [],
    }
    for li in range(n_layer):
        lk = jax.random.split(keys[2 + li], 6)
        params["layers"].append({
            # x @ W layouts (already transposed vs. PyTorch's (out, in))
            "wq": 0.02 * jax.random.normal(lk[0], (d_model, n_head * d_k), jnp.float32),
            "wk": 0.02 * jax.random.normal(lk[1], (d_model, n_head * d_k), jnp.float32),
            "wv": 0.02 * jax.random.normal(lk[2], (d_model, n_head * d_v), jnp.float32),
            "wo": 0.02 * jax.random.normal(lk[3], (n_head * d_v, d_model), jnp.float32),
            "ln1_g": jnp.ones((1, d_model), jnp.float32),
            "ln1_b": jnp.zeros((1, d_model), jnp.float32),
            "w1": 0.02 * jax.random.normal(lk[4], (d_model, d_ff), jnp.float32),
            "b1": jnp.zeros((1, d_ff), jnp.float32),
            "w2": 0.02 * jax.random.normal(lk[5], (d_ff, d_model), jnp.float32),
            "b2": jnp.zeros((1, d_model), jnp.float32),
            "ln2_g": jnp.ones((1, d_model), jnp.float32),
            "ln2_b": jnp.zeros((1, d_model), jnp.float32),
        })
    return params


# ----------------------------------- main ---------------------------------------

if __name__ == "__main__":
    # small but lane-dense shapes (d_model multiple of 128)
    vocab_size, d_model, n_layer = 64, 128, 2
    n_head, d_k, d_v, d_ff = 4, 32, 32, 256
    pad_idx, n_position, scale_emb = 0, 64, True
    B, L = 2, 16

    key = jax.random.PRNGKey(0)
    pkey, skey = jax.random.split(key)
    params = init_params(pkey, vocab_size=vocab_size, d_model=d_model,
                         n_layer=n_layer, n_head=n_head, d_k=d_k, d_v=d_v,
                         d_ff=d_ff, pad_idx=pad_idx, n_position=n_position)

    src_seq = jax.random.randint(skey, (B, L), 1, vocab_size)
    src_seq = src_seq.at[1, -5:].set(pad_idx)                       # some padding
    pad_mask = (src_seq != pad_idx).astype(jnp.int32)[:, None, :]   # (B, 1, L)

    # one-time weight prep (hoisted out of the forward pass)
    prepped = prepare_encoder_params(params, n_head=n_head, d_k=d_k)

    out = encoder_forward(prepped, src_seq, pad_mask, scale_emb=scale_emb,
                          n_head=n_head, d_k=d_k, d_v=d_v)
    out = jax.block_until_ready(out)

    ref = reference_forward(params, src_seq, pad_mask, scale_emb=scale_emb,
                            n_head=n_head, d_k=d_k, d_v=d_v)
    ref = jax.block_until_ready(ref)

    assert out.shape == (B, L, d_model)
    assert bool(jnp.all(jnp.isfinite(out)))
    max_err = float(jnp.max(jnp.abs(out - ref)))
    assert bool(jnp.allclose(out, ref, atol=5e-2, rtol=5e-2)), \
        f"mismatch vs reference (max abs err {max_err:.4g})"

    print("KERNEL_OK")
</pallas_src>

<mosaic_0001>
module attributes {stable_mosaic.version = 11 : i64} {
  func.func @encoder_stack_kernel(%arg0: i32, %arg1: i32, %arg2: memref<2x16x128xf32, #tpu.memory_space<vmem>>, %arg3: memref<16x128xf32, #tpu.memory_space<vmem>>, %arg4: memref<1x128xf32, #tpu.memory_space<vmem>>, %arg5: memref<1x128xf32, #tpu.memory_space<vmem>>, %arg6: memref<2x1x16xf32, #tpu.memory_space<vmem>>, %arg7: memref<1x128x384xbf16, #tpu.memory_space<vmem>>, %arg8: memref<1x128x128xbf16, #tpu.memory_space<vmem>>, %arg9: memref<1x1x128xf32, #tpu.memory_space<vmem>>, %arg10: memref<1x1x128xf32, #tpu.memory_space<vmem>>, %arg11: memref<1x128x256xbf16, #tpu.memory_space<vmem>>, %arg12: memref<1x1x256xf32, #tpu.memory_space<vmem>>, %arg13: memref<1x256x128xbf16, #tpu.memory_space<vmem>>, %arg14: memref<1x1x128xf32, #tpu.memory_space<vmem>>, %arg15: memref<1x1x128xf32, #tpu.memory_space<vmem>>, %arg16: memref<1x1x128xf32, #tpu.memory_space<vmem>>, %arg17: memref<2x16x128xf32, #tpu.memory_space<vmem>>, %arg18: memref<32x128xf32, #tpu.memory_space<vmem>>, %arg19: memref<32x128xbf16, #tpu.memory_space<vmem>>) attributes {dimension_semantics = [#tpu.dimension_semantics<parallel>, #tpu.dimension_semantics<arbitrary>], iteration_bounds = array<i64: 1, 2>, scalar_prefetch = 0 : i64, scratch_operands = 2 : i64, tpu.core_type = #tpu.core_type<tc>, window_params = [{pipeline_mode = #tpu.pipeline_mode<synchronous>, transform_indices = @transform_0, window_bounds = array<i64: 2, 16, 128>}, {pipeline_mode = #tpu.pipeline_mode<synchronous>, transform_indices = @transform_1, window_bounds = array<i64: 16, 128>}, {pipeline_mode = #tpu.pipeline_mode<synchronous>, transform_indices = @transform_2, window_bounds = array<i64: 1, 128>}, {pipeline_mode = #tpu.pipeline_mode<synchronous>, transform_indices = @transform_3, window_bounds = array<i64: 1, 128>}, {pipeline_mode = #tpu.pipeline_mode<synchronous>, transform_indices = @transform_4, window_bounds = array<i64: 2, 1, 16>}, {transform_indices = @transform_5, window_bounds = array<i64: 1, 128, 384>}, {transform_indices = @transform_6, window_bounds = array<i64: 1, 128, 128>}, {transform_indices = @transform_7, window_bounds = array<i64: 1, 1, 128>}, {transform_indices = @transform_8, window_bounds = array<i64: 1, 1, 128>}, {transform_indices = @transform_9, window_bounds = array<i64: 1, 128, 256>}, {transform_indices = @transform_10, window_bounds = array<i64: 1, 1, 256>}, {transform_indices = @transform_11, window_bounds = array<i64: 1, 256, 128>}, {transform_indices = @transform_12, window_bounds = array<i64: 1, 1, 128>}, {transform_indices = @transform_13, window_bounds = array<i64: 1, 1, 128>}, {transform_indices = @transform_14, window_bounds = array<i64: 1, 1, 128>}, {transform_indices = @transform_15, window_bounds = array<i64: 2, 16, 128>}]} {
    %c0_i32 = arith.constant 0 : i32
    %0 = arith.cmpi eq, %arg1, %c0_i32 : i32
    %1 = arith.extui %0 : i1 to i32
    %c0_i32_0 = arith.constant 0 : i32
    %2 = arith.cmpi ne, %1, %c0_i32_0 : i32
    scf.if %2 {
      %c0_100 = arith.constant 0 : index
      %c0_101 = arith.constant 0 : index
      %c0_102 = arith.constant 0 : index
      %260 = vector.load %arg2[%c0_100, %c0_101, %c0_102] : memref<2x16x128xf32, #tpu.memory_space<vmem>>, vector<1x16x128xf32>
      %261 = vector.shape_cast %260 : vector<1x16x128xf32> to vector<16x128xf32>
      %cst_103 = arith.constant 11.3137083 : f32
      %262 = vector.broadcast %cst_103 : f32 to vector<16x128xf32>
      %263 = arith.mulf %261, %262 : vector<16x128xf32>
      %c0_104 = arith.constant 0 : index
      %c0_105 = arith.constant 0 : index
      %264 = vector.load %arg3[%c0_104, %c0_105] : memref<16x128xf32, #tpu.memory_space<vmem>>, vector<16x128xf32>
      %265 = arith.addf %263, %264 : vector<16x128xf32>
      %c0_106 = arith.constant 0 : index
      %c0_107 = arith.constant 0 : index
      %266 = vector.load %arg4[%c0_106, %c0_107] : memref<1x128xf32, #tpu.memory_space<vmem>>, vector<1x128xf32>
      %c0_108 = arith.constant 0 : index
      %c0_109 = arith.constant 0 : index
      %267 = vector.load %arg5[%c0_108, %c0_109] : memref<1x128xf32, #tpu.memory_space<vmem>>, vector<1x128xf32>
      %cst_110 = arith.constant dense<0.000000e+00> : vector<16xf32>
      %268 = vector.multi_reduction <add>, %265, %cst_110 [1] : vector<16x128xf32> to vector<16xf32>
      %269 = vector.shape_cast %268 : vector<16xf32> to vector<16x1xf32>
      %cst_111 = arith.constant 1.280000e+02 : f32
      %270 = vector.broadcast %cst_111 : f32 to vector<16x1xf32>
      %271 = arith.divf %269, %270 : vector<16x1xf32>
      %272 = vector.broadcast %271 : vector<16x1xf32> to vector<16x128xf32>
      %273 = arith.subf %265, %272 : vector<16x128xf32>
      %274 = arith.mulf %273, %273 : vector<16x128xf32>
      %cst_112 = arith.constant dense<0.000000e+00> : vector<16xf32>
      %275 = vector.multi_reduction <add>, %274, %cst_112 [1] : vector<16x128xf32> to vector<16xf32>
      %276 = vector.shape_cast %275 : vector<16xf32> to vector<16x1xf32>
      %cst_113 = arith.constant 1.280000e+02 : f32
      %277 = vector.broadcast %cst_113 : f32 to vector<16x1xf32>
      %278 = arith.divf %276, %277 : vector<16x1xf32>
      %279 = vector.broadcast %271 : vector<16x1xf32> to vector<16x128xf32>
      %280 = arith.subf %265, %279 : vector<16x128xf32>
      %cst_114 = arith.constant 9.99999997E-7 : f32
      %281 = vector.broadcast %cst_114 : f32 to vector<16x1xf32>
      %282 = arith.addf %278, %281 : vector<16x1xf32>
      %283 = math.rsqrt %282 : vector<16x1xf32>
      %284 = vector.broadcast %283 : vector<16x1xf32> to vector<16x128xf32>
      %285 = arith.mulf %280, %284 : vector<16x128xf32>
      %286 = vector.broadcast %266 : vector<1x128xf32> to vector<16x128xf32>
      %287 = arith.mulf %285, %286 : vector<16x128xf32>
      %288 = vector.broadcast %267 : vector<1x128xf32> to vector<16x128xf32>
      %289 = arith.addf %287, %288 : vector<16x128xf32>
      %c0_115 = arith.constant 0 : index
      %c0_116 = arith.constant 0 : index
      %290 = vector.load %arg18[%c0_115, %c0_116] : memref<32x128xf32, #tpu.memory_space<vmem>>, vector<16x128xf32>
      tpu.vector_store %arg18[%c0_115, %c0_116], %289 {strides = array<i32>} : memref<32x128xf32, #tpu.memory_space<vmem>>, vector<16x128xf32>,
      %c1_117 = arith.constant 1 : index
      %c0_118 = arith.constant 0 : index
      %c0_119 = arith.constant 0 : index
      %291 = vector.load %arg2[%c1_117, %c0_118, %c0_119] : memref<2x16x128xf32, #tpu.memory_space<vmem>>, vector<1x16x128xf32>
      %292 = vector.shape_cast %291 : vector<1x16x128xf32> to vector<16x128xf32>
      %cst_120 = arith.constant 11.3137083 : f32
      %293 = vector.broadcast %cst_120 : f32 to vector<16x128xf32>
      %294 = arith.mulf %292, %293 : vector<16x128xf32>
      %c0_121 = arith.constant 0 : index
      %c0_122 = arith.constant 0 : index
      %295 = vector.load %arg3[%c0_121, %c0_122] : memref<16x128xf32, #tpu.memory_space<vmem>>, vector<16x128xf32>
      %296 = arith.addf %294, %295 : vector<16x128xf32>
      %c0_123 = arith.constant 0 : index
      %c0_124 = arith.constant 0 : index
      %297 = vector.load %arg4[%c0_123, %c0_124] : memref<1x128xf32, #tpu.memory_space<vmem>>, vector<1x128xf32>
      %c0_125 = arith.constant 0 : index
      %c0_126 = arith.constant 0 : index
      %298 = vector.load %arg5[%c0_125, %c0_126] : memref<1x128xf32, #tpu.memory_space<vmem>>, vector<1x128xf32>
      %cst_127 = arith.constant dense<0.000000e+00> : vector<16xf32>
      %299 = vector.multi_reduction <add>, %296, %cst_127 [1] : vector<16x128xf32> to vector<16xf32>
      %300 = vector.shape_cast %299 : vector<16xf32> to vector<16x1xf32>
      %cst_128 = arith.constant 1.280000e+02 : f32
      %301 = vector.broadcast %cst_128 : f32 to vector<16x1xf32>
      %302 = arith.divf %300, %301 : vector<16x1xf32>
      %303 = vector.broadcast %302 : vector<16x1xf32> to vector<16x128xf32>
      %304 = arith.subf %296, %303 : vector<16x128xf32>
      %305 = arith.mulf %304, %304 : vector<16x128xf32>
      %cst_129 = arith.constant dense<0.000000e+00> : vector<16xf32>
      %306 = vector.multi_reduction <add>, %305, %cst_129 [1] : vector<16x128xf32> to vector<16xf32>
      %307 = vector.shape_cast %306 : vector<16xf32> to vector<16x1xf32>
      %cst_130 = arith.constant 1.280000e+02 : f32
      %308 = vector.broadcast %cst_130 : f32 to vector<16x1xf32>
      %309 = arith.divf %307, %308 : vector<16x1xf32>
      %310 = vector.broadcast %302 : vector<16x1xf32> to vector<16x128xf32>
      %311 = arith.subf %296, %310 : vector<16x128xf32>
      %cst_131 = arith.constant 9.99999997E-7 : f32
      %312 = vector.broadcast %cst_131 : f32 to vector<16x1xf32>
      %313 = arith.addf %309, %312 : vector<16x1xf32>
      %314 = math.rsqrt %313 : vector<16x1xf32>
      %315 = vector.broadcast %314 : vector<16x1xf32> to vector<16x128xf32>
      %316 = arith.mulf %311, %315 : vector<16x128xf32>
      %317 = vector.broadcast %297 : vector<1x128xf32> to vector<16x128xf32>
      %318 = arith.mulf %316, %317 : vector<16x128xf32>
      %319 = vector.broadcast %298 : vector<1x128xf32> to vector<16x128xf32>
      %320 = arith.addf %318, %319 : vector<16x128xf32>
      %c16_132 = arith.constant 16 : index
      %c0_133 = arith.constant 0 : index
      %321 = vector.load %arg18[%c16_132, %c0_133] : memref<32x128xf32, #tpu.memory_space<vmem>>, vector<16x128xf32>
      tpu.vector_store %arg18[%c16_132, %c0_133], %320 {strides = array<i32>} : memref<32x128xf32, #tpu.memory_space<vmem>>, vector<16x128xf32>,
    } else {
    }
    %c0 = arith.constant 0 : index
    %c0_1 = arith.constant 0 : index
    %3 = vector.load %arg18[%c0, %c0_1] : memref<32x128xf32, #tpu.memory_space<vmem>>, vector<32x128xf32>
    %4 = arith.truncf %3 : vector<32x128xf32> to vector<32x128xbf16>
    %c0_2 = arith.constant 0 : index
    %c0_3 = arith.constant 0 : index
    %c0_4 = arith.constant 0 : index
    %5 = vector.load %arg7[%c0_2, %c0_3, %c0_4] : memref<1x128x384xbf16, #tpu.memory_space<vmem>>, vector<1x128x384xbf16>
    %6 = vector.shape_cast %5 : vector<1x128x384xbf16> to vector<128x384xbf16>
    %cst = arith.constant dense<0.000000e+00> : vector<32x384xf32>
    %7 = tpu.matmul %4, %6, %cst {dimension_numbers = #tpu.dot_dimension_numbers<[1], [0], [0], [1], [0, 0, 1, 1], [], []>} : vector<32x128xbf16>, vector<128x384xbf16>, vector<32x384xf32> -> vector<32x384xf32>
    %8 = vector.extract_strided_slice %7 {offsets = [0, 0], sizes = [32, 128], strides = [1, 1]} : vector<32x384xf32> to vector<32x128xf32>
    %9 = arith.truncf %8 : vector<32x128xf32> to vector<32x128xbf16>
    %10 = vector.extract_strided_slice %7 {offsets = [0, 128], sizes = [32, 128], strides = [1, 1]} : vector<32x384xf32> to vector<32x128xf32>
    %11 = arith.truncf %10 : vector<32x128xf32> to vector<32x128xbf16>
    %12 = vector.extract_strided_slice %7 {offsets = [0, 256], sizes = [32, 128], strides = [1, 1]} : vector<32x384xf32> to vector<32x128xf32>
    %13 = arith.truncf %12 : vector<32x128xf32> to vector<32x128xbf16>
    %c0_5 = arith.constant 0 : index
    %c0_6 = arith.constant 0 : index
    %c0_7 = arith.constant 0 : index
    %14 = vector.load %arg6[%c0_5, %c0_6, %c0_7] : memref<2x1x16xf32, #tpu.memory_space<vmem>>, vector<1x1x16xf32>
    %15 = vector.shape_cast %14 : vector<1x1x16xf32> to vector<1x16xf32>
    %16 = vector.shape_cast %15 : vector<1x16xf32> to vector<1x16xf32>
    %17 = vector.broadcast %16 : vector<1x16xf32> to vector<16x16xf32>
    %18 = vector.extract_strided_slice %9 {offsets = [0, 0], sizes = [16, 128], strides = [1, 1]} : vector<32x128xbf16> to vector<16x128xbf16>
    %19 = vector.extract_strided_slice %11 {offsets = [0, 0], sizes = [16, 128], strides = [1, 1]} : vector<32x128xbf16> to vector<16x128xbf16>
    %20 = vector.extract_strided_slice %13 {offsets = [0, 0], sizes = [16, 128], strides = [1, 1]} : vector<32x128xbf16> to vector<16x128xbf16>
    %21 = vector.extract_strided_slice %18 {offsets = [0, 0], sizes = [16, 32], strides = [1, 1]} : vector<16x128xbf16> to vector<16x32xbf16>
    %22 = vector.extract_strided_slice %19 {offsets = [0, 0], sizes = [16, 32], strides = [1, 1]} : vector<16x128xbf16> to vector<16x32xbf16>
    %23 = vector.extract_strided_slice %20 {offsets = [0, 0], sizes = [16, 32], strides = [1, 1]} : vector<16x128xbf16> to vector<16x32xbf16>
    %cst_8 = arith.constant dense<0.000000e+00> : vector<16x16xf32>
    %24 = tpu.matmul %21, %22, %cst_8 {dimension_numbers = #tpu.dot_dimension_numbers<[1], [1], [0], [0], [0, 0, 1, 0], [], []>} : vector<16x32xbf16>, vector<16x32xbf16>, vector<16x16xf32> -> vector<16x16xf32>
    %25 = arith.addf %24, %17 : vector<16x16xf32>
    %cst_9 = arith.constant dense<0xFF800000> : vector<16xf32>
    %26 = vector.multi_reduction <maximumf>, %25, %cst_9 [1] : vector<16x16xf32> to vector<16xf32>
    %27 = vector.shape_cast %26 : vector<16xf32> to vector<16x1xf32>
    %28 = vector.broadcast %27 : vector<16x1xf32> to vector<16x16xf32>
    %29 = arith.subf %25, %28 : vector<16x16xf32>
    %30 = math.exp %29 : vector<16x16xf32>
    %cst_10 = arith.constant dense<0.000000e+00> : vector<16xf32>
    %31 = vector.multi_reduction <add>, %30, %cst_10 [1] : vector<16x16xf32> to vector<16xf32>
    %32 = vector.shape_cast %31 : vector<16xf32> to vector<16x1xf32>
    %33 = tpu.reciprocal %32 {approx = true} : vector<16x1xf32> -> vector<16x1xf32>
    %34 = vector.broadcast %33 : vector<16x1xf32> to vector<16x16xf32>
    %35 = arith.mulf %30, %34 : vector<16x16xf32>
    %36 = arith.truncf %35 : vector<16x16xf32> to vector<16x16xbf16>
    %cst_11 = arith.constant dense<0.000000e+00> : vector<16x32xf32>
    %37 = tpu.matmul %36, %23, %cst_11 {dimension_numbers = #tpu.dot_dimension_numbers<[1], [0], [0], [1], [0, 0, 1, 1], [], []>} : vector<16x16xbf16>, vector<16x32xbf16>, vector<16x32xf32> -> vector<16x32xf32>
    %38 = arith.truncf %37 : vector<16x32xf32> to vector<16x32xbf16>
    %c0_12 = arith.constant 0 : index
    %c0_13 = arith.constant 0 : index
    %39 = vector.load %arg19[%c0_12, %c0_13] : memref<32x128xbf16, #tpu.memory_space<vmem>>, vector<16x32xbf16>
    tpu.vector_store %arg19[%c0_12, %c0_13], %38 {strides = array<i32>} : memref<32x128xbf16, #tpu.memory_space<vmem>>, vector<16x32xbf16>,
    %40 = vector.extract_strided_slice %18 {offsets = [0, 32], sizes = [16, 32], strides = [1, 1]} : vector<16x128xbf16> to vector<16x32xbf16>
    %41 = vector.extract_strided_slice %19 {offsets = [0, 32], sizes = [16, 32], strides = [1, 1]} : vector<16x128xbf16> to vector<16x32xbf16>
    %42 = vector.extract_strided_slice %20 {offsets = [0, 32], sizes = [16, 32], strides = [1, 1]} : vector<16x128xbf16> to vector<16x32xbf16>
    %cst_14 = arith.constant dense<0.000000e+00> : vector<16x16xf32>
    %43 = tpu.matmul %40, %41, %cst_14 {dimension_numbers = #tpu.dot_dimension_numbers<[1], [1], [0], [0], [0, 0, 1, 0], [], []>} : vector<16x32xbf16>, vector<16x32xbf16>, vector<16x16xf32> -> vector<16x16xf32>
    %44 = arith.addf %43, %17 : vector<16x16xf32>
    %cst_15 = arith.constant dense<0xFF800000> : vector<16xf32>
    %45 = vector.multi_reduction <maximumf>, %44, %cst_15 [1] : vector<16x16xf32> to vector<16xf32>
    %46 = vector.shape_cast %45 : vector<16xf32> to vector<16x1xf32>
    %47 = vector.broadcast %46 : vector<16x1xf32> to vector<16x16xf32>
    %48 = arith.subf %44, %47 : vector<16x16xf32>
    %49 = math.exp %48 : vector<16x16xf32>
    %cst_16 = arith.constant dense<0.000000e+00> : vector<16xf32>
    %50 = vector.multi_reduction <add>, %49, %cst_16 [1] : vector<16x16xf32> to vector<16xf32>
    %51 = vector.shape_cast %50 : vector<16xf32> to vector<16x1xf32>
    %52 = tpu.reciprocal %51 {approx = true} : vector<16x1xf32> -> vector<16x1xf32>
    %53 = vector.broadcast %52 : vector<16x1xf32> to vector<16x16xf32>
    %54 = arith.mulf %49, %53 : vector<16x16xf32>
    %55 = arith.truncf %54 : vector<16x16xf32> to vector<16x16xbf16>
    %cst_17 = arith.constant dense<0.000000e+00> : vector<16x32xf32>
    %56 = tpu.matmul %55, %42, %cst_17 {dimension_numbers = #tpu.dot_dimension_numbers<[1], [0], [0], [1], [0, 0, 1, 1], [], []>} : vector<16x16xbf16>, vector<16x32xbf16>, vector<16x32xf32> -> vector<16x32xf32>
    %57 = arith.truncf %56 : vector<16x32xf32> to vector<16x32xbf16>
    %c0_18 = arith.constant 0 : index
    %c32 = arith.constant 32 : index
    %58 = vector.load %arg19[%c0_18, %c32] : memref<32x128xbf16, #tpu.memory_space<vmem>>, vector<16x32xbf16>
    tpu.vector_store %arg19[%c0_18, %c32], %57 {strides = array<i32>} : memref<32x128xbf16, #tpu.memory_space<vmem>>, vector<16x32xbf16>,
    %59 = vector.extract_strided_slice %18 {offsets = [0, 64], sizes = [16, 32], strides = [1, 1]} : vector<16x128xbf16> to vector<16x32xbf16>
    %60 = vector.extract_strided_slice %19 {offsets = [0, 64], sizes = [16, 32], strides = [1, 1]} : vector<16x128xbf16> to vector<16x32xbf16>
    %61 = vector.extract_strided_slice %20 {offsets = [0, 64], sizes = [16, 32], strides = [1, 1]} : vector<16x128xbf16> to vector<16x32xbf16>
    %cst_19 = arith.constant dense<0.000000e+00> : vector<16x16xf32>
    %62 = tpu.matmul %59, %60, %cst_19 {dimension_numbers = #tpu.dot_dimension_numbers<[1], [1], [0], [0], [0, 0, 1, 0], [], []>} : vector<16x32xbf16>, vector<16x32xbf16>, vector<16x16xf32> -> vector<16x16xf32>
    %63 = arith.addf %62, %17 : vector<16x16xf32>
    %cst_20 = arith.constant dense<0xFF800000> : vector<16xf32>
    %64 = vector.multi_reduction <maximumf>, %63, %cst_20 [1] : vector<16x16xf32> to vector<16xf32>
    %65 = vector.shape_cast %64 : vector<16xf32> to vector<16x1xf32>
    %66 = vector.broadcast %65 : vector<16x1xf32> to vector<16x16xf32>
    %67 = arith.subf %63, %66 : vector<16x16xf32>
    %68 = math.exp %67 : vector<16x16xf32>
    %cst_21 = arith.constant dense<0.000000e+00> : vector<16xf32>
    %69 = vector.multi_reduction <add>, %68, %cst_21 [1] : vector<16x16xf32> to vector<16xf32>
    %70 = vector.shape_cast %69 : vector<16xf32> to vector<16x1xf32>
    %71 = tpu.reciprocal %70 {approx = true} : vector<16x1xf32> -> vector<16x1xf32>
    %72 = vector.broadcast %71 : vector<16x1xf32> to vector<16x16xf32>
    %73 = arith.mulf %68, %72 : vector<16x16xf32>
    %74 = arith.truncf %73 : vector<16x16xf32> to vector<16x16xbf16>
    %cst_22 = arith.constant dense<0.000000e+00> : vector<16x32xf32>
    %75 = tpu.matmul %74, %61, %cst_22 {dimension_numbers = #tpu.dot_dimension_numbers<[1], [0], [0], [1], [0, 0, 1, 1], [], []>} : vector<16x16xbf16>, vector<16x32xbf16>, vector<16x32xf32> -> vector<16x32xf32>
    %76 = arith.truncf %75 : vector<16x32xf32> to vector<16x32xbf16>
    %c0_23 = arith.constant 0 : index
    %c64 = arith.constant 64 : index
    %77 = vector.load %arg19[%c0_23, %c64] : memref<32x128xbf16, #tpu.memory_space<vmem>>, vector<16x32xbf16>
    tpu.vector_store %arg19[%c0_23, %c64], %76 {strides = array<i32>} : memref<32x128xbf16, #tpu.memory_space<vmem>>, vector<16x32xbf16>,
    %78 = vector.extract_strided_slice %18 {offsets = [0, 96], sizes = [16, 32], strides = [1, 1]} : vector<16x128xbf16> to vector<16x32xbf16>
    %79 = vector.extract_strided_slice %19 {offsets = [0, 96], sizes = [16, 32], strides = [1, 1]} : vector<16x128xbf16> to vector<16x32xbf16>
    %80 = vector.extract_strided_slice %20 {offsets = [0, 96], sizes = [16, 32], strides = [1, 1]} : vector<16x128xbf16> to vector<16x32xbf16>
    %cst_24 = arith.constant dense<0.000000e+00> : vector<16x16xf32>
    %81 = tpu.matmul %78, %79, %cst_24 {dimension_numbers = #tpu.dot_dimension_numbers<[1], [1], [0], [0], [0, 0, 1, 0], [], []>} : vector<16x32xbf16>, vector<16x32xbf16>, vector<16x16xf32> -> vector<16x16xf32>
    %82 = arith.addf %81, %17 : vector<16x16xf32>
    %cst_25 = arith.constant dense<0xFF800000> : vector<16xf32>
    %83 = vector.multi_reduction <maximumf>, %82, %cst_25 [1] : vector<16x16xf32> to vector<16xf32>
    %84 = vector.shape_cast %83 : vector<16xf32> to vector<16x1xf32>
    %85 = vector.broadcast %84 : vector<16x1xf32> to vector<16x16xf32>
    %86 = arith.subf %82, %85 : vector<16x16xf32>
    %87 = math.exp %86 : vector<16x16xf32>
    %cst_26 = arith.constant dense<0.000000e+00> : vector<16xf32>
    %88 = vector.multi_reduction <add>, %87, %cst_26 [1] : vector<16x16xf32> to vector<16xf32>
    %89 = vector.shape_cast %88 : vector<16xf32> to vector<16x1xf32>
    %90 = tpu.reciprocal %89 {approx = true} : vector<16x1xf32> -> vector<16x1xf32>
    %91 = vector.broadcast %90 : vector<16x1xf32> to vector<16x16xf32>
    %92 = arith.mulf %87, %91 : vector<16x16xf32>
    %93 = arith.truncf %92 : vector<16x16xf32> to vector<16x16xbf16>
    %cst_27 = arith.constant dense<0.000000e+00> : vector<16x32xf32>
    %94 = tpu.matmul %93, %80, %cst_27 {dimension_numbers = #tpu.dot_dimension_numbers<[1], [0], [0], [1], [0, 0, 1, 1], [], []>} : vector<16x16xbf16>, vector<16x32xbf16>, vector<16x32xf32> -> vector<16x32xf32>
    %95 = arith.truncf %94 : vector<16x32xf32> to vector<16x32xbf16>
    %c0_28 = arith.constant 0 : index
    %c96 = arith.constant 96 : index
    %96 = vector.load %arg19[%c0_28, %c96] : memref<32x128xbf16, #tpu.memory_space<vmem>>, vector<16x32xbf16>
    tpu.vector_store %arg19[%c0_28, %c96], %95 {strides = array<i32>} : memref<32x128xbf16, #tpu.memory_space<vmem>>, vector<16x32xbf16>,
    %c1 = arith.constant 1 : index
    %c0_29 = arith.constant 0 : index
    %c0_30 = arith.constant 0 : index
    %97 = vector.load %arg6[%c1, %c0_29, %c0_30] : memref<2x1x16xf32, #tpu.memory_space<vmem>>, vector<1x1x16xf32>
    %98 = vector.shape_cast %97 : vector<1x1x16xf32> to vector<1x16xf32>
    %99 = vector.shape_cast %98 : vector<1x16xf32> to vector<1x16xf32>
    %100 = vector.broadcast %99 : vector<1x16xf32> to vector<16x16xf32>
    %101 = vector.extract_strided_slice %9 {offsets = [16, 0], sizes = [16, 128], strides = [1, 1]} : vector<32x128xbf16> to vector<16x128xbf16>
    %102 = vector.extract_strided_slice %11 {offsets = [16, 0], sizes = [16, 128], strides = [1, 1]} : vector<32x128xbf16> to vector<16x128xbf16>
    %103 = vector.extract_strided_slice %13 {offsets = [16, 0], sizes = [16, 128], strides = [1, 1]} : vector<32x128xbf16> to vector<16x128xbf16>
    %104 = vector.extract_strided_slice %101 {offsets = [0, 0], sizes = [16, 32], strides = [1, 1]} : vector<16x128xbf16> to vector<16x32xbf16>
    %105 = vector.extract_strided_slice %102 {offsets = [0, 0], sizes = [16, 32], strides = [1, 1]} : vector<16x128xbf16> to vector<16x32xbf16>
    %106 = vector.extract_strided_slice %103 {offsets = [0, 0], sizes = [16, 32], strides = [1, 1]} : vector<16x128xbf16> to vector<16x32xbf16>
    %cst_31 = arith.constant dense<0.000000e+00> : vector<16x16xf32>
    %107 = tpu.matmul %104, %105, %cst_31 {dimension_numbers = #tpu.dot_dimension_numbers<[1], [1], [0], [0], [0, 0, 1, 0], [], []>} : vector<16x32xbf16>, vector<16x32xbf16>, vector<16x16xf32> -> vector<16x16xf32>
    %108 = arith.addf %107, %100 : vector<16x16xf32>
    %cst_32 = arith.constant dense<0xFF800000> : vector<16xf32>
    %109 = vector.multi_reduction <maximumf>, %108, %cst_32 [1] : vector<16x16xf32> to vector<16xf32>
    %110 = vector.shape_cast %109 : vector<16xf32> to vector<16x1xf32>
    %111 = vector.broadcast %110 : vector<16x1xf32> to vector<16x16xf32>
    %112 = arith.subf %108, %111 : vector<16x16xf32>
    %113 = math.exp %112 : vector<16x16xf32>
    %cst_33 = arith.constant dense<0.000000e+00> : vector<16xf32>
    %114 = vector.multi_reduction <add>, %113, %cst_33 [1] : vector<16x16xf32> to vector<16xf32>
    %115 = vector.shape_cast %114 : vector<16xf32> to vector<16x1xf32>
    %116 = tpu.reciprocal %115 {approx = true} : vector<16x1xf32> -> vector<16x1xf32>
    %117 = vector.broadcast %116 : vector<16x1xf32> to vector<16x16xf32>
    %118 = arith.mulf %113, %117 : vector<16x16xf32>
    %119 = arith.truncf %118 : vector<16x16xf32> to vector<16x16xbf16>
    %cst_34 = arith.constant dense<0.000000e+00> : vector<16x32xf32>
    %120 = tpu.matmul %119, %106, %cst_34 {dimension_numbers = #tpu.dot_dimension_numbers<[1], [0], [0], [1], [0, 0, 1, 1], [], []>} : vector<16x16xbf16>, vector<16x32xbf16>, vector<16x32xf32> -> vector<16x32xf32>
    %121 = arith.truncf %120 : vector<16x32xf32> to vector<16x32xbf16>
    %c16 = arith.constant 16 : index
    %c0_35 = arith.constant 0 : index
    %122 = vector.load %arg19[%c16, %c0_35] : memref<32x128xbf16, #tpu.memory_space<vmem>>, vector<16x32xbf16>
    tpu.vector_store %arg19[%c16, %c0_35], %121 {strides = array<i32>} : memref<32x128xbf16, #tpu.memory_space<vmem>>, vector<16x32xbf16>,
    %123 = vector.extract_strided_slice %101 {offsets = [0, 32], sizes = [16, 32], strides = [1, 1]} : vector<16x128xbf16> to vector<16x32xbf16>
    %124 = vector.extract_strided_slice %102 {offsets = [0, 32], sizes = [16, 32], strides = [1, 1]} : vector<16x128xbf16> to vector<16x32xbf16>
    %125 = vector.extract_strided_slice %103 {offsets = [0, 32], sizes = [16, 32], strides = [1, 1]} : vector<16x128xbf16> to vector<16x32xbf16>
    %cst_36 = arith.constant dense<0.000000e+00> : vector<16x16xf32>
    %126 = tpu.matmul %123, %124, %cst_36 {dimension_numbers = #tpu.dot_dimension_numbers<[1], [1], [0], [0], [0, 0, 1, 0], [], []>} : vector<16x32xbf16>, vector<16x32xbf16>, vector<16x16xf32> -> vector<16x16xf32>
    %127 = arith.addf %126, %100 : vector<16x16xf32>
    %cst_37 = arith.constant dense<0xFF800000> : vector<16xf32>
    %128 = vector.multi_reduction <maximumf>, %127, %cst_37 [1] : vector<16x16xf32> to vector<16xf32>
    %129 = vector.shape_cast %128 : vector<16xf32> to vector<16x1xf32>
    %130 = vector.broadcast %129 : vector<16x1xf32> to vector<16x16xf32>
    %131 = arith.subf %127, %130 : vector<16x16xf32>
    %132 = math.exp %131 : vector<16x16xf32>
    %cst_38 = arith.constant dense<0.000000e+00> : vector<16xf32>
    %133 = vector.multi_reduction <add>, %132, %cst_38 [1] : vector<16x16xf32> to vector<16xf32>
    %134 = vector.shape_cast %133 : vector<16xf32> to vector<16x1xf32>
    %135 = tpu.reciprocal %134 {approx = true} : vector<16x1xf32> -> vector<16x1xf32>
    %136 = vector.broadcast %135 : vector<16x1xf32> to vector<16x16xf32>
    %137 = arith.mulf %132, %136 : vector<16x16xf32>
    %138 = arith.truncf %137 : vector<16x16xf32> to vector<16x16xbf16>
    %cst_39 = arith.constant dense<0.000000e+00> : vector<16x32xf32>
    %139 = tpu.matmul %138, %125, %cst_39 {dimension_numbers = #tpu.dot_dimension_numbers<[1], [0], [0], [1], [0, 0, 1, 1], [], []>} : vector<16x16xbf16>, vector<16x32xbf16>, vector<16x32xf32> -> vector<16x32xf32>
    %140 = arith.truncf %139 : vector<16x32xf32> to vector<16x32xbf16>
    %c16_40 = arith.constant 16 : index
    %c32_41 = arith.constant 32 : index
    %141 = vector.load %arg19[%c16_40, %c32_41] : memref<32x128xbf16, #tpu.memory_space<vmem>>, vector<16x32xbf16>
    tpu.vector_store %arg19[%c16_40, %c32_41], %140 {strides = array<i32>} : memref<32x128xbf16, #tpu.memory_space<vmem>>, vector<16x32xbf16>,
    %142 = vector.extract_strided_slice %101 {offsets = [0, 64], sizes = [16, 32], strides = [1, 1]} : vector<16x128xbf16> to vector<16x32xbf16>
    %143 = vector.extract_strided_slice %102 {offsets = [0, 64], sizes = [16, 32], strides = [1, 1]} : vector<16x128xbf16> to vector<16x32xbf16>
    %144 = vector.extract_strided_slice %103 {offsets = [0, 64], sizes = [16, 32], strides = [1, 1]} : vector<16x128xbf16> to vector<16x32xbf16>
    %cst_42 = arith.constant dense<0.000000e+00> : vector<16x16xf32>
    %145 = tpu.matmul %142, %143, %cst_42 {dimension_numbers = #tpu.dot_dimension_numbers<[1], [1], [0], [0], [0, 0, 1, 0], [], []>} : vector<16x32xbf16>, vector<16x32xbf16>, vector<16x16xf32> -> vector<16x16xf32>
    %146 = arith.addf %145, %100 : vector<16x16xf32>
    %cst_43 = arith.constant dense<0xFF800000> : vector<16xf32>
    %147 = vector.multi_reduction <maximumf>, %146, %cst_43 [1] : vector<16x16xf32> to vector<16xf32>
    %148 = vector.shape_cast %147 : vector<16xf32> to vector<16x1xf32>
    %149 = vector.broadcast %148 : vector<16x1xf32> to vector<16x16xf32>
    %150 = arith.subf %146, %149 : vector<16x16xf32>
    %151 = math.exp %150 : vector<16x16xf32>
    %cst_44 = arith.constant dense<0.000000e+00> : vector<16xf32>
    %152 = vector.multi_reduction <add>, %151, %cst_44 [1] : vector<16x16xf32> to vector<16xf32>
    %153 = vector.shape_cast %152 : vector<16xf32> to vector<16x1xf32>
    %154 = tpu.reciprocal %153 {approx = true} : vector<16x1xf32> -> vector<16x1xf32>
    %155 = vector.broadcast %154 : vector<16x1xf32> to vector<16x16xf32>
    %156 = arith.mulf %151, %155 : vector<16x16xf32>
    %157 = arith.truncf %156 : vector<16x16xf32> to vector<16x16xbf16>
    %cst_45 = arith.constant dense<0.000000e+00> : vector<16x32xf32>
    %158 = tpu.matmul %157, %144, %cst_45 {dimension_numbers = #tpu.dot_dimension_numbers<[1], [0], [0], [1], [0, 0, 1, 1], [], []>} : vector<16x16xbf16>, vector<16x32xbf16>, vector<16x32xf32> -> vector<16x32xf32>
    %159 = arith.truncf %158 : vector<16x32xf32> to vector<16x32xbf16>
    %c16_46 = arith.constant 16 : index
    %c64_47 = arith.constant 64 : index
    %160 = vector.load %arg19[%c16_46, %c64_47] : memref<32x128xbf16, #tpu.memory_space<vmem>>, vector<16x32xbf16>
    tpu.vector_store %arg19[%c16_46, %c64_47], %159 {strides = array<i32>} : memref<32x128xbf16, #tpu.memory_space<vmem>>, vector<16x32xbf16>,
    %161 = vector.extract_strided_slice %101 {offsets = [0, 96], sizes = [16, 32], strides = [1, 1]} : vector<16x128xbf16> to vector<16x32xbf16>
    %162 = vector.extract_strided_slice %102 {offsets = [0, 96], sizes = [16, 32], strides = [1, 1]} : vector<16x128xbf16> to vector<16x32xbf16>
    %163 = vector.extract_strided_slice %103 {offsets = [0, 96], sizes = [16, 32], strides = [1, 1]} : vector<16x128xbf16> to vector<16x32xbf16>
    %cst_48 = arith.constant dense<0.000000e+00> : vector<16x16xf32>
    %164 = tpu.matmul %161, %162, %cst_48 {dimension_numbers = #tpu.dot_dimension_numbers<[1], [1], [0], [0], [0, 0, 1, 0], [], []>} : vector<16x32xbf16>, vector<16x32xbf16>, vector<16x16xf32> -> vector<16x16xf32>
    %165 = arith.addf %164, %100 : vector<16x16xf32>
    %cst_49 = arith.constant dense<0xFF800000> : vector<16xf32>
    %166 = vector.multi_reduction <maximumf>, %165, %cst_49 [1] : vector<16x16xf32> to vector<16xf32>
    %167 = vector.shape_cast %166 : vector<16xf32> to vector<16x1xf32>
    %168 = vector.broadcast %167 : vector<16x1xf32> to vector<16x16xf32>
    %169 = arith.subf %165, %168 : vector<16x16xf32>
    %170 = math.exp %169 : vector<16x16xf32>
    %cst_50 = arith.constant dense<0.000000e+00> : vector<16xf32>
    %171 = vector.multi_reduction <add>, %170, %cst_50 [1] : vector<16x16xf32> to vector<16xf32>
    %172 = vector.shape_cast %171 : vector<16xf32> to vector<16x1xf32>
    %173 = tpu.reciprocal %172 {approx = true} : vector<16x1xf32> -> vector<16x1xf32>
    %174 = vector.broadcast %173 : vector<16x1xf32> to vector<16x16xf32>
    %175 = arith.mulf %170, %174 : vector<16x16xf32>
    %176 = arith.truncf %175 : vector<16x16xf32> to vector<16x16xbf16>
    %cst_51 = arith.constant dense<0.000000e+00> : vector<16x32xf32>
    %177 = tpu.matmul %176, %163, %cst_51 {dimension_numbers = #tpu.dot_dimension_numbers<[1], [0], [0], [1], [0, 0, 1, 1], [], []>} : vector<16x16xbf16>, vector<16x32xbf16>, vector<16x32xf32> -> vector<16x32xf32>
    %178 = arith.truncf %177 : vector<16x32xf32> to vector<16x32xbf16>
    %c16_52 = arith.constant 16 : index
    %c96_53 = arith.constant 96 : index
    %179 = vector.load %arg19[%c16_52, %c96_53] : memref<32x128xbf16, #tpu.memory_space<vmem>>, vector<16x32xbf16>
    tpu.vector_store %arg19[%c16_52, %c96_53], %178 {strides = array<i32>} : memref<32x128xbf16, #tpu.memory_space<vmem>>, vector<16x32xbf16>,
    %c0_54 = arith.constant 0 : index
    %c0_55 = arith.constant 0 : index
    %180 = vector.load %arg19[%c0_54, %c0_55] : memref<32x128xbf16, #tpu.memory_space<vmem>>, vector<32x128xbf16>
    %c0_56 = arith.constant 0 : index
    %c0_57 = arith.constant 0 : index
    %c0_58 = arith.constant 0 : index
    %181 = vector.load %arg8[%c0_56, %c0_57, %c0_58] : memref<1x128x128xbf16, #tpu.memory_space<vmem>>, vector<1x128x128xbf16>
    %182 = vector.shape_cast %181 : vector<1x128x128xbf16> to vector<128x128xbf16>
    %cst_59 = arith.constant dense<0.000000e+00> : vector<32x128xf32>
    %183 = tpu.matmul %180, %182, %cst_59 {dimension_numbers = #tpu.dot_dimension_numbers<[1], [0], [0], [1], [0, 0, 1, 1], [], []>} : vector<32x128xbf16>, vector<128x128xbf16>, vector<32x128xf32> -> vector<32x128xf32>
    %184 = arith.addf %183, %3 : vector<32x128xf32>
    %c0_60 = arith.constant 0 : index
    %c0_61 = arith.constant 0 : index
    %c0_62 = arith.constant 0 : index
    %185 = vector.load %arg9[%c0_60, %c0_61, %c0_62] : memref<1x1x128xf32, #tpu.memory_space<vmem>>, vector<1x1x128xf32>
    %186 = vector.shape_cast %185 : vector<1x1x128xf32> to vector<1x128xf32>
    %c0_63 = arith.constant 0 : index
    %c0_64 = arith.constant 0 : index
    %c0_65 = arith.constant 0 : index
    %187 = vector.load %arg10[%c0_63, %c0_64, %c0_65] : memref<1x1x128xf32, #tpu.memory_space<vmem>>, vector<1x1x128xf32>
    %188 = vector.shape_cast %187 : vector<1x1x128xf32> to vector<1x128xf32>
    %cst_66 = arith.constant dense<0.000000e+00> : vector<32xf32>
    %189 = vector.multi_reduction <add>, %184, %cst_66 [1] : vector<32x128xf32> to vector<32xf32>
    %190 = vector.shape_cast %189 : vector<32xf32> to vector<32x1xf32>
    %cst_67 = arith.constant 1.280000e+02 : f32
    %191 = vector.broadcast %cst_67 : f32 to vector<32x1xf32>
    %192 = arith.divf %190, %191 : vector<32x1xf32>
    %193 = vector.broadcast %192 : vector<32x1xf32> to vector<32x128xf32>
    %194 = arith.subf %184, %193 : vector<32x128xf32>
    %195 = arith.mulf %194, %194 : vector<32x128xf32>
    %cst_68 = arith.constant dense<0.000000e+00> : vector<32xf32>
    %196 = vector.multi_reduction <add>, %195, %cst_68 [1] : vector<32x128xf32> to vector<32xf32>
    %197 = vector.shape_cast %196 : vector<32xf32> to vector<32x1xf32>
    %cst_69 = arith.constant 1.280000e+02 : f32
    %198 = vector.broadcast %cst_69 : f32 to vector<32x1xf32>
    %199 = arith.divf %197, %198 : vector<32x1xf32>
    %200 = vector.broadcast %192 : vector<32x1xf32> to vector<32x128xf32>
    %201 = arith.subf %184, %200 : vector<32x128xf32>
    %cst_70 = arith.constant 9.99999997E-7 : f32
    %202 = vector.broadcast %cst_70 : f32 to vector<32x1xf32>
    %203 = arith.addf %199, %202 : vector<32x1xf32>
    %204 = math.rsqrt %203 : vector<32x1xf32>
    %205 = vector.broadcast %204 : vector<32x1xf32> to vector<32x128xf32>
    %206 = arith.mulf %201, %205 : vector<32x128xf32>
    %207 = vector.broadcast %186 : vector<1x128xf32> to vector<32x128xf32>
    %208 = arith.mulf %206, %207 : vector<32x128xf32>
    %209 = vector.broadcast %188 : vector<1x128xf32> to vector<32x128xf32>
    %210 = arith.addf %208, %209 : vector<32x128xf32>
    %211 = arith.truncf %210 : vector<32x128xf32> to vector<32x128xbf16>
    %c0_71 = arith.constant 0 : index
    %c0_72 = arith.constant 0 : index
    %c0_73 = arith.constant 0 : index
    %212 = vector.load %arg11[%c0_71, %c0_72, %c0_73] : memref<1x128x256xbf16, #tpu.memory_space<vmem>>, vector<1x128x256xbf16>
    %213 = vector.shape_cast %212 : vector<1x128x256xbf16> to vector<128x256xbf16>
    %cst_74 = arith.constant dense<0.000000e+00> : vector<32x256xf32>
    %214 = tpu.matmul %211, %213, %cst_74 {dimension_numbers = #tpu.dot_dimension_numbers<[1], [0], [0], [1], [0, 0, 1, 1], [], []>} : vector<32x128xbf16>, vector<128x256xbf16>, vector<32x256xf32> -> vector<32x256xf32>
    %c0_75 = arith.constant 0 : index
    %c0_76 = arith.constant 0 : index
    %c0_77 = arith.constant 0 : index
    %215 = vector.load %arg12[%c0_75, %c0_76, %c0_77] : memref<1x1x256xf32, #tpu.memory_space<vmem>>, vector<1x1x256xf32>
    %216 = vector.shape_cast %215 : vector<1x1x256xf32> to vector<1x256xf32>
    %217 = vector.broadcast %216 : vector<1x256xf32> to vector<32x256xf32>
    %218 = arith.addf %214, %217 : vector<32x256xf32>
    %cst_78 = arith.constant 0.000000e+00 : f32
    %219 = vector.broadcast %cst_78 : f32 to vector<32x256xf32>
    %220 = arith.maximumf %218, %219 : vector<32x256xf32>
    %221 = arith.truncf %220 : vector<32x256xf32> to vector<32x256xbf16>
    %c0_79 = arith.constant 0 : index
    %c0_80 = arith.constant 0 : index
    %c0_81 = arith.constant 0 : index
    %222 = vector.load %arg13[%c0_79, %c0_80, %c0_81] : memref<1x256x128xbf16, #tpu.memory_space<vmem>>, vector<1x256x128xbf16>
    %223 = vector.shape_cast %222 : vector<1x256x128xbf16> to vector<256x128xbf16>
    %cst_82 = arith.constant dense<0.000000e+00> : vector<32x128xf32>
    %224 = tpu.matmul %221, %223, %cst_82 {dimension_numbers = #tpu.dot_dimension_numbers<[1], [0], [0], [1], [0, 0, 1, 1], [], []>} : vector<32x256xbf16>, vector<256x128xbf16>, vector<32x128xf32> -> vector<32x128xf32>
    %c0_83 = arith.constant 0 : index
    %c0_84 = arith.constant 0 : index
    %c0_85 = arith.constant 0 : index
    %225 = vector.load %arg14[%c0_83, %c0_84, %c0_85] : memref<1x1x128xf32, #tpu.memory_space<vmem>>, vector<1x1x128xf32>
    %226 = vector.shape_cast %225 : vector<1x1x128xf32> to vector<1x128xf32>
    %227 = vector.broadcast %226 : vector<1x128xf32> to vector<32x128xf32>
    %228 = arith.addf %224, %227 : vector<32x128xf32>
    %229 = arith.addf %228, %210 : vector<32x128xf32>
    %c0_86 = arith.constant 0 : index
    %c0_87 = arith.constant 0 : index
    %c0_88 = arith.constant 0 : index
    %230 = vector.load %arg15[%c0_86, %c0_87, %c0_88] : memref<1x1x128xf32, #tpu.memory_space<vmem>>, vector<1x1x128xf32>
    %231 = vector.shape_cast %230 : vector<1x1x128xf32> to vector<1x128xf32>
    %c0_89 = arith.constant 0 : index
    %c0_90 = arith.constant 0 : index
    %c0_91 = arith.constant 0 : index
    %232 = vector.load %arg16[%c0_89, %c0_90, %c0_91] : memref<1x1x128xf32, #tpu.memory_space<vmem>>, vector<1x1x128xf32>
    %233 = vector.shape_cast %232 : vector<1x1x128xf32> to vector<1x128xf32>
    %cst_92 = arith.constant dense<0.000000e+00> : vector<32xf32>
    %234 = vector.multi_reduction <add>, %229, %cst_92 [1] : vector<32x128xf32> to vector<32xf32>
    %235 = vector.shape_cast %234 : vector<32xf32> to vector<32x1xf32>
    %cst_93 = arith.constant 1.280000e+02 : f32
    %236 = vector.broadcast %cst_93 : f32 to vector<32x1xf32>
    %237 = arith.divf %235, %236 : vector<32x1xf32>
    %238 = vector.broadcast %237 : vector<32x1xf32> to vector<32x128xf32>
    %239 = arith.subf %229, %238 : vector<32x128xf32>
    %240 = arith.mulf %239, %239 : vector<32x128xf32>
    %cst_94 = arith.constant dense<0.000000e+00> : vector<32xf32>
    %241 = vector.multi_reduction <add>, %240, %cst_94 [1] : vector<32x128xf32> to vector<32xf32>
    %242 = vector.shape_cast %241 : vector<32xf32> to vector<32x1xf32>
    %cst_95 = arith.constant 1.280000e+02 : f32
    %243 = vector.broadcast %cst_95 : f32 to vector<32x1xf32>
    %244 = arith.divf %242, %243 : vector<32x1xf32>
    %245 = vector.broadcast %237 : vector<32x1xf32> to vector<32x128xf32>
    %246 = arith.subf %229, %245 : vector<32x128xf32>
    %cst_96 = arith.constant 9.99999997E-7 : f32
    %247 = vector.broadcast %cst_96 : f32 to vector<32x1xf32>
    %248 = arith.addf %244, %247 : vector<32x1xf32>
    %249 = math.rsqrt %248 : vector<32x1xf32>
    %250 = vector.broadcast %249 : vector<32x1xf32> to vector<32x128xf32>
    %251 = arith.mulf %246, %250 : vector<32x128xf32>
    %252 = vector.broadcast %231 : vector<1x128xf32> to vector<32x128xf32>
    %253 = arith.mulf %251, %252 : vector<32x128xf32>
    %254 = vector.broadcast %233 : vector<1x128xf32> to vector<32x128xf32>
    %255 = arith.addf %253, %254 : vector<32x128xf32>
    %c0_97 = arith.constant 0 : index
    %c0_98 = arith.constant 0 : index
    %256 = vector.load %arg18[%c0_97, %c0_98] : memref<32x128xf32, #tpu.memory_space<vmem>>, vector<32x128xf32>
    tpu.vector_store %arg18[%c0_97, %c0_98], %255 {strides = array<i32>} : memref<32x128xf32, #tpu.memory_space<vmem>>, vector<32x128xf32>,
    %c1_i32 = arith.constant 1 : i32
    %257 = arith.cmpi eq, %arg1, %c1_i32 : i32
    %258 = arith.extui %257 : i1 to i32
    %c0_i32_99 = arith.constant 0 : i32
    %259 = arith.cmpi ne, %258, %c0_i32_99 : i32
    scf.if %259 {
      %260 = vector.extract_strided_slice %255 {offsets = [0, 0], sizes = [16, 128], strides = [1, 1]} : vector<32x128xf32> to vector<16x128xf32>
      %c0_100 = arith.constant 0 : index
      %c0_101 = arith.constant 0 : index
      %c0_102 = arith.constant 0 : index
      %261 = vector.load %arg17[%c0_100, %c0_101, %c0_102] : memref<2x16x128xf32, #tpu.memory_space<vmem>>, vector<1x16x128xf32>
      %262 = vector.shape_cast %261 : vector<1x16x128xf32> to vector<16x128xf32>
      %263 = vector.shape_cast %260 : vector<16x128xf32> to vector<1x16x128xf32>
      tpu.vector_store %arg17[%c0_100, %c0_101, %c0_102], %263 {strides = array<i32>} : memref<2x16x128xf32, #tpu.memory_space<vmem>>, vector<1x16x128xf32>,
      %264 = vector.extract_strided_slice %255 {offsets = [16, 0], sizes = [16, 128], strides = [1, 1]} : vector<32x128xf32> to vector<16x128xf32>
      %c1_103 = arith.constant 1 : index
      %c0_104 = arith.constant 0 : index
      %c0_105 = arith.constant 0 : index
      %265 = vector.load %arg17[%c1_103, %c0_104, %c0_105] : memref<2x16x128xf32, #tpu.memory_space<vmem>>, vector<1x16x128xf32>
      %266 = vector.shape_cast %265 : vector<1x16x128xf32> to vector<16x128xf32>
      %267 = vector.shape_cast %264 : vector<16x128xf32> to vector<1x16x128xf32>
      tpu.vector_store %arg17[%c1_103, %c0_104, %c0_105], %267 {strides = array<i32>} : memref<2x16x128xf32, #tpu.memory_space<vmem>>, vector<1x16x128xf32>,
    } else {
    }
    return
  }
  func.func @transform_0(%arg0: i32, %arg1: i32) -> (i32, i32, i32) {
    %c0_i32 = arith.constant 0 : i32
    %c0_i32_0 = arith.constant 0 : i32
    %c0_i32_1 = arith.constant 0 : i32
    return %arg0, %c0_i32, %c0_i32_0 : i32, i32, i32
  }
  func.func @transform_1(%arg0: i32, %arg1: i32) -> (i32, i32) {
    %c0_i32 = arith.constant 0 : i32
    %c0_i32_0 = arith.constant 0 : i32
    %c0_i32_1 = arith.constant 0 : i32
    return %c0_i32, %c0_i32_0 : i32, i32
  }
  func.func @transform_2(%arg0: i32, %arg1: i32) -> (i32, i32) {
    %c0_i32 = arith.constant 0 : i32
    %c0_i32_0 = arith.constant 0 : i32
    %c0_i32_1 = arith.constant 0 : i32
    return %c0_i32, %c0_i32_0 : i32, i32
  }
  func.func @transform_3(%arg0: i32, %arg1: i32) -> (i32, i32) {
    %c0_i32 = arith.constant 0 : i32
    %c0_i32_0 = arith.constant 0 : i32
    %c0_i32_1 = arith.constant 0 : i32
    return %c0_i32, %c0_i32_0 : i32, i32
  }
  func.func @transform_4(%arg0: i32, %arg1: i32) -> (i32, i32, i32) {
    %c0_i32 = arith.constant 0 : i32
    %c0_i32_0 = arith.constant 0 : i32
    %c0_i32_1 = arith.constant 0 : i32
    return %arg0, %c0_i32, %c0_i32_0 : i32, i32, i32
  }
  func.func @transform_5(%arg0: i32, %arg1: i32) -> (i32, i32, i32) {
    %c0_i32 = arith.constant 0 : i32
    %c0_i32_0 = arith.constant 0 : i32
    %c0_i32_1 = arith.constant 0 : i32
    return %arg1, %c0_i32, %c0_i32_0 : i32, i32, i32
  }
  func.func @transform_6(%arg0: i32, %arg1: i32) -> (i32, i32, i32) {
    %c0_i32 = arith.constant 0 : i32
    %c0_i32_0 = arith.constant 0 : i32
    %c0_i32_1 = arith.constant 0 : i32
    return %arg1, %c0_i32, %c0_i32_0 : i32, i32, i32
  }
  func.func @transform_7(%arg0: i32, %arg1: i32) -> (i32, i32, i32) {
    %c0_i32 = arith.constant 0 : i32
    %c0_i32_0 = arith.constant 0 : i32
    %c0_i32_1 = arith.constant 0 : i32
    return %arg1, %c0_i32, %c0_i32_0 : i32, i32, i32
  }
  func.func @transform_8(%arg0: i32, %arg1: i32) -> (i32, i32, i32) {
    %c0_i32 = arith.constant 0 : i32
    %c0_i32_0 = arith.constant 0 : i32
    %c0_i32_1 = arith.constant 0 : i32
    return %arg1, %c0_i32, %c0_i32_0 : i32, i32, i32
  }
  func.func @transform_9(%arg0: i32, %arg1: i32) -> (i32, i32, i32) {
    %c0_i32 = arith.constant 0 : i32
    %c0_i32_0 = arith.constant 0 : i32
    %c0_i32_1 = arith.constant 0 : i32
    return %arg1, %c0_i32, %c0_i32_0 : i32, i32, i32
  }
  func.func @transform_10(%arg0: i32, %arg1: i32) -> (i32, i32, i32) {
    %c0_i32 = arith.constant 0 : i32
    %c0_i32_0 = arith.constant 0 : i32
    %c0_i32_1 = arith.constant 0 : i32
    return %arg1, %c0_i32, %c0_i32_0 : i32, i32, i32
  }
  func.func @transform_11(%arg0: i32, %arg1: i32) -> (i32, i32, i32) {
    %c0_i32 = arith.constant 0 : i32
    %c0_i32_0 = arith.constant 0 : i32
    %c0_i32_1 = arith.constant 0 : i32
    return %arg1, %c0_i32, %c0_i32_0 : i32, i32, i32
  }
  func.func @transform_12(%arg0: i32, %arg1: i32) -> (i32, i32, i32) {
    %c0_i32 = arith.constant 0 : i32
    %c0_i32_0 = arith.constant 0 : i32
    %c0_i32_1 = arith.constant 0 : i32
    return %arg1, %c0_i32, %c0_i32_0 : i32, i32, i32
  }
  func.func @transform_13(%arg0: i32, %arg1: i32) -> (i32, i32, i32) {
    %c0_i32 = arith.constant 0 : i32
    %c0_i32_0 = arith.constant 0 : i32
    %c0_i32_1 = arith.constant 0 : i32
    return %arg1, %c0_i32, %c0_i32_0 : i32, i32, i32
  }
  func.func @transform_14(%arg0: i32, %arg1: i32) -> (i32, i32, i32) {
    %c0_i32 = arith.constant 0 : i32
    %c0_i32_0 = arith.constant 0 : i32
    %c0_i32_1 = arith.constant 0 : i32
    return %arg1, %c0_i32, %c0_i32_0 : i32, i32, i32
  }
  func.func @transform_15(%arg0: i32, %arg1: i32) -> (i32, i32, i32) {
    %c0_i32 = arith.constant 0 : i32
    %c0_i32_0 = arith.constant 0 : i32
    %c0_i32_1 = arith.constant 0 : i32
    return %arg0, %c0_i32, %c0_i32_0 : i32, i32, i32
  }
}

module attributes {stable_mosaic.version = 11 : i64} {
  func.func @encoder_stack_kernel(%arg0: i32, %arg1: i32, %arg2: memref<2x16x128xf32, #tpu.memory_space<vmem>>, %arg3: memref<16x128xf32, #tpu.memory_space<vmem>>, %arg4: memref<1x128xf32, #tpu.memory_space<vmem>>, %arg5: memref<1x128xf32, #tpu.memory_space<vmem>>, %arg6: memref<2x1x16xf32, #tpu.memory_space<vmem>>, %arg7: memref<1x128x384xbf16, #tpu.memory_space<vmem>>, %arg8: memref<1x128x128xbf16, #tpu.memory_space<vmem>>, %arg9: memref<1x1x128xf32, #tpu.memory_space<vmem>>, %arg10: memref<1x1x128xf32, #tpu.memory_space<vmem>>, %arg11: memref<1x128x256xbf16, #tpu.memory_space<vmem>>, %arg12: memref<1x1x256xf32, #tpu.memory_space<vmem>>, %arg13: memref<1x256x128xbf16, #tpu.memory_space<vmem>>, %arg14: memref<1x1x128xf32, #tpu.memory_space<vmem>>, %arg15: memref<1x1x128xf32, #tpu.memory_space<vmem>>, %arg16: memref<1x1x128xf32, #tpu.memory_space<vmem>>, %arg17: memref<2x16x128xf32, #tpu.memory_space<vmem>>, %arg18: memref<32x128xf32, #tpu.memory_space<vmem>>, %arg19: memref<32x128xbf16, #tpu.memory_space<vmem>>) attributes {dimension_semantics = [#tpu.dimension_semantics<parallel>, #tpu.dimension_semantics<arbitrary>], iteration_bounds = array<i64: 1, 2>, scalar_prefetch = 0 : i64, scratch_operands = 2 : i64, tpu.core_type = #tpu.core_type<tc>, window_params = [{transform_indices = @transform_0, window_bounds = array<i64: 2, 16, 128>}, {pipeline_mode = #tpu.pipeline_mode<synchronous>, transform_indices = @transform_1, window_bounds = array<i64: 16, 128>}, {pipeline_mode = #tpu.pipeline_mode<synchronous>, transform_indices = @transform_2, window_bounds = array<i64: 1, 128>}, {pipeline_mode = #tpu.pipeline_mode<synchronous>, transform_indices = @transform_3, window_bounds = array<i64: 1, 128>}, {transform_indices = @transform_4, window_bounds = array<i64: 2, 1, 16>}, {transform_indices = @transform_5, window_bounds = array<i64: 1, 128, 384>}, {transform_indices = @transform_6, window_bounds = array<i64: 1, 128, 128>}, {transform_indices = @transform_7, window_bounds = array<i64: 1, 1, 128>}, {transform_indices = @transform_8, window_bounds = array<i64: 1, 1, 128>}, {transform_indices = @transform_9, window_bounds = array<i64: 1, 128, 256>}, {transform_indices = @transform_10, window_bounds = array<i64: 1, 1, 256>}, {transform_indices = @transform_11, window_bounds = array<i64: 1, 256, 128>}, {transform_indices = @transform_12, window_bounds = array<i64: 1, 1, 128>}, {transform_indices = @transform_13, window_bounds = array<i64: 1, 1, 128>}, {transform_indices = @transform_14, window_bounds = array<i64: 1, 1, 128>}, {transform_indices = @transform_15, window_bounds = array<i64: 2, 16, 128>}]} {
    %c0_i32 = arith.constant 0 : i32
    %0 = arith.cmpi eq, %arg1, %c0_i32 : i32
    %1 = arith.extui %0 : i1 to i32
    %c0_i32_0 = arith.constant 0 : i32
    %2 = arith.cmpi ne, %1, %c0_i32_0 : i32
    scf.if %2 {
      %c0_100 = arith.constant 0 : index
      %c0_101 = arith.constant 0 : index
      %c0_102 = arith.constant 0 : index
      %260 = vector.load %arg2[%c0_100, %c0_101, %c0_102] : memref<2x16x128xf32, #tpu.memory_space<vmem>>, vector<1x16x128xf32>
      %261 = vector.shape_cast %260 : vector<1x16x128xf32> to vector<16x128xf32>
      %cst_103 = arith.constant 11.3137083 : f32
      %262 = vector.broadcast %cst_103 : f32 to vector<16x128xf32>
      %263 = arith.mulf %261, %262 : vector<16x128xf32>
      %c0_104 = arith.constant 0 : index
      %c0_105 = arith.constant 0 : index
      %264 = vector.load %arg3[%c0_104, %c0_105] : memref<16x128xf32, #tpu.memory_space<vmem>>, vector<16x128xf32>
      %265 = arith.addf %263, %264 : vector<16x128xf32>
      %c0_106 = arith.constant 0 : index
      %c0_107 = arith.constant 0 : index
      %266 = vector.load %arg4[%c0_106, %c0_107] : memref<1x128xf32, #tpu.memory_space<vmem>>, vector<1x128xf32>
      %c0_108 = arith.constant 0 : index
      %c0_109 = arith.constant 0 : index
      %267 = vector.load %arg5[%c0_108, %c0_109] : memref<1x128xf32, #tpu.memory_space<vmem>>, vector<1x128xf32>
      %cst_110 = arith.constant dense<0.000000e+00> : vector<16xf32>
      %268 = vector.multi_reduction <add>, %265, %cst_110 [1] : vector<16x128xf32> to vector<16xf32>
      %269 = vector.shape_cast %268 : vector<16xf32> to vector<16x1xf32>
      %cst_111 = arith.constant 1.280000e+02 : f32
      %270 = vector.broadcast %cst_111 : f32 to vector<16x1xf32>
      %271 = arith.divf %269, %270 : vector<16x1xf32>
      %272 = vector.broadcast %271 : vector<16x1xf32> to vector<16x128xf32>
      %273 = arith.subf %265, %272 : vector<16x128xf32>
      %274 = arith.mulf %273, %273 : vector<16x128xf32>
      %cst_112 = arith.constant dense<0.000000e+00> : vector<16xf32>
      %275 = vector.multi_reduction <add>, %274, %cst_112 [1] : vector<16x128xf32> to vector<16xf32>
      %276 = vector.shape_cast %275 : vector<16xf32> to vector<16x1xf32>
      %cst_113 = arith.constant 1.280000e+02 : f32
      %277 = vector.broadcast %cst_113 : f32 to vector<16x1xf32>
      %278 = arith.divf %276, %277 : vector<16x1xf32>
      %279 = vector.broadcast %271 : vector<16x1xf32> to vector<16x128xf32>
      %280 = arith.subf %265, %279 : vector<16x128xf32>
      %cst_114 = arith.constant 9.99999997E-7 : f32
      %281 = vector.broadcast %cst_114 : f32 to vector<16x1xf32>
      %282 = arith.addf %278, %281 : vector<16x1xf32>
      %283 = math.rsqrt %282 : vector<16x1xf32>
      %284 = vector.broadcast %283 : vector<16x1xf32> to vector<16x128xf32>
      %285 = arith.mulf %280, %284 : vector<16x128xf32>
      %286 = vector.broadcast %266 : vector<1x128xf32> to vector<16x128xf32>
      %287 = arith.mulf %285, %286 : vector<16x128xf32>
      %288 = vector.broadcast %267 : vector<1x128xf32> to vector<16x128xf32>
      %289 = arith.addf %287, %288 : vector<16x128xf32>
      %c0_115 = arith.constant 0 : index
      %c0_116 = arith.constant 0 : index
      %290 = vector.load %arg18[%c0_115, %c0_116] : memref<32x128xf32, #tpu.memory_space<vmem>>, vector<16x128xf32>
      tpu.vector_store %arg18[%c0_115, %c0_116], %289 {strides = array<i32>} : memref<32x128xf32, #tpu.memory_space<vmem>>, vector<16x128xf32>,
      %c1_117 = arith.constant 1 : index
      %c0_118 = arith.constant 0 : index
      %c0_119 = arith.constant 0 : index
      %291 = vector.load %arg2[%c1_117, %c0_118, %c0_119] : memref<2x16x128xf32, #tpu.memory_space<vmem>>, vector<1x16x128xf32>
      %292 = vector.shape_cast %291 : vector<1x16x128xf32> to vector<16x128xf32>
      %cst_120 = arith.constant 11.3137083 : f32
      %293 = vector.broadcast %cst_120 : f32 to vector<16x128xf32>
      %294 = arith.mulf %292, %293 : vector<16x128xf32>
      %c0_121 = arith.constant 0 : index
      %c0_122 = arith.constant 0 : index
      %295 = vector.load %arg3[%c0_121, %c0_122] : memref<16x128xf32, #tpu.memory_space<vmem>>, vector<16x128xf32>
      %296 = arith.addf %294, %295 : vector<16x128xf32>
      %c0_123 = arith.constant 0 : index
      %c0_124 = arith.constant 0 : index
      %297 = vector.load %arg4[%c0_123, %c0_124] : memref<1x128xf32, #tpu.memory_space<vmem>>, vector<1x128xf32>
      %c0_125 = arith.constant 0 : index
      %c0_126 = arith.constant 0 : index
      %298 = vector.load %arg5[%c0_125, %c0_126] : memref<1x128xf32, #tpu.memory_space<vmem>>, vector<1x128xf32>
      %cst_127 = arith.constant dense<0.000000e+00> : vector<16xf32>
      %299 = vector.multi_reduction <add>, %296, %cst_127 [1] : vector<16x128xf32> to vector<16xf32>
      %300 = vector.shape_cast %299 : vector<16xf32> to vector<16x1xf32>
      %cst_128 = arith.constant 1.280000e+02 : f32
      %301 = vector.broadcast %cst_128 : f32 to vector<16x1xf32>
      %302 = arith.divf %300, %301 : vector<16x1xf32>
      %303 = vector.broadcast %302 : vector<16x1xf32> to vector<16x128xf32>
      %304 = arith.subf %296, %303 : vector<16x128xf32>
      %305 = arith.mulf %304, %304 : vector<16x128xf32>
      %cst_129 = arith.constant dense<0.000000e+00> : vector<16xf32>
      %306 = vector.multi_reduction <add>, %305, %cst_129 [1] : vector<16x128xf32> to vector<16xf32>
      %307 = vector.shape_cast %306 : vector<16xf32> to vector<16x1xf32>
      %cst_130 = arith.constant 1.280000e+02 : f32
      %308 = vector.broadcast %cst_130 : f32 to vector<16x1xf32>
      %309 = arith.divf %307, %308 : vector<16x1xf32>
      %310 = vector.broadcast %302 : vector<16x1xf32> to vector<16x128xf32>
      %311 = arith.subf %296, %310 : vector<16x128xf32>
      %cst_131 = arith.constant 9.99999997E-7 : f32
      %312 = vector.broadcast %cst_131 : f32 to vector<16x1xf32>
      %313 = arith.addf %309, %312 : vector<16x1xf32>
      %314 = math.rsqrt %313 : vector<16x1xf32>
      %315 = vector.broadcast %314 : vector<16x1xf32> to vector<16x128xf32>
      %316 = arith.mulf %311, %315 : vector<16x128xf32>
      %317 = vector.broadcast %297 : vector<1x128xf32> to vector<16x128xf32>
      %318 = arith.mulf %316, %317 : vector<16x128xf32>
      %319 = vector.broadcast %298 : vector<1x128xf32> to vector<16x128xf32>
      %320 = arith.addf %318, %319 : vector<16x128xf32>
      %c16_132 = arith.constant 16 : index
      %c0_133 = arith.constant 0 : index
      %321 = vector.load %arg18[%c16_132, %c0_133] : memref<32x128xf32, #tpu.memory_space<vmem>>, vector<16x128xf32>
      tpu.vector_store %arg18[%c16_132, %c0_133], %320 {strides = array<i32>} : memref<32x128xf32, #tpu.memory_space<vmem>>, vector<16x128xf32>,
    } else {
    }
    %c0 = arith.constant 0 : index
    %c0_1 = arith.constant 0 : index
    %3 = vector.load %arg18[%c0, %c0_1] : memref<32x128xf32, #tpu.memory_space<vmem>>, vector<32x128xf32>
    %4 = arith.truncf %3 : vector<32x128xf32> to vector<32x128xbf16>
    %c0_2 = arith.constant 0 : index
    %c0_3 = arith.constant 0 : index
    %c0_4 = arith.constant 0 : index
    %5 = vector.load %arg7[%c0_2, %c0_3, %c0_4] : memref<1x128x384xbf16, #tpu.memory_space<vmem>>, vector<1x128x384xbf16>
    %6 = vector.shape_cast %5 : vector<1x128x384xbf16> to vector<128x384xbf16>
    %cst = arith.constant dense<0.000000e+00> : vector<32x384xf32>
    %7 = tpu.matmul %4, %6, %cst {dimension_numbers = #tpu.dot_dimension_numbers<[1], [0], [0], [1], [0, 0, 1, 1], [], []>} : vector<32x128xbf16>, vector<128x384xbf16>, vector<32x384xf32> -> vector<32x384xf32>
    %8 = vector.extract_strided_slice %7 {offsets = [0, 0], sizes = [32, 128], strides = [1, 1]} : vector<32x384xf32> to vector<32x128xf32>
    %9 = arith.truncf %8 : vector<32x128xf32> to vector<32x128xbf16>
    %10 = vector.extract_strided_slice %7 {offsets = [0, 128], sizes = [32, 128], strides = [1, 1]} : vector<32x384xf32> to vector<32x128xf32>
    %11 = arith.truncf %10 : vector<32x128xf32> to vector<32x128xbf16>
    %12 = vector.extract_strided_slice %7 {offsets = [0, 256], sizes = [32, 128], strides = [1, 1]} : vector<32x384xf32> to vector<32x128xf32>
    %13 = arith.truncf %12 : vector<32x128xf32> to vector<32x128xbf16>
    %c0_5 = arith.constant 0 : index
    %c0_6 = arith.constant 0 : index
    %c0_7 = arith.constant 0 : index
    %14 = vector.load %arg6[%c0_5, %c0_6, %c0_7] : memref<2x1x16xf32, #tpu.memory_space<vmem>>, vector<1x1x16xf32>
    %15 = vector.shape_cast %14 : vector<1x1x16xf32> to vector<1x16xf32>
    %16 = vector.shape_cast %15 : vector<1x16xf32> to vector<1x16xf32>
    %17 = vector.broadcast %16 : vector<1x16xf32> to vector<16x16xf32>
    %18 = vector.extract_strided_slice %9 {offsets = [0, 0], sizes = [16, 128], strides = [1, 1]} : vector<32x128xbf16> to vector<16x128xbf16>
    %19 = vector.extract_strided_slice %11 {offsets = [0, 0], sizes = [16, 128], strides = [1, 1]} : vector<32x128xbf16> to vector<16x128xbf16>
    %20 = vector.extract_strided_slice %13 {offsets = [0, 0], sizes = [16, 128], strides = [1, 1]} : vector<32x128xbf16> to vector<16x128xbf16>
    %21 = vector.extract_strided_slice %18 {offsets = [0, 0], sizes = [16, 32], strides = [1, 1]} : vector<16x128xbf16> to vector<16x32xbf16>
    %22 = vector.extract_strided_slice %19 {offsets = [0, 0], sizes = [16, 32], strides = [1, 1]} : vector<16x128xbf16> to vector<16x32xbf16>
    %23 = vector.extract_strided_slice %20 {offsets = [0, 0], sizes = [16, 32], strides = [1, 1]} : vector<16x128xbf16> to vector<16x32xbf16>
    %cst_8 = arith.constant dense<0.000000e+00> : vector<16x16xf32>
    %24 = tpu.matmul %21, %22, %cst_8 {dimension_numbers = #tpu.dot_dimension_numbers<[1], [1], [0], [0], [0, 0, 1, 0], [], []>} : vector<16x32xbf16>, vector<16x32xbf16>, vector<16x16xf32> -> vector<16x16xf32>
    %25 = arith.addf %24, %17 : vector<16x16xf32>
    %cst_9 = arith.constant dense<0xFF800000> : vector<16xf32>
    %26 = vector.multi_reduction <maximumf>, %25, %cst_9 [1] : vector<16x16xf32> to vector<16xf32>
    %27 = vector.shape_cast %26 : vector<16xf32> to vector<16x1xf32>
    %28 = vector.broadcast %27 : vector<16x1xf32> to vector<16x16xf32>
    %29 = arith.subf %25, %28 : vector<16x16xf32>
    %30 = math.exp %29 : vector<16x16xf32>
    %cst_10 = arith.constant dense<0.000000e+00> : vector<16xf32>
    %31 = vector.multi_reduction <add>, %30, %cst_10 [1] : vector<16x16xf32> to vector<16xf32>
    %32 = vector.shape_cast %31 : vector<16xf32> to vector<16x1xf32>
    %33 = tpu.reciprocal %32 {approx = true} : vector<16x1xf32> -> vector<16x1xf32>
    %34 = vector.broadcast %33 : vector<16x1xf32> to vector<16x16xf32>
    %35 = arith.mulf %30, %34 : vector<16x16xf32>
    %36 = arith.truncf %35 : vector<16x16xf32> to vector<16x16xbf16>
    %cst_11 = arith.constant dense<0.000000e+00> : vector<16x32xf32>
    %37 = tpu.matmul %36, %23, %cst_11 {dimension_numbers = #tpu.dot_dimension_numbers<[1], [0], [0], [1], [0, 0, 1, 1], [], []>} : vector<16x16xbf16>, vector<16x32xbf16>, vector<16x32xf32> -> vector<16x32xf32>
    %38 = arith.truncf %37 : vector<16x32xf32> to vector<16x32xbf16>
    %c0_12 = arith.constant 0 : index
    %c0_13 = arith.constant 0 : index
    %39 = vector.load %arg19[%c0_12, %c0_13] : memref<32x128xbf16, #tpu.memory_space<vmem>>, vector<16x32xbf16>
    tpu.vector_store %arg19[%c0_12, %c0_13], %38 {strides = array<i32>} : memref<32x128xbf16, #tpu.memory_space<vmem>>, vector<16x32xbf16>,
    %40 = vector.extract_strided_slice %18 {offsets = [0, 32], sizes = [16, 32], strides = [1, 1]} : vector<16x128xbf16> to vector<16x32xbf16>
    %41 = vector.extract_strided_slice %19 {offsets = [0, 32], sizes = [16, 32], strides = [1, 1]} : vector<16x128xbf16> to vector<16x32xbf16>
    %42 = vector.extract_strided_slice %20 {offsets = [0, 32], sizes = [16, 32], strides = [1, 1]} : vector<16x128xbf16> to vector<16x32xbf16>
    %cst_14 = arith.constant dense<0.000000e+00> : vector<16x16xf32>
    %43 = tpu.matmul %40, %41, %cst_14 {dimension_numbers = #tpu.dot_dimension_numbers<[1], [1], [0], [0], [0, 0, 1, 0], [], []>} : vector<16x32xbf16>, vector<16x32xbf16>, vector<16x16xf32> -> vector<16x16xf32>
    %44 = arith.addf %43, %17 : vector<16x16xf32>
    %cst_15 = arith.constant dense<0xFF800000> : vector<16xf32>
    %45 = vector.multi_reduction <maximumf>, %44, %cst_15 [1] : vector<16x16xf32> to vector<16xf32>
    %46 = vector.shape_cast %45 : vector<16xf32> to vector<16x1xf32>
    %47 = vector.broadcast %46 : vector<16x1xf32> to vector<16x16xf32>
    %48 = arith.subf %44, %47 : vector<16x16xf32>
    %49 = math.exp %48 : vector<16x16xf32>
    %cst_16 = arith.constant dense<0.000000e+00> : vector<16xf32>
    %50 = vector.multi_reduction <add>, %49, %cst_16 [1] : vector<16x16xf32> to vector<16xf32>
    %51 = vector.shape_cast %50 : vector<16xf32> to vector<16x1xf32>
    %52 = tpu.reciprocal %51 {approx = true} : vector<16x1xf32> -> vector<16x1xf32>
    %53 = vector.broadcast %52 : vector<16x1xf32> to vector<16x16xf32>
    %54 = arith.mulf %49, %53 : vector<16x16xf32>
    %55 = arith.truncf %54 : vector<16x16xf32> to vector<16x16xbf16>
    %cst_17 = arith.constant dense<0.000000e+00> : vector<16x32xf32>
    %56 = tpu.matmul %55, %42, %cst_17 {dimension_numbers = #tpu.dot_dimension_numbers<[1], [0], [0], [1], [0, 0, 1, 1], [], []>} : vector<16x16xbf16>, vector<16x32xbf16>, vector<16x32xf32> -> vector<16x32xf32>
    %57 = arith.truncf %56 : vector<16x32xf32> to vector<16x32xbf16>
    %c0_18 = arith.constant 0 : index
    %c32 = arith.constant 32 : index
    %58 = vector.load %arg19[%c0_18, %c32] : memref<32x128xbf16, #tpu.memory_space<vmem>>, vector<16x32xbf16>
    tpu.vector_store %arg19[%c0_18, %c32], %57 {strides = array<i32>} : memref<32x128xbf16, #tpu.memory_space<vmem>>, vector<16x32xbf16>,
    %59 = vector.extract_strided_slice %18 {offsets = [0, 64], sizes = [16, 32], strides = [1, 1]} : vector<16x128xbf16> to vector<16x32xbf16>
    %60 = vector.extract_strided_slice %19 {offsets = [0, 64], sizes = [16, 32], strides = [1, 1]} : vector<16x128xbf16> to vector<16x32xbf16>
    %61 = vector.extract_strided_slice %20 {offsets = [0, 64], sizes = [16, 32], strides = [1, 1]} : vector<16x128xbf16> to vector<16x32xbf16>
    %cst_19 = arith.constant dense<0.000000e+00> : vector<16x16xf32>
    %62 = tpu.matmul %59, %60, %cst_19 {dimension_numbers = #tpu.dot_dimension_numbers<[1], [1], [0], [0], [0, 0, 1, 0], [], []>} : vector<16x32xbf16>, vector<16x32xbf16>, vector<16x16xf32> -> vector<16x16xf32>
    %63 = arith.addf %62, %17 : vector<16x16xf32>
    %cst_20 = arith.constant dense<0xFF800000> : vector<16xf32>
    %64 = vector.multi_reduction <maximumf>, %63, %cst_20 [1] : vector<16x16xf32> to vector<16xf32>
    %65 = vector.shape_cast %64 : vector<16xf32> to vector<16x1xf32>
    %66 = vector.broadcast %65 : vector<16x1xf32> to vector<16x16xf32>
    %67 = arith.subf %63, %66 : vector<16x16xf32>
    %68 = math.exp %67 : vector<16x16xf32>
    %cst_21 = arith.constant dense<0.000000e+00> : vector<16xf32>
    %69 = vector.multi_reduction <add>, %68, %cst_21 [1] : vector<16x16xf32> to vector<16xf32>
    %70 = vector.shape_cast %69 : vector<16xf32> to vector<16x1xf32>
    %71 = tpu.reciprocal %70 {approx = true} : vector<16x1xf32> -> vector<16x1xf32>
    %72 = vector.broadcast %71 : vector<16x1xf32> to vector<16x16xf32>
    %73 = arith.mulf %68, %72 : vector<16x16xf32>
    %74 = arith.truncf %73 : vector<16x16xf32> to vector<16x16xbf16>
    %cst_22 = arith.constant dense<0.000000e+00> : vector<16x32xf32>
    %75 = tpu.matmul %74, %61, %cst_22 {dimension_numbers = #tpu.dot_dimension_numbers<[1], [0], [0], [1], [0, 0, 1, 1], [], []>} : vector<16x16xbf16>, vector<16x32xbf16>, vector<16x32xf32> -> vector<16x32xf32>
    %76 = arith.truncf %75 : vector<16x32xf32> to vector<16x32xbf16>
    %c0_23 = arith.constant 0 : index
    %c64 = arith.constant 64 : index
    %77 = vector.load %arg19[%c0_23, %c64] : memref<32x128xbf16, #tpu.memory_space<vmem>>, vector<16x32xbf16>
    tpu.vector_store %arg19[%c0_23, %c64], %76 {strides = array<i32>} : memref<32x128xbf16, #tpu.memory_space<vmem>>, vector<16x32xbf16>,
    %78 = vector.extract_strided_slice %18 {offsets = [0, 96], sizes = [16, 32], strides = [1, 1]} : vector<16x128xbf16> to vector<16x32xbf16>
    %79 = vector.extract_strided_slice %19 {offsets = [0, 96], sizes = [16, 32], strides = [1, 1]} : vector<16x128xbf16> to vector<16x32xbf16>
    %80 = vector.extract_strided_slice %20 {offsets = [0, 96], sizes = [16, 32], strides = [1, 1]} : vector<16x128xbf16> to vector<16x32xbf16>
    %cst_24 = arith.constant dense<0.000000e+00> : vector<16x16xf32>
    %81 = tpu.matmul %78, %79, %cst_24 {dimension_numbers = #tpu.dot_dimension_numbers<[1], [1], [0], [0], [0, 0, 1, 0], [], []>} : vector<16x32xbf16>, vector<16x32xbf16>, vector<16x16xf32> -> vector<16x16xf32>
    %82 = arith.addf %81, %17 : vector<16x16xf32>
    %cst_25 = arith.constant dense<0xFF800000> : vector<16xf32>
    %83 = vector.multi_reduction <maximumf>, %82, %cst_25 [1] : vector<16x16xf32> to vector<16xf32>
    %84 = vector.shape_cast %83 : vector<16xf32> to vector<16x1xf32>
    %85 = vector.broadcast %84 : vector<16x1xf32> to vector<16x16xf32>
    %86 = arith.subf %82, %85 : vector<16x16xf32>
    %87 = math.exp %86 : vector<16x16xf32>
    %cst_26 = arith.constant dense<0.000000e+00> : vector<16xf32>
    %88 = vector.multi_reduction <add>, %87, %cst_26 [1] : vector<16x16xf32> to vector<16xf32>
    %89 = vector.shape_cast %88 : vector<16xf32> to vector<16x1xf32>
    %90 = tpu.reciprocal %89 {approx = true} : vector<16x1xf32> -> vector<16x1xf32>
    %91 = vector.broadcast %90 : vector<16x1xf32> to vector<16x16xf32>
    %92 = arith.mulf %87, %91 : vector<16x16xf32>
    %93 = arith.truncf %92 : vector<16x16xf32> to vector<16x16xbf16>
    %cst_27 = arith.constant dense<0.000000e+00> : vector<16x32xf32>
    %94 = tpu.matmul %93, %80, %cst_27 {dimension_numbers = #tpu.dot_dimension_numbers<[1], [0], [0], [1], [0, 0, 1, 1], [], []>} : vector<16x16xbf16>, vector<16x32xbf16>, vector<16x32xf32> -> vector<16x32xf32>
    %95 = arith.truncf %94 : vector<16x32xf32> to vector<16x32xbf16>
    %c0_28 = arith.constant 0 : index
    %c96 = arith.constant 96 : index
    %96 = vector.load %arg19[%c0_28, %c96] : memref<32x128xbf16, #tpu.memory_space<vmem>>, vector<16x32xbf16>
    tpu.vector_store %arg19[%c0_28, %c96], %95 {strides = array<i32>} : memref<32x128xbf16, #tpu.memory_space<vmem>>, vector<16x32xbf16>,
    %c1 = arith.constant 1 : index
    %c0_29 = arith.constant 0 : index
    %c0_30 = arith.constant 0 : index
    %97 = vector.load %arg6[%c1, %c0_29, %c0_30] : memref<2x1x16xf32, #tpu.memory_space<vmem>>, vector<1x1x16xf32>
    %98 = vector.shape_cast %97 : vector<1x1x16xf32> to vector<1x16xf32>
    %99 = vector.shape_cast %98 : vector<1x16xf32> to vector<1x16xf32>
    %100 = vector.broadcast %99 : vector<1x16xf32> to vector<16x16xf32>
    %101 = vector.extract_strided_slice %9 {offsets = [16, 0], sizes = [16, 128], strides = [1, 1]} : vector<32x128xbf16> to vector<16x128xbf16>
    %102 = vector.extract_strided_slice %11 {offsets = [16, 0], sizes = [16, 128], strides = [1, 1]} : vector<32x128xbf16> to vector<16x128xbf16>
    %103 = vector.extract_strided_slice %13 {offsets = [16, 0], sizes = [16, 128], strides = [1, 1]} : vector<32x128xbf16> to vector<16x128xbf16>
    %104 = vector.extract_strided_slice %101 {offsets = [0, 0], sizes = [16, 32], strides = [1, 1]} : vector<16x128xbf16> to vector<16x32xbf16>
    %105 = vector.extract_strided_slice %102 {offsets = [0, 0], sizes = [16, 32], strides = [1, 1]} : vector<16x128xbf16> to vector<16x32xbf16>
    %106 = vector.extract_strided_slice %103 {offsets = [0, 0], sizes = [16, 32], strides = [1, 1]} : vector<16x128xbf16> to vector<16x32xbf16>
    %cst_31 = arith.constant dense<0.000000e+00> : vector<16x16xf32>
    %107 = tpu.matmul %104, %105, %cst_31 {dimension_numbers = #tpu.dot_dimension_numbers<[1], [1], [0], [0], [0, 0, 1, 0], [], []>} : vector<16x32xbf16>, vector<16x32xbf16>, vector<16x16xf32> -> vector<16x16xf32>
    %108 = arith.addf %107, %100 : vector<16x16xf32>
    %cst_32 = arith.constant dense<0xFF800000> : vector<16xf32>
    %109 = vector.multi_reduction <maximumf>, %108, %cst_32 [1] : vector<16x16xf32> to vector<16xf32>
    %110 = vector.shape_cast %109 : vector<16xf32> to vector<16x1xf32>
    %111 = vector.broadcast %110 : vector<16x1xf32> to vector<16x16xf32>
    %112 = arith.subf %108, %111 : vector<16x16xf32>
    %113 = math.exp %112 : vector<16x16xf32>
    %cst_33 = arith.constant dense<0.000000e+00> : vector<16xf32>
    %114 = vector.multi_reduction <add>, %113, %cst_33 [1] : vector<16x16xf32> to vector<16xf32>
    %115 = vector.shape_cast %114 : vector<16xf32> to vector<16x1xf32>
    %116 = tpu.reciprocal %115 {approx = true} : vector<16x1xf32> -> vector<16x1xf32>
    %117 = vector.broadcast %116 : vector<16x1xf32> to vector<16x16xf32>
    %118 = arith.mulf %113, %117 : vector<16x16xf32>
    %119 = arith.truncf %118 : vector<16x16xf32> to vector<16x16xbf16>
    %cst_34 = arith.constant dense<0.000000e+00> : vector<16x32xf32>
    %120 = tpu.matmul %119, %106, %cst_34 {dimension_numbers = #tpu.dot_dimension_numbers<[1], [0], [0], [1], [0, 0, 1, 1], [], []>} : vector<16x16xbf16>, vector<16x32xbf16>, vector<16x32xf32> -> vector<16x32xf32>
    %121 = arith.truncf %120 : vector<16x32xf32> to vector<16x32xbf16>
    %c16 = arith.constant 16 : index
    %c0_35 = arith.constant 0 : index
    %122 = vector.load %arg19[%c16, %c0_35] : memref<32x128xbf16, #tpu.memory_space<vmem>>, vector<16x32xbf16>
    tpu.vector_store %arg19[%c16, %c0_35], %121 {strides = array<i32>} : memref<32x128xbf16, #tpu.memory_space<vmem>>, vector<16x32xbf16>,
    %123 = vector.extract_strided_slice %101 {offsets = [0, 32], sizes = [16, 32], strides = [1, 1]} : vector<16x128xbf16> to vector<16x32xbf16>
    %124 = vector.extract_strided_slice %102 {offsets = [0, 32], sizes = [16, 32], strides = [1, 1]} : vector<16x128xbf16> to vector<16x32xbf16>
    %125 = vector.extract_strided_slice %103 {offsets = [0, 32], sizes = [16, 32], strides = [1, 1]} : vector<16x128xbf16> to vector<16x32xbf16>
    %cst_36 = arith.constant dense<0.000000e+00> : vector<16x16xf32>
    %126 = tpu.matmul %123, %124, %cst_36 {dimension_numbers = #tpu.dot_dimension_numbers<[1], [1], [0], [0], [0, 0, 1, 0], [], []>} : vector<16x32xbf16>, vector<16x32xbf16>, vector<16x16xf32> -> vector<16x16xf32>
    %127 = arith.addf %126, %100 : vector<16x16xf32>
    %cst_37 = arith.constant dense<0xFF800000> : vector<16xf32>
    %128 = vector.multi_reduction <maximumf>, %127, %cst_37 [1] : vector<16x16xf32> to vector<16xf32>
    %129 = vector.shape_cast %128 : vector<16xf32> to vector<16x1xf32>
    %130 = vector.broadcast %129 : vector<16x1xf32> to vector<16x16xf32>
    %131 = arith.subf %127, %130 : vector<16x16xf32>
    %132 = math.exp %131 : vector<16x16xf32>
    %cst_38 = arith.constant dense<0.000000e+00> : vector<16xf32>
    %133 = vector.multi_reduction <add>, %132, %cst_38 [1] : vector<16x16xf32> to vector<16xf32>
    %134 = vector.shape_cast %133 : vector<16xf32> to vector<16x1xf32>
    %135 = tpu.reciprocal %134 {approx = true} : vector<16x1xf32> -> vector<16x1xf32>
    %136 = vector.broadcast %135 : vector<16x1xf32> to vector<16x16xf32>
    %137 = arith.mulf %132, %136 : vector<16x16xf32>
    %138 = arith.truncf %137 : vector<16x16xf32> to vector<16x16xbf16>
    %cst_39 = arith.constant dense<0.000000e+00> : vector<16x32xf32>
    %139 = tpu.matmul %138, %125, %cst_39 {dimension_numbers = #tpu.dot_dimension_numbers<[1], [0], [0], [1], [0, 0, 1, 1], [], []>} : vector<16x16xbf16>, vector<16x32xbf16>, vector<16x32xf32> -> vector<16x32xf32>
    %140 = arith.truncf %139 : vector<16x32xf32> to vector<16x32xbf16>
    %c16_40 = arith.constant 16 : index
    %c32_41 = arith.constant 32 : index
    %141 = vector.load %arg19[%c16_40, %c32_41] : memref<32x128xbf16, #tpu.memory_space<vmem>>, vector<16x32xbf16>
    tpu.vector_store %arg19[%c16_40, %c32_41], %140 {strides = array<i32>} : memref<32x128xbf16, #tpu.memory_space<vmem>>, vector<16x32xbf16>,
    %142 = vector.extract_strided_slice %101 {offsets = [0, 64], sizes = [16, 32], strides = [1, 1]} : vector<16x128xbf16> to vector<16x32xbf16>
    %143 = vector.extract_strided_slice %102 {offsets = [0, 64], sizes = [16, 32], strides = [1, 1]} : vector<16x128xbf16> to vector<16x32xbf16>
    %144 = vector.extract_strided_slice %103 {offsets = [0, 64], sizes = [16, 32], strides = [1, 1]} : vector<16x128xbf16> to vector<16x32xbf16>
    %cst_42 = arith.constant dense<0.000000e+00> : vector<16x16xf32>
    %145 = tpu.matmul %142, %143, %cst_42 {dimension_numbers = #tpu.dot_dimension_numbers<[1], [1], [0], [0], [0, 0, 1, 0], [], []>} : vector<16x32xbf16>, vector<16x32xbf16>, vector<16x16xf32> -> vector<16x16xf32>
    %146 = arith.addf %145, %100 : vector<16x16xf32>
    %cst_43 = arith.constant dense<0xFF800000> : vector<16xf32>
    %147 = vector.multi_reduction <maximumf>, %146, %cst_43 [1] : vector<16x16xf32> to vector<16xf32>
    %148 = vector.shape_cast %147 : vector<16xf32> to vector<16x1xf32>
    %149 = vector.broadcast %148 : vector<16x1xf32> to vector<16x16xf32>
    %150 = arith.subf %146, %149 : vector<16x16xf32>
    %151 = math.exp %150 : vector<16x16xf32>
    %cst_44 = arith.constant dense<0.000000e+00> : vector<16xf32>
    %152 = vector.multi_reduction <add>, %151, %cst_44 [1] : vector<16x16xf32> to vector<16xf32>
    %153 = vector.shape_cast %152 : vector<16xf32> to vector<16x1xf32>
    %154 = tpu.reciprocal %153 {approx = true} : vector<16x1xf32> -> vector<16x1xf32>
    %155 = vector.broadcast %154 : vector<16x1xf32> to vector<16x16xf32>
    %156 = arith.mulf %151, %155 : vector<16x16xf32>
    %157 = arith.truncf %156 : vector<16x16xf32> to vector<16x16xbf16>
    %cst_45 = arith.constant dense<0.000000e+00> : vector<16x32xf32>
    %158 = tpu.matmul %157, %144, %cst_45 {dimension_numbers = #tpu.dot_dimension_numbers<[1], [0], [0], [1], [0, 0, 1, 1], [], []>} : vector<16x16xbf16>, vector<16x32xbf16>, vector<16x32xf32> -> vector<16x32xf32>
    %159 = arith.truncf %158 : vector<16x32xf32> to vector<16x32xbf16>
    %c16_46 = arith.constant 16 : index
    %c64_47 = arith.constant 64 : index
    %160 = vector.load %arg19[%c16_46, %c64_47] : memref<32x128xbf16, #tpu.memory_space<vmem>>, vector<16x32xbf16>
    tpu.vector_store %arg19[%c16_46, %c64_47], %159 {strides = array<i32>} : memref<32x128xbf16, #tpu.memory_space<vmem>>, vector<16x32xbf16>,
    %161 = vector.extract_strided_slice %101 {offsets = [0, 96], sizes = [16, 32], strides = [1, 1]} : vector<16x128xbf16> to vector<16x32xbf16>
    %162 = vector.extract_strided_slice %102 {offsets = [0, 96], sizes = [16, 32], strides = [1, 1]} : vector<16x128xbf16> to vector<16x32xbf16>
    %163 = vector.extract_strided_slice %103 {offsets = [0, 96], sizes = [16, 32], strides = [1, 1]} : vector<16x128xbf16> to vector<16x32xbf16>
    %cst_48 = arith.constant dense<0.000000e+00> : vector<16x16xf32>
    %164 = tpu.matmul %161, %162, %cst_48 {dimension_numbers = #tpu.dot_dimension_numbers<[1], [1], [0], [0], [0, 0, 1, 0], [], []>} : vector<16x32xbf16>, vector<16x32xbf16>, vector<16x16xf32> -> vector<16x16xf32>
    %165 = arith.addf %164, %100 : vector<16x16xf32>
    %cst_49 = arith.constant dense<0xFF800000> : vector<16xf32>
    %166 = vector.multi_reduction <maximumf>, %165, %cst_49 [1] : vector<16x16xf32> to vector<16xf32>
    %167 = vector.shape_cast %166 : vector<16xf32> to vector<16x1xf32>
    %168 = vector.broadcast %167 : vector<16x1xf32> to vector<16x16xf32>
    %169 = arith.subf %165, %168 : vector<16x16xf32>
    %170 = math.exp %169 : vector<16x16xf32>
    %cst_50 = arith.constant dense<0.000000e+00> : vector<16xf32>
    %171 = vector.multi_reduction <add>, %170, %cst_50 [1] : vector<16x16xf32> to vector<16xf32>
    %172 = vector.shape_cast %171 : vector<16xf32> to vector<16x1xf32>
    %173 = tpu.reciprocal %172 {approx = true} : vector<16x1xf32> -> vector<16x1xf32>
    %174 = vector.broadcast %173 : vector<16x1xf32> to vector<16x16xf32>
    %175 = arith.mulf %170, %174 : vector<16x16xf32>
    %176 = arith.truncf %175 : vector<16x16xf32> to vector<16x16xbf16>
    %cst_51 = arith.constant dense<0.000000e+00> : vector<16x32xf32>
    %177 = tpu.matmul %176, %163, %cst_51 {dimension_numbers = #tpu.dot_dimension_numbers<[1], [0], [0], [1], [0, 0, 1, 1], [], []>} : vector<16x16xbf16>, vector<16x32xbf16>, vector<16x32xf32> -> vector<16x32xf32>
    %178 = arith.truncf %177 : vector<16x32xf32> to vector<16x32xbf16>
    %c16_52 = arith.constant 16 : index
    %c96_53 = arith.constant 96 : index
    %179 = vector.load %arg19[%c16_52, %c96_53] : memref<32x128xbf16, #tpu.memory_space<vmem>>, vector<16x32xbf16>
    tpu.vector_store %arg19[%c16_52, %c96_53], %178 {strides = array<i32>} : memref<32x128xbf16, #tpu.memory_space<vmem>>, vector<16x32xbf16>,
    %c0_54 = arith.constant 0 : index
    %c0_55 = arith.constant 0 : index
    %180 = vector.load %arg19[%c0_54, %c0_55] : memref<32x128xbf16, #tpu.memory_space<vmem>>, vector<32x128xbf16>
    %c0_56 = arith.constant 0 : index
    %c0_57 = arith.constant 0 : index
    %c0_58 = arith.constant 0 : index
    %181 = vector.load %arg8[%c0_56, %c0_57, %c0_58] : memref<1x128x128xbf16, #tpu.memory_space<vmem>>, vector<1x128x128xbf16>
    %182 = vector.shape_cast %181 : vector<1x128x128xbf16> to vector<128x128xbf16>
    %cst_59 = arith.constant dense<0.000000e+00> : vector<32x128xf32>
    %183 = tpu.matmul %180, %182, %cst_59 {dimension_numbers = #tpu.dot_dimension_numbers<[1], [0], [0], [1], [0, 0, 1, 1], [], []>} : vector<32x128xbf16>, vector<128x128xbf16>, vector<32x128xf32> -> vector<32x128xf32>
    %184 = arith.addf %183, %3 : vector<32x128xf32>
    %c0_60 = arith.constant 0 : index
    %c0_61 = arith.constant 0 : index
    %c0_62 = arith.constant 0 : index
    %185 = vector.load %arg9[%c0_60, %c0_61, %c0_62] : memref<1x1x128xf32, #tpu.memory_space<vmem>>, vector<1x1x128xf32>
    %186 = vector.shape_cast %185 : vector<1x1x128xf32> to vector<1x128xf32>
    %c0_63 = arith.constant 0 : index
    %c0_64 = arith.constant 0 : index
    %c0_65 = arith.constant 0 : index
    %187 = vector.load %arg10[%c0_63, %c0_64, %c0_65] : memref<1x1x128xf32, #tpu.memory_space<vmem>>, vector<1x1x128xf32>
    %188 = vector.shape_cast %187 : vector<1x1x128xf32> to vector<1x128xf32>
    %cst_66 = arith.constant dense<0.000000e+00> : vector<32xf32>
    %189 = vector.multi_reduction <add>, %184, %cst_66 [1] : vector<32x128xf32> to vector<32xf32>
    %190 = vector.shape_cast %189 : vector<32xf32> to vector<32x1xf32>
    %cst_67 = arith.constant 1.280000e+02 : f32
    %191 = vector.broadcast %cst_67 : f32 to vector<32x1xf32>
    %192 = arith.divf %190, %191 : vector<32x1xf32>
    %193 = vector.broadcast %192 : vector<32x1xf32> to vector<32x128xf32>
    %194 = arith.subf %184, %193 : vector<32x128xf32>
    %195 = arith.mulf %194, %194 : vector<32x128xf32>
    %cst_68 = arith.constant dense<0.000000e+00> : vector<32xf32>
    %196 = vector.multi_reduction <add>, %195, %cst_68 [1] : vector<32x128xf32> to vector<32xf32>
    %197 = vector.shape_cast %196 : vector<32xf32> to vector<32x1xf32>
    %cst_69 = arith.constant 1.280000e+02 : f32
    %198 = vector.broadcast %cst_69 : f32 to vector<32x1xf32>
    %199 = arith.divf %197, %198 : vector<32x1xf32>
    %200 = vector.broadcast %192 : vector<32x1xf32> to vector<32x128xf32>
    %201 = arith.subf %184, %200 : vector<32x128xf32>
    %cst_70 = arith.constant 9.99999997E-7 : f32
    %202 = vector.broadcast %cst_70 : f32 to vector<32x1xf32>
    %203 = arith.addf %199, %202 : vector<32x1xf32>
    %204 = math.rsqrt %203 : vector<32x1xf32>
    %205 = vector.broadcast %204 : vector<32x1xf32> to vector<32x128xf32>
    %206 = arith.mulf %201, %205 : vector<32x128xf32>
    %207 = vector.broadcast %186 : vector<1x128xf32> to vector<32x128xf32>
    %208 = arith.mulf %206, %207 : vector<32x128xf32>
    %209 = vector.broadcast %188 : vector<1x128xf32> to vector<32x128xf32>
    %210 = arith.addf %208, %209 : vector<32x128xf32>
    %211 = arith.truncf %210 : vector<32x128xf32> to vector<32x128xbf16>
    %c0_71 = arith.constant 0 : index
    %c0_72 = arith.constant 0 : index
    %c0_73 = arith.constant 0 : index
    %212 = vector.load %arg11[%c0_71, %c0_72, %c0_73] : memref<1x128x256xbf16, #tpu.memory_space<vmem>>, vector<1x128x256xbf16>
    %213 = vector.shape_cast %212 : vector<1x128x256xbf16> to vector<128x256xbf16>
    %cst_74 = arith.constant dense<0.000000e+00> : vector<32x256xf32>
    %214 = tpu.matmul %211, %213, %cst_74 {dimension_numbers = #tpu.dot_dimension_numbers<[1], [0], [0], [1], [0, 0, 1, 1], [], []>} : vector<32x128xbf16>, vector<128x256xbf16>, vector<32x256xf32> -> vector<32x256xf32>
    %c0_75 = arith.constant 0 : index
    %c0_76 = arith.constant 0 : index
    %c0_77 = arith.constant 0 : index
    %215 = vector.load %arg12[%c0_75, %c0_76, %c0_77] : memref<1x1x256xf32, #tpu.memory_space<vmem>>, vector<1x1x256xf32>
    %216 = vector.shape_cast %215 : vector<1x1x256xf32> to vector<1x256xf32>
    %217 = vector.broadcast %216 : vector<1x256xf32> to vector<32x256xf32>
    %218 = arith.addf %214, %217 : vector<32x256xf32>
    %cst_78 = arith.constant 0.000000e+00 : f32
    %219 = vector.broadcast %cst_78 : f32 to vector<32x256xf32>
    %220 = arith.maximumf %218, %219 : vector<32x256xf32>
    %221 = arith.truncf %220 : vector<32x256xf32> to vector<32x256xbf16>
    %c0_79 = arith.constant 0 : index
    %c0_80 = arith.constant 0 : index
    %c0_81 = arith.constant 0 : index
    %222 = vector.load %arg13[%c0_79, %c0_80, %c0_81] : memref<1x256x128xbf16, #tpu.memory_space<vmem>>, vector<1x256x128xbf16>
    %223 = vector.shape_cast %222 : vector<1x256x128xbf16> to vector<256x128xbf16>
    %cst_82 = arith.constant dense<0.000000e+00> : vector<32x128xf32>
    %224 = tpu.matmul %221, %223, %cst_82 {dimension_numbers = #tpu.dot_dimension_numbers<[1], [0], [0], [1], [0, 0, 1, 1], [], []>} : vector<32x256xbf16>, vector<256x128xbf16>, vector<32x128xf32> -> vector<32x128xf32>
    %c0_83 = arith.constant 0 : index
    %c0_84 = arith.constant 0 : index
    %c0_85 = arith.constant 0 : index
    %225 = vector.load %arg14[%c0_83, %c0_84, %c0_85] : memref<1x1x128xf32, #tpu.memory_space<vmem>>, vector<1x1x128xf32>
    %226 = vector.shape_cast %225 : vector<1x1x128xf32> to vector<1x128xf32>
    %227 = vector.broadcast %226 : vector<1x128xf32> to vector<32x128xf32>
    %228 = arith.addf %224, %227 : vector<32x128xf32>
    %229 = arith.addf %228, %210 : vector<32x128xf32>
    %c0_86 = arith.constant 0 : index
    %c0_87 = arith.constant 0 : index
    %c0_88 = arith.constant 0 : index
    %230 = vector.load %arg15[%c0_86, %c0_87, %c0_88] : memref<1x1x128xf32, #tpu.memory_space<vmem>>, vector<1x1x128xf32>
    %231 = vector.shape_cast %230 : vector<1x1x128xf32> to vector<1x128xf32>
    %c0_89 = arith.constant 0 : index
    %c0_90 = arith.constant 0 : index
    %c0_91 = arith.constant 0 : index
    %232 = vector.load %arg16[%c0_89, %c0_90, %c0_91] : memref<1x1x128xf32, #tpu.memory_space<vmem>>, vector<1x1x128xf32>
    %233 = vector.shape_cast %232 : vector<1x1x128xf32> to vector<1x128xf32>
    %cst_92 = arith.constant dense<0.000000e+00> : vector<32xf32>
    %234 = vector.multi_reduction <add>, %229, %cst_92 [1] : vector<32x128xf32> to vector<32xf32>
    %235 = vector.shape_cast %234 : vector<32xf32> to vector<32x1xf32>
    %cst_93 = arith.constant 1.280000e+02 : f32
    %236 = vector.broadcast %cst_93 : f32 to vector<32x1xf32>
    %237 = arith.divf %235, %236 : vector<32x1xf32>
    %238 = vector.broadcast %237 : vector<32x1xf32> to vector<32x128xf32>
    %239 = arith.subf %229, %238 : vector<32x128xf32>
    %240 = arith.mulf %239, %239 : vector<32x128xf32>
    %cst_94 = arith.constant dense<0.000000e+00> : vector<32xf32>
    %241 = vector.multi_reduction <add>, %240, %cst_94 [1] : vector<32x128xf32> to vector<32xf32>
    %242 = vector.shape_cast %241 : vector<32xf32> to vector<32x1xf32>
    %cst_95 = arith.constant 1.280000e+02 : f32
    %243 = vector.broadcast %cst_95 : f32 to vector<32x1xf32>
    %244 = arith.divf %242, %243 : vector<32x1xf32>
    %245 = vector.broadcast %237 : vector<32x1xf32> to vector<32x128xf32>
    %246 = arith.subf %229, %245 : vector<32x128xf32>
    %cst_96 = arith.constant 9.99999997E-7 : f32
    %247 = vector.broadcast %cst_96 : f32 to vector<32x1xf32>
    %248 = arith.addf %244, %247 : vector<32x1xf32>
    %249 = math.rsqrt %248 : vector<32x1xf32>
    %250 = vector.broadcast %249 : vector<32x1xf32> to vector<32x128xf32>
    %251 = arith.mulf %246, %250 : vector<32x128xf32>
    %252 = vector.broadcast %231 : vector<1x128xf32> to vector<32x128xf32>
    %253 = arith.mulf %251, %252 : vector<32x128xf32>
    %254 = vector.broadcast %233 : vector<1x128xf32> to vector<32x128xf32>
    %255 = arith.addf %253, %254 : vector<32x128xf32>
    %c0_97 = arith.constant 0 : index
    %c0_98 = arith.constant 0 : index
    %256 = vector.load %arg18[%c0_97, %c0_98] : memref<32x128xf32, #tpu.memory_space<vmem>>, vector<32x128xf32>
    tpu.vector_store %arg18[%c0_97, %c0_98], %255 {strides = array<i32>} : memref<32x128xf32, #tpu.memory_space<vmem>>, vector<32x128xf32>,
    %c1_i32 = arith.constant 1 : i32
    %257 = arith.cmpi eq, %arg1, %c1_i32 : i32
    %258 = arith.extui %257 : i1 to i32
    %c0_i32_99 = arith.constant 0 : i32
    %259 = arith.cmpi ne, %258, %c0_i32_99 : i32
    scf.if %259 {
      %260 = vector.extract_strided_slice %255 {offsets = [0, 0], sizes = [16, 128], strides = [1, 1]} : vector<32x128xf32> to vector<16x128xf32>
      %c0_100 = arith.constant 0 : index
      %c0_101 = arith.constant 0 : index
      %c0_102 = arith.constant 0 : index
      %261 = vector.load %arg17[%c0_100, %c0_101, %c0_102] : memref<2x16x128xf32, #tpu.memory_space<vmem>>, vector<1x16x128xf32>
      %262 = vector.shape_cast %261 : vector<1x16x128xf32> to vector<16x128xf32>
      %263 = vector.shape_cast %260 : vector<16x128xf32> to vector<1x16x128xf32>
      tpu.vector_store %arg17[%c0_100, %c0_101, %c0_102], %263 {strides = array<i32>} : memref<2x16x128xf32, #tpu.memory_space<vmem>>, vector<1x16x128xf32>,
      %264 = vector.extract_strided_slice %255 {offsets = [16, 0], sizes = [16, 128], strides = [1, 1]} : vector<32x128xf32> to vector<16x128xf32>
      %c1_103 = arith.constant 1 : index
      %c0_104 = arith.constant 0 : index
      %c0_105 = arith.constant 0 : index
      %265 = vector.load %arg17[%c1_103, %c0_104, %c0_105] : memref<2x16x128xf32, #tpu.memory_space<vmem>>, vector<1x16x128xf32>
      %266 = vector.shape_cast %265 : vector<1x16x128xf32> to vector<16x128xf32>
      %267 = vector.shape_cast %264 : vector<16x128xf32> to vector<1x16x128xf32>
      tpu.vector_store %arg17[%c1_103, %c0_104, %c0_105], %267 {strides = array<i32>} : memref<2x16x128xf32, #tpu.memory_space<vmem>>, vector<1x16x128xf32>,
    } else {
    }
    return
  }
  func.func @transform_0(%arg0: i32, %arg1: i32) -> (i32, i32, i32) {
    %c0_i32 = arith.constant 0 : i32
    %c0_i32_0 = arith.constant 0 : i32
    %c0_i32_1 = arith.constant 0 : i32
    return %arg0, %c0_i32, %c0_i32_0 : i32, i32, i32
  }
  func.func @transform_1(%arg0: i32, %arg1: i32) -> (i32, i32) {
    %c0_i32 = arith.constant 0 : i32
    %c0_i32_0 = arith.constant 0 : i32
    %c0_i32_1 = arith.constant 0 : i32
    return %c0_i32, %c0_i32_0 : i32, i32
  }
  func.func @transform_2(%arg0: i32, %arg1: i32) -> (i32, i32) {
    %c0_i32 = arith.constant 0 : i32
    %c0_i32_0 = arith.constant 0 : i32
    %c0_i32_1 = arith.constant 0 : i32
    return %c0_i32, %c0_i32_0 : i32, i32
  }
  func.func @transform_3(%arg0: i32, %arg1: i32) -> (i32, i32) {
    %c0_i32 = arith.constant 0 : i32
    %c0_i32_0 = arith.constant 0 : i32
    %c0_i32_1 = arith.constant 0 : i32
    return %c0_i32, %c0_i32_0 : i32, i32
  }
  func.func @transform_4(%arg0: i32, %arg1: i32) -> (i32, i32, i32) {
    %c0_i32 = arith.constant 0 : i32
    %c0_i32_0 = arith.constant 0 : i32
    %c0_i32_1 = arith.constant 0 : i32
    return %arg0, %c0_i32, %c0_i32_0 : i32, i32, i32
  }
  func.func @transform_5(%arg0: i32, %arg1: i32) -> (i32, i32, i32) {
    %c0_i32 = arith.constant 0 : i32
    %c0_i32_0 = arith.constant 0 : i32
    %c0_i32_1 = arith.constant 0 : i32
    return %arg1, %c0_i32, %c0_i32_0 : i32, i32, i32
  }
  func.func @transform_6(%arg0: i32, %arg1: i32) -> (i32, i32, i32) {
    %c0_i32 = arith.constant 0 : i32
    %c0_i32_0 = arith.constant 0 : i32
    %c0_i32_1 = arith.constant 0 : i32
    return %arg1, %c0_i32, %c0_i32_0 : i32, i32, i32
  }
  func.func @transform_7(%arg0: i32, %arg1: i32) -> (i32, i32, i32) {
    %c0_i32 = arith.constant 0 : i32
    %c0_i32_0 = arith.constant 0 : i32
    %c0_i32_1 = arith.constant 0 : i32
    return %arg1, %c0_i32, %c0_i32_0 : i32, i32, i32
  }
  func.func @transform_8(%arg0: i32, %arg1: i32) -> (i32, i32, i32) {
    %c0_i32 = arith.constant 0 : i32
    %c0_i32_0 = arith.constant 0 : i32
    %c0_i32_1 = arith.constant 0 : i32
    return %arg1, %c0_i32, %c0_i32_0 : i32, i32, i32
  }
  func.func @transform_9(%arg0: i32, %arg1: i32) -> (i32, i32, i32) {
    %c0_i32 = arith.constant 0 : i32
    %c0_i32_0 = arith.constant 0 : i32
    %c0_i32_1 = arith.constant 0 : i32
    return %arg1, %c0_i32, %c0_i32_0 : i32, i32, i32
  }
  func.func @transform_10(%arg0: i32, %arg1: i32) -> (i32, i32, i32) {
    %c0_i32 = arith.constant 0 : i32
    %c0_i32_0 = arith.constant 0 : i32
    %c0_i32_1 = arith.constant 0 : i32
    return %arg1, %c0_i32, %c0_i32_0 : i32, i32, i32
  }
  func.func @transform_11(%arg0: i32, %arg1: i32) -> (i32, i32, i32) {
    %c0_i32 = arith.constant 0 : i32
    %c0_i32_0 = arith.constant 0 : i32
    %c0_i32_1 = arith.constant 0 : i32
    return %arg1, %c0_i32, %c0_i32_0 : i32, i32, i32
  }
  func.func @transform_12(%arg0: i32, %arg1: i32) -> (i32, i32, i32) {
    %c0_i32 = arith.constant 0 : i32
    %c0_i32_0 = arith.constant 0 : i32
    %c0_i32_1 = arith.constant 0 : i32
    return %arg1, %c0_i32, %c0_i32_0 : i32, i32, i32
  }
  func.func @transform_13(%arg0: i32, %arg1: i32) -> (i32, i32, i32) {
    %c0_i32 = arith.constant 0 : i32
    %c0_i32_0 = arith.constant 0 : i32
    %c0_i32_1 = arith.constant 0 : i32
    return %arg1, %c0_i32, %c0_i32_0 : i32, i32, i32
  }
  func.func @transform_14(%arg0: i32, %arg1: i32) -> (i32, i32, i32) {
    %c0_i32 = arith.constant 0 : i32
    %c0_i32_0 = arith.constant 0 : i32
    %c0_i32_1 = arith.constant 0 : i32
    return %arg1, %c0_i32, %c0_i32_0 : i32, i32, i32
  }
  func.func @transform_15(%arg0: i32, %arg1: i32) -> (i32, i32, i32) {
    %c0_i32 = arith.constant 0 : i32
    %c0_i32_0 = arith.constant 0 : i32
    %c0_i32_1 = arith.constant 0 : i32
    return %arg0, %c0_i32, %c0_i32_0 : i32, i32, i32
  }
}

</mosaic_0001>

<bundles_post_ra>
// kernel: tpu_custom_call.1
= control target key start
LH: loop header
LB: loop body
LE: loop exit
PB: predicated region body
PF: predicated region fallthrough
CT: control target
= control target key end

     0   :  { %s4606_s0 = inlined_call_operand.hbm [shape: f32[2,16,128], index: 0, kind: input, shape index: {}]   ;;  %s4607_s1 = inlined_call_operand.hbm [shape: f32[16,128], index: 1, kind: input, shape index: {}]   ;;  %s4608_s2 = inlined_call_operand.hbm [shape: f32[1,128], index: 2, kind: input, shape index: {}]   ;;  %s4609_s3 = inlined_call_operand.hbm [shape: f32[1,128], index: 3, kind: input, shape index: {}]   ;;  %s4610_s4 = inlined_call_operand.vmem [shape: f32[2,1,16], index: 4, kind: input, shape index: {}]   ;;  %s4611_s5 = inlined_call_operand.hbm [shape: bf16[2,128,384], index: 5, kind: input, shape index: {}]   ;;  %s4612_s6 = inlined_call_operand.hbm [shape: bf16[2,128,128], index: 6, kind: input, shape index: {}]   ;;  %s4613_s7 = inlined_call_operand.hbm [shape: f32[2,1,128], index: 7, kind: input, shape index: {}]   ;;  %s4614_s8 = inlined_call_operand.hbm [shape: f32[2,1,128], index: 8, kind: input, shape index: {}]   ;;  %s4615_s9 = inlined_call_operand.hbm [shape: bf16[2,128,256], index: 9, kind: input, shape index: {}]   ;;  %s4616_s10 = inlined_call_operand.vmem [shape: f32[2,1,256], index: 10, kind: input, shape index: {}]   ;;  %s4617_s11 = inlined_call_operand.hbm [shape: bf16[2,256,128], index: 11, kind: input, shape index: {}]   ;;  %s4618_s12 = inlined_call_operand.vmem [shape: f32[2,1,128], index: 12, kind: input, shape index: {}]   ;;  %s4619_s13 = inlined_call_operand.vmem [shape: f32[2,1,128], index: 13, kind: input, shape index: {}]   ;;  %s4620_s14 = inlined_call_operand.vmem [shape: f32[2,1,128], index: 14, kind: input, shape index: {}]   ;;  %s4621_s15 = inlined_call_operand.hbm [shape: f32[2,16,128], index: 15, kind: output, shape index: {}]  }
   0x1   :  { %4634 = sst [smem:[#allocation29_spill]] %s4606_s0 }
   0x2   :  { %4635 = sst [smem:[#allocation30_spill]] %s4607_s1 }
   0x3   :  { %4636 = sst [smem:[#allocation31_spill]] %s4608_s2 }
   0x4   :  { %4637 = sst [smem:[#allocation32_spill]] %s4609_s3 }
   0x5   :  { %4638 = sst [smem:[#allocation33_spill]] %s4610_s4 }
   0x6   :  { %4639 = sst [smem:[#allocation34_spill]] %s4611_s5 }
   0x7   :  { %4640 = sst [smem:[#allocation35_spill]] %s4612_s6 }
   0x8   :  { %4641 = sst [smem:[#allocation36_spill]] %s4613_s7 }
   0x9   :  { %4642 = sst [smem:[#allocation37_spill]] %s4614_s8 }
   0xa   :  { %4643 = sst [smem:[#allocation38_spill]] %s4615_s9 }
   0xb   :  { %4644 = sst [smem:[#allocation39_spill]] %s4616_s10 }
   0xc   :  { %4645 = sst [smem:[#allocation40_spill]] %s4617_s11 }
   0xd   :  { %4646 = sst [smem:[#allocation41_spill]] %s4618_s12 }
   0xe   :  { %4647 = sst [smem:[#allocation42_spill]] %s4619_s13 }
   0xf   :  { %4648 = sst [smem:[#allocation43_spill]] %s4620_s14 }
  0x10   :  { %4649 = sst [smem:[#allocation44_spill]] %s4621_s15 }
  0x11   :  { %20 = vsyncpa [#allocation5], 0 }
  0x12   :  { %21 = vsyncpa [#allocation8], 0 }
  0x13   :  { %22 = vsyncpa [#allocation11], 0 }
  0x14   :  { %23 = vsyncpa [#allocation6], 0  ;;  %s3893_s18 = smov 0   ;;  %s3895_s19 = smov 0  }
  0x15   :  { %s3897_s20 = smov 0   ;;  %s3899_s21 = smov 0  }
  0x16   :  { %s3901_s22 = smov 0   ;;  %s3903_s23 = smov 0  }
  0x17 LB: > { %4650 = sst [smem:[#allocation24_spill]] %s3777_s19  ;;  %s3922_s24 = sadd.s32 4294967295, %s3793_s23   ;;  %s3793_s23 = sphi %s3903_s23, %s29_s23   ;;  %s3789_s22 = sphi %s3901_s22, %s4694_s22   ;;  %s3785_s21 = sphi %s3899_s21, %s4693_s21   ;;  %s3781_s20 = sphi %s3897_s20, %s4692_s20   ;;  %s3777_s19 = sphi %s3895_s19, %s4691_s19   ;;  %s3773_s18 = sphi %s3893_s18, %s4688_s18  }
  0x18   : > { %4651 = sst [smem:[#allocation25_spill]] %s3785_s21  ;;  %p170_p0 = scmp.ne.s32.totalorder %s3781_s20, %s3777_s19 }
  0x19   : > { %p171_p1 = scmp.eq.s32.totalorder %s3793_s23, 0  ;;  %p176_p2 = scmp.ne.s32.totalorder %s3777_s19, %s3773_s18 }
  0x1a   : > { %p177_p3 = scmp.eq.s32.totalorder %s3922_s24, 0  ;;  %p2770_p5 = scmp.ge.s32.totalorder %s3793_s23, 1 }
  0x1b   : > { %p3930_p4 = por %p171_p1, %p170_p0  ;;  %p447_p7 = scmp.lt.s32.totalorder %s3793_s23, 3 }
  0x1c   : > { %p3937_p6 = por %p177_p3, %p176_p2  ;;  %s4655_s0 = sld [smem:[#allocation29_spill]] }
  0x1d   : > { %p3945_p8 = pnand %p2770_p5, %p447_p7  ;;  %s3795_s17 = smov [#allocation4]  }
  0x1e   : > { %s4653_s27 = scalar_select %p3937_p6, 1, 0 }
  0x1f   : > { %p3187_p9 = pneg %p3945_p8  ;;  %s464_s18 = sshll.u32 %s3795_s17, 4  ;;  %s465_s18 = int_to_ptr.vmem [resolvable:$true] %s464_s18 }
  0x20   : > { %4654 = sst [smem:[#allocation26_spill]] %s4653_s27  ;;  %p3223_p11 = scmp.lt.s32.totalorder %s3793_s23, 2 }
  0x21   : > { %p3953_p10 = pnand %p3187_p9, %p177_p3  ;;  %s4623_s28 = smov 128  }
  0x22   : > { %s462_s30 = sshll.u32 %s4655_s0, 4  ;;  %s4625_s29 = smov 8   ;;  %s463_s30 = int_to_ptr.hbm [resolvable:$true] %s462_s30 }
  0x23   : > { %3190 = dma.hbm_to_vmem [thread:$0]  (!%p3953_p10), %s463_s30, 512, %s465_s18, [#allocation5], %s4623_s28, %s4623_s28, %s4625_s29  }
  0x24   : > { %s38_s0 = sadd.s32 1, %s3789_s22  ;;  %s524_s17 = sand.u32 1, %s3793_s23  }
  0x25   : > { %p39_p12 = scmp.ge.s32.totalorder %s38_s0, 2  ;;  %s3966_s15 = sand.u32 1, %s3781_s20  }
  0x26   : > { %s3153_s4 = smul.u32 192, %s3789_s22  ;;  %s4659_s5 = sld [smem:[#allocation34_spill]] }
  0x27   : > { %s4696_s0 = smov (%p39_p12, %s38_s0), 0  ;;  %s3152_s14 = smul.u32 192, %s3966_s15 }
  0x28   : > { %4658 = sst [smem:[#allocation27_spill]] %s4696_s0  ;;  %s160_s30 = ssub.s32 %s3789_s22, %s4696_s0 }
  0x29   : > { %p161_p13 = scmp.eq.s32.totalorder %s160_s30, 0  ;;  %s528_s28 = scalar_lea.vmem [#allocation12], %s3152_s14 }
  0x2a   : > { %s536_s29 = sshll.u32 %s528_s28, 4  ;;  %s4660_s21 = sadd.s32 1, %s3781_s20  ;;  %s537_s29 = int_to_ptr.vmem [resolvable:$true] %s536_s29 }
  0x2b   : > { %s3980_s27 = scalar_select %p161_p13, %s3781_s20, %s4660_s21  }
  0x2c   : > { %s533_s12 = scalar_lea.hbm %s4659_s5, %s3153_s4  ;;  %p3986_p0 = pnand %p3223_p11, %p3930_p4 }
  0x2d   : > { %s534_s18 = sshll.u32 %s533_s12, 4  ;;  %4661 = sst [smem:[#allocation28_spill]] %s3980_s27  ;;  %s535_s18 = int_to_ptr.hbm [resolvable:$true] %s534_s18 }
  0x2e   : > { %s2778_s4 = sshll.u32 %s3966_s15, 6  ;;  %s3991_s10 = scalar_lea.sflag [#allocation5], %s524_s17 }
  0x2f   : > { %s3798_s12 = smov 192   ;;  %s3799_s13 = smov 12  }
  0x30   : > { %3203 = dma.hbm_to_vmem [thread:$0]  (!%p3986_p0), %s535_s18, 3072, %s537_s29, %s3991_s10, %s3798_s12, %s3798_s12, %s3799_s13  }
  0x31   : > { %s3083_s14 = sshll.u32 %s3789_s22, 6  ;;  %s4663_s6 = sld [smem:[#allocation35_spill]] }
  0x32   : > { %s550_s30 = scalar_lea.vmem [#allocation13], %s2778_s4  ;;  %s4632_s17 = smov 64  }
  0x33   : > { %s558_s5 = sshll.u32 %s550_s30, 4  ;;  %s4633_s27 = smov 4   ;;  %s559_s5 = int_to_ptr.vmem [resolvable:$true] %s558_s5 }
  0x34   : > { %s4664_s7 = sld [smem:[#allocation36_spill]]  ;;  %s571_s13 = scalar_lea.vmem [#allocation14], %s3966_s15 }
  0x35   : > { %s578_s4 = sshll.u32 %s571_s13, 4  ;;  %s4665_s8 = sld [smem:[#allocation37_spill]]  ;;  %s579_s4 = int_to_ptr.vmem [resolvable:$true] %s578_s4 }
  0x36   : > { %s588_s30 = scalar_lea.vmem [#allocation15], %s3966_s15  ;;  %s4666_s1 = sld [smem:[#allocation30_spill]] }
  0x37   : > { %s555_s28 = scalar_lea.hbm %s4663_s6, %s3083_s14  ;;  %s4667_s21 = smov 8  }
  0x38   : > { %s556_s0 = sshll.u32 %s555_s28, 4  ;;  %s4668_s26 = smov 128   ;;  %s557_s0 = int_to_ptr.hbm [resolvable:$true] %s556_s0 }
  0x39   : > { %3206 = dma.hbm_to_vmem [thread:$0]  (!%p3986_p0), %s557_s0, 1024, %s559_s5, %s3991_s10, %s4632_s17, %s4632_s17, %s4633_s27  }
  0x3a   : > { %s574_s12 = scalar_lea.hbm %s4664_s7, %s3789_s22  ;;  %s595_s0 = sshll.u32 %s588_s30, 4  ;;  %s596_s0 = int_to_ptr.vmem [resolvable:$true] %s595_s0 }
  0x3b   : > { %s576_s14 = sshll.u32 %s574_s12, 4  ;;  %s591_s28 = scalar_lea.hbm %s4665_s8, %s3789_s22  ;;  %s577_s14 = int_to_ptr.hbm [resolvable:$true] %s576_s14 }
  0x3c   : > { %3209 = dma.hbm_to_vmem [thread:$0]  (!%p3986_p0), %s577_s14, 16, %s579_s4, %s3991_s10  }
  0x3d   : > { %s593_s5 = sshll.u32 %s591_s28, 4  ;;  %s476_s13 = sshll.u32 %s4666_s1, 4  ;;  %s594_s5 = int_to_ptr.hbm [resolvable:$true] %s593_s5  ;;  %s477_s13 = int_to_ptr.hbm [resolvable:$true] %s476_s13 }
  0x3e   : > { %3212 = dma.hbm_to_vmem [thread:$0]  (!%p3986_p0), %s594_s5, 16, %s596_s0, %s3991_s10  }
  0x3f   : > { %s3802_s12 = smov [#allocation7]   ;;  %s2781_s14 = sshll.u32 %s3966_s15, 7 }
  0x40   : > { %s478_s4 = sshll.u32 %s3802_s12, 4  ;;  %s3084_s28 = sshll.u32 %s3789_s22, 7  ;;  %s479_s4 = int_to_ptr.vmem [resolvable:$true] %s478_s4 }
  0x41   : > { %3193 = dma.hbm_to_vmem [thread:$0]  (!%p3953_p10), %s477_s13, 256, %s479_s4, [#allocation8], %s4668_s26, %s4668_s26, %s4667_s21  }
  0x42   : > { %s606_s30 = scalar_lea.vmem [#allocation16], %s2781_s14  ;;  %s4669_s9 = sld [smem:[#allocation38_spill]] }
  0x43   : > { %s614_s17 = sshll.u32 %s606_s30, 4  ;;  %s4670_s2 = sld [smem:[#allocation31_spill]]  ;;  %s615_s17 = int_to_ptr.vmem [resolvable:$true] %s614_s17 }
  0x44   : > { %s4671_s3 = sld [smem:[#allocation32_spill]]  ;;  %s3803_s29 = smov [#allocation9]  }
  0x45   : > { %s493_s18 = sshll.u32 %s3803_s29, 4  ;;  %s3804_s27 = smov [#allocation10]   ;;  %s494_s18 = int_to_ptr.vmem [resolvable:$true] %s493_s18 }
  0x46   : > { %s4672_s11 = sld [smem:[#allocation40_spill]]  ;;  %s4674_s13 = smov 64  }
  0x48   : > { %s611_s0 = scalar_lea.hbm %s4669_s9, %s3084_s28 }
  0x49   : > { %s612_s5 = sshll.u32 %s611_s0, 4  ;;  %s491_s15 = sshll.u32 %s4670_s2, 4  ;;  %s613_s5 = int_to_ptr.hbm [resolvable:$true] %s612_s5  ;;  %s492_s15 = int_to_ptr.hbm [resolvable:$true] %s491_s15 }
  0x4a   : > { %3215 = dma.hbm_to_vmem [thread:$0]  (!%p3986_p0), %s613_s5, 2048, %s615_s17, %s3991_s10, %s4668_s26, %s4668_s26, %s4667_s21  }
  0x4b   : > { %s503_s30 = sshll.u32 %s4671_s3, 4  ;;  %s505_s0 = sshll.u32 %s3804_s27, 4  ;;  %s504_s30 = int_to_ptr.hbm [resolvable:$true] %s503_s30  ;;  %s506_s0 = int_to_ptr.vmem [resolvable:$true] %s505_s0 }
  0x4c   : > { %3196 = dma.hbm_to_vmem [thread:$0]  (!%p3953_p10), %s492_s15, 16, %s494_s18, [#allocation8]  }
  0x4d   : > { %s640_s2 = scalar_lea.hbm %s4672_s11, %s3084_s28  ;;  %s635_s21 = scalar_lea.vmem [#allocation17], %s2781_s14 }
  0x4e   : > { %3199 = dma.hbm_to_vmem [thread:$0]  (!%p3953_p10), %s504_s30, 16, %s506_s0, [#allocation11]  }
  0x4f   : > { %s641_s17 = sshll.u32 %s640_s2, 4  ;;  %s643_s26 = sshll.u32 %s635_s21, 4  ;;  %s642_s17 = int_to_ptr.hbm [resolvable:$true] %s641_s17  ;;  %s644_s26 = int_to_ptr.vmem [resolvable:$true] %s643_s26 }
  0x50   : > { %s4673_s5 = smov 4   ;;  %673 = sbr.rel (%p3945_p8) target bundleno = 2727 (0xaa7), region = 80 }
  0x51   : > { %3218 = dma.hbm_to_vmem [thread:$0]  (!%p3986_p0), %s642_s17, 2048, %s644_s26, %s3991_s10, %s4674_s13, %s4674_s13, %s4673_s5  }
  0x55   : > { %3752 = dma.done.wait (%p177_p3), [#allocation5], 512  }
  0x56   : > { %3754 = vsyncadd (%p177_p3), [#allocation5], 4294966784 }
  0x57   : > { %3756 = dma.done.wait (%p177_p3), [#allocation8], 272  }
  0x58   : > { %3758 = vsyncadd (%p177_p3), [#allocation8], 4294967024 }
  0x59   : > { %3760 = dma.done.wait (%p177_p3), [#allocation11], 16  }
  0x5a   : > { %3762 = vsyncadd (%p177_p3), [#allocation11], 4294967280  ;;  %s4675_s1 = sld [smem:[#allocation24_spill]]  ;;  %s695_s19 = sand.u32 1, %s3922_s24  }
  0x5b   : > { %s696_s10 = scalar_lea.sflag [#allocation5], %s695_s19 }
  0x60   : > { %s4076_s25 = sand.u32 1, %s4675_s1  }
  0x61   : > { %s3154_s16 = smul.u32 192, %s4076_s25 }
  0x63   : > { %s4079_s14 = scalar_lea.vmem [#allocation12], %s3154_s16 }
  0x64   : > { %3764 = dma.done.wait (%p3937_p6), %s696_s10, 8224  }
  0x65   : > { %3766 = vsyncadd (%p3937_p6), %s696_s10, 4294959072  ;;  %s4677_s28 = sld [smem:[#allocation25_spill]]  ;;  %s2792_s15 = sshll.u32 %s4076_s25, 6 }
  0x66   : > { %s2793_s4 = sshll.u32 %s4076_s25, 7  ;;  %s4678_s0 = sld [smem:[#allocation41_spill]] }
  0x67   : > { %s4679_s26 = sld [smem:[#allocation39_spill]]  ;;  %s4109_s7 = scalar_lea.vmem [#allocation13], %s2792_s15 }
  0x68   : > { %s4680_s2 = sld [smem:[#allocation42_spill]]  ;;  %s718_s8 = scalar_lea.vmem [#allocation14], %s4076_s25 }
  0x69   : > { %s4681_s3 = sld [smem:[#allocation43_spill]]  ;;  %s727_s9 = scalar_lea.vmem [#allocation15], %s4076_s25 }
  0x6a   : > { %s4113_s11 = scalar_lea.vmem [#allocation16], %s2793_s4  ;;  %s4115_s18 = scalar_lea.vmem [#allocation17], %s2793_s4 }
  0x6b   : > { %p836_p1 = scmp.lt.s32.totalorder %s4677_s28, 1  ;;  %p2796_p2 = scmp.ne.s32.totalorder %s4677_s28, 0 }
  0x6d   : > { %s4089_s30 = scalar_select %p836_p1, %s4677_s28, 1 }
  0x6e   : > { %854 = sbr.rel (%p2796_p2) target bundleno = 396 (0x18c), region = 124 }
  0x6f   : > { %s2795_s29 = sshll.u32 %s4089_s30, 1  ;;  %s842_s12 = scalar_lea.vmem %s4678_s0, %s4089_s30 }
  0x70   : > { %s4099_s5 = scalar_lea.vmem %s4679_s26, %s2795_s29  ;;  %s845_s19 = scalar_lea.vmem %s4680_s2, %s4089_s30 }
  0x71   : > { %s848_s6 = scalar_lea.vmem %s4681_s3, %s4089_s30 }
  0x73   : > { %v925_v0 = vld [vmem:[#allocation4 + $0x10] sm:$0xff]  ;;  %v929_v1 = vld [vmem:[#allocation7] sm:$0xff]  ;;  %v926_v5 = vld [vmem:[#allocation4 + $0x18] sm:$0xff]  ;;  %v3805_v14 = vmov 128.0  }
  0x74   : > { %v855_v2 = vld [vmem:[#allocation4] sm:$0xff]  ;;  %v927_v3 = vmul.f32 11.313708, %v925_v0  ;;  %v856_v6 = vld [vmem:[#allocation4 + $0x8] sm:$0xff]  ;;  %v928_v9 = vmul.f32 11.313708, %v926_v5  ;;  %3300 = vrcp.f32 %v3805_v14 }
  0x75   : > { %v857_v4 = vmul.f32 11.313708, %v855_v2  ;;  %v858_v10 = vmul.f32 11.313708, %v856_v6  ;;  %v930_v11 = vld [vmem:[#allocation7 + $0x8] sm:$0xff] }
  0x76   : > { %v931_v7 = vadd.f32 %v929_v1, %v927_v3  ;;  %v932_v12 = vadd.f32 %v930_v11, %v928_v9  ;;  %v3296_v63 = vld [vmem:[#allocation9] ss:$0 sm:$0xff]  ;;  %v3297_v5 = vld [vmem:[#allocation10] ss:$0 sm:$0xff] }
  0x77   : > { %v861_v8 = vadd.f32 %v929_v1, %v857_v4  ;;  %v862_v13 = vadd.f32 %v930_v11, %v858_v10  ;;  %v3298_v3 = vld [vmem:[#allocation9] ss:$0 sm:$0xff]  ;;  %v3299_v9 = vld [vmem:[#allocation10] ss:$0 sm:$0xff] }
  0x78   : > { %935 = vadd.xlane.f32.xlu1 %v931_v7 }
  0x79   : > { %865 = vadd.xlane.f32.xlu0 %v861_v8 }
  0x7a   : > { %v3301_v15 = vpop.eup %3300 }
  0x7b   : > { %v870_v16 = vmul.f32 128.0, %v3301_v15  ;;  %vm874_vm0 = vweird.f32 %v3301_v15 }
  0x7d   : > { %v871_v17 = vsub.f32 1.0, %v870_v16 }
  0x7f   : > { %v872_v18 = vmul.f32 %v3301_v15, %v871_v17 }
  0x80   : > { %937 = vadd.xlane.f32.xlu1 %v932_v12 }
  0x81   : > { %867 = vadd.xlane.f32.xlu0 %v862_v13  ;;  %v873_v19 = vadd.f32 %v3301_v15, %v872_v18 }
  0x83   : > { %v875_v20 = vsel %vm874_vm0, %v3301_v15, %v873_v19 }
  0xeb   : > { %v936_v21 = vpop.xlane.xlu1 %935 }
  0xec   : > { %v866_v22 = vpop.xlane.xlu0 %865  ;;  %v939_v23 = vmul.f32 %v936_v21, %v875_v20 }
  0xed   : > { %v876_v24 = vmul.f32 %v875_v20, %v866_v22 }
  0xee   : > { %v4118_v25 = vsub.f32 %v931_v7, %v939_v23 }
  0xef   : > { %v878_v26 = vsub.f32 %v861_v8, %v876_v24 }
  0xf0   : > { %v943_v27 = vmul.f32 %v4118_v25, %v4118_v25 }
  0xf1   : > { %v880_v28 = vmul.f32 %v878_v26, %v878_v26 }
  0xf2   : > { %945 = vadd.xlane.f32.xlu0 %v943_v27 }
  0xf3   : > { %882 = vadd.xlane.f32.xlu2 %v880_v28  ;;  %v938_v29 = vpop.xlane.xlu1 %937 }
  0xf4   : > { %v868_v30 = vpop.xlane.xlu0 %867  ;;  %v940_v31 = vmul.f32 %v938_v29, %v875_v20 }
  0xf5   : > { %v877_v32 = vmul.f32 %v875_v20, %v868_v30 }
  0xf6   : > { %v4122_v33 = vsub.f32 %v932_v12, %v940_v31 }
  0xf7   : > { %v4124_v34 = vsub.f32 %v862_v13, %v877_v32 }
  0xf8   : > { %v944_v35 = vmul.f32 %v4122_v33, %v4122_v33 }
  0xf9   : > { %v881_v36 = vmul.f32 %v4124_v34, %v4124_v34 }
  0xfa   : > { %947 = vadd.xlane.f32.xlu1 %v944_v35 }
  0xfb   : > { %884 = vadd.xlane.f32.xlu2 %v881_v36 }
 0x165   : > { %v946_v38 = vpop.xlane.xlu0 %945 }
 0x166   : > { %v883_v37 = vpop.xlane.xlu2 %882  ;;  %v949_v40 = vmul.f32 %v946_v38, %v875_v20 }
 0x167   : > { %v886_v39 = vmul.f32 %v883_v37, %v875_v20 }
 0x168   : > { %v951_v42 = vadd.f32 1e-06, %v949_v40 }
 0x169   : > { %v888_v41 = vadd.f32 1e-06, %v886_v39 }
 0x16a   : > { %vm959_vm5 = vweird.f32 %v951_v42 }
 0x16b   : > { %3302 = vrsqrt.f32 %v888_v41  ;;  %vm896_vm3 = vweird.f32 %v888_v41 }
 0x16c   : > { %3304 = vrsqrt.f32 %v951_v42 }
 0x16d   : > { %v948_v43 = vpop.xlane.xlu1 %947 }
 0x16e   : > { %v885_v44 = vpop.xlane.xlu2 %884  ;;  %v950_v45 = vmul.f32 %v948_v43, %v875_v20 }
 0x16f   : > { %v887_v46 = vmul.f32 %v885_v44, %v875_v20 }
 0x170   : > { %v952_v48 = vadd.f32 1e-06, %v950_v45 }
 0x171   : > { %v3303_v47 = vpop.eup %3302  ;;  %v889_v49 = vadd.f32 1e-06, %v887_v46 }
 0x172   : > { %v3305_v50 = vpop.eup %3304  ;;  %v891_v51 = vmul.f32 %v3303_v47, %v888_v41  ;;  %3306 = vrsqrt.f32 %v952_v48  ;;  %vm897_vm1 = vweird.f32 %v3303_v47  ;;  %vm969_vm9 = vweird.f32 %v952_v48 }
 0x173   : > { %v954_v52 = vmul.f32 %v3305_v50, %v951_v42  ;;  %3308 = vrsqrt.f32 %v889_v49  ;;  %vm960_vm2 = vweird.f32 %v3305_v50  ;;  %vm898_vm4 = vmor %vm896_vm3, %vm897_vm1  ;;  %vm906_vm11 = vweird.f32 %v889_v49 }
 0x174   : > { %v892_v53 = vmul.f32 %v3303_v47, %v891_v51  ;;  %vm961_vm6 = vmor %vm959_vm5, %vm960_vm2 }
 0x175   : > { %v955_v54 = vmul.f32 %v3305_v50, %v954_v52 }
 0x176   : > { %v893_v55 = vmul.f32 0.5, %v892_v53 }
 0x177   : > { %v956_v56 = vmul.f32 0.5, %v955_v54 }
 0x178   : > { %v894_v57 = vsub.f32 1.5, %v893_v55  ;;  %v3307_v58 = vpop.eup %3306 }
 0x179   : > { %v957_v59 = vsub.f32 1.5, %v956_v56  ;;  %v3309_v60 = vpop.eup %3308  ;;  %v964_v62 = vmul.f32 %v3307_v58, %v952_v48  ;;  %vm970_vm7 = vweird.f32 %v3307_v58 }
 0x17a   : > { %v895_v61 = vmul.f32 %v3303_v47, %v894_v57  ;;  %v901_v1 = vmul.f32 %v3309_v60, %v889_v49  ;;  %vm907_vm8 = vweird.f32 %v3309_v60  ;;  %vm971_vm10 = vmor %vm969_vm9, %vm970_vm7 }
 0x17b   : > { %v958_v0 = vmul.f32 %v3305_v50, %v957_v59  ;;  %v965_v4 = vmul.f32 %v3307_v58, %v964_v62  ;;  %vm908_vm12 = vmor %vm906_vm11, %vm907_vm8 }
 0x17c   : > { %v899_v2 = vsel %vm898_vm4, %v3303_v47, %v895_v61  ;;  %v902_v8 = vmul.f32 %v3309_v60, %v901_v1 }
 0x17d   : > { %v910_v6 = vmul.f32 %v899_v2, %v878_v26  ;;  %v962_v7 = vsel %vm961_vm6, %v3305_v50, %v958_v0  ;;  %v966_v11 = vmul.f32 0.5, %v965_v4 }
 0x17e   : > { %v973_v10 = vmul.f32 %v962_v7, %v4118_v25  ;;  %v903_v13 = vmul.f32 0.5, %v902_v8 }
 0x17f   : > { %v915_v12 = vmul.f32 %v3296_v63, %v910_v6  ;;  %v967_v15 = vsub.f32 1.5, %v966_v11 }
 0x180   : > { %v978_v14 = vmul.f32 %v3298_v3, %v973_v10  ;;  %v904_v17 = vsub.f32 1.5, %v903_v13 }
 0x181   : > { %v920_v16 = vadd.f32 %v3297_v5, %v915_v12  ;;  %v968_v19 = vmul.f32 %v3307_v58, %v967_v15 }
 0x182   : > { %v983_v18 = vadd.f32 %v3299_v9, %v978_v14  ;;  %v905_v20 = vmul.f32 %v3309_v60, %v904_v17 }
 0x183   : > { %922 = vst [vmem:[#allocation2 + $0x10] sm:$0xff] %v920_v16  ;;  %v972_v21 = vsel %vm971_vm10, %v3307_v58, %v968_v19 }
 0x184   : > { %985 = vst [vmem:[#allocation2 + $0x18] sm:$0xff] %v983_v18  ;;  %v974_v22 = vmul.f32 %v972_v21, %v4122_v33  ;;  %v909_v23 = vsel %vm908_vm12, %v3309_v60, %v905_v20 }
 0x185   : > { %v911_v24 = vmul.f32 %v909_v23, %v4124_v34 }
 0x186   : > { %v979_v25 = vmul.f32 %v3298_v3, %v974_v22 }
 0x187   : > { %v916_v26 = vmul.f32 %v3296_v63, %v911_v24 }
 0x188   : > { %v984_v27 = vadd.f32 %v3299_v9, %v979_v25 }
 0x189   : > { %v921_v28 = vadd.f32 %v3297_v5, %v916_v26 }
 0x18a   : > { %986 = vst [vmem:[#allocation2 + $0x8] sm:$0xff] %v984_v27 }
 0x18b   : > { %923 = vst [vmem:[#allocation2] sm:$0xff] %v921_v28 }
 0x18c PF: > { %v2883_v29 = vld [vmem:[%s4079_s14 + $0xa8] sm:$0xf]  ;;  %v3108_v30 = vld [vmem:[%s4079_s14 + $0xb0] sm:$0xf0]  ;;  %v3107_v31 = vld [vmem:[%s4079_s14 + $0xac] sm:$0xf] }
 0x18d   : > { %v2884_v32 = vor.u32 %v3108_v30, %v2883_v29  ;;  %v2885_v33 = vld [vmem:[%s4079_s14 + $0xb4] sm:$0xf0]  ;;  %v2871_v34 = vld [vmem:[%s4079_s14 + $0x90] sm:$0xf]  ;;  %v3105_v35 = vld [vmem:[%s4079_s14 + $0x98] sm:$0xf0] }
 0x18e   : > { %v2888_v36 = vor.u32 %v3107_v31, %v2885_v33  ;;  %v3104_v37 = vld [vmem:[%s4079_s14 + $0x94] sm:$0xf]  ;;  %v2873_v38 = vld [vmem:[%s4079_s14 + $0x9c] sm:$0xf0]  ;;  %v2872_v39 = vor.u32 %v3105_v35, %v2871_v34  ;;  %v2859_v41 = vld [vmem:[%s4079_s14 + $0x78] sm:$0xf] }
 0x18f   : > { %1153 = vmatpush.bf16.msra.mxu0 %v2884_v32  ;;  %v2876_v40 = vor.u32 %v3104_v37, %v2873_v38  ;;  %v3102_v42 = vld [vmem:[%s4079_s14 + $0x80] sm:$0xf0]  ;;  %v3101_v43 = vld [vmem:[%s4079_s14 + $0x7c] sm:$0xf]  ;;  %v2861_v44 = vld [vmem:[%s4079_s14 + $0x84] sm:$0xf0] }
 0x190   : > { %1172 = vmatpush.bf16.msra.mxu1 %v2888_v36  ;;  %v2860_v45 = vor.u32 %v3102_v42, %v2859_v41  ;;  %v2864_v46 = vor.u32 %v3101_v43, %v2861_v44  ;;  %v2847_v47 = vld [vmem:[%s4079_s14 + $0x60] sm:$0xf]  ;;  %v3099_v48 = vld [vmem:[%s4079_s14 + $0x68] sm:$0xf0]  ;;  %v3098_v49 = vld [vmem:[%s4079_s14 + $0x64] sm:$0xf] }
 0x191   : > { %v2849_v50 = vld [vmem:[%s4079_s14 + $0x6c] sm:$0xf0]  ;;  %v2835_v51 = vld [vmem:[%s4079_s14 + $0x48] sm:$0xf]  ;;  %v2848_v52 = vor.u32 %v3099_v48, %v2847_v47  ;;  %v3096_v53 = vld [vmem:[%s4079_s14 + $0x50] sm:$0xf0] }
 0x192   : > { %v3095_v54 = vld [vmem:[%s4079_s14 + $0x4c] sm:$0xf]  ;;  %v2837_v55 = vld [vmem:[%s4079_s14 + $0x54] sm:$0xf0]  ;;  %v2852_v56 = vor.u32 %v3098_v49, %v2849_v50  ;;  %v2836_v57 = vor.u32 %v3096_v53, %v2835_v51  ;;  %v2823_v59 = vld [vmem:[%s4079_s14 + $0x30] sm:$0xf] }
 0x193   : > { %1154 = vmatpush.bf16.msra.mxu0 %v2872_v39  ;;  %v2840_v58 = vor.u32 %v3095_v54, %v2837_v55  ;;  %v3093_v60 = vld [vmem:[%s4079_s14 + $0x38] sm:$0xf0]  ;;  %v3092_v61 = vld [vmem:[%s4079_s14 + $0x34] sm:$0xf]  ;;  %v2825_v62 = vld [vmem:[%s4079_s14 + $0x3c] sm:$0xf0] }
 0x194   : > { %1173 = vmatpush.bf16.msra.mxu1 %v2876_v40  ;;  %v2824_v63 = vor.u32 %v3093_v60, %v2823_v59  ;;  %v2891_v0 = vld [vmem:[%s4079_s14 + $0xb0] sm:$0xf]  ;;  %v3109_v1 = vld [vmem:[%s4079_s14 + $0xb8] sm:$0xf0]  ;;  %v2879_v2 = vld [vmem:[%s4079_s14 + $0x98] sm:$0xf]  ;;  %v2828_v3 = vor.u32 %v3092_v61, %v2825_v62 }
 0x195   : > { %v2811_v4 = vld [vmem:[%s4079_s14 + $0x18] sm:$0xf]  ;;  %v3090_v5 = vld [vmem:[%s4079_s14 + $0x20] sm:$0xf0]  ;;  %v2892_v6 = vor.u32 %v3109_v1, %v2891_v0  ;;  %v3089_v8 = vld [vmem:[%s4079_s14 + $0x1c] sm:$0xf] }
 0x196   : > { %v3106_v7 = vld [vmem:[%s4079_s14 + $0xa0] sm:$0xf0]  ;;  %v2813_v9 = vld [vmem:[%s4079_s14 + $0x24] sm:$0xf0]  ;;  %v2812_v11 = vor.u32 %v3090_v5, %v2811_v4  ;;  %v2867_v12 = vld [vmem:[%s4079_s14 + $0x80] sm:$0xf] }
 0x197   : > { %1155 = vmatpush.bf16.msra.mxu0 %v2860_v45  ;;  %1191 = vmatpush.bf16.msra.mxu2 %v2892_v6  ;;  %v2880_v10 = vor.u32 %v3106_v7, %v2879_v2  ;;  %v3103_v13 = vld [vmem:[%s4079_s14 + $0x88] sm:$0xf0]  ;;  %v2816_v14 = vor.u32 %v3089_v8, %v2813_v9  ;;  %v2799_v15 = vld [vmem:[%s4079_s14] sm:$0xf]  ;;  %v3086_v17 = vld [vmem:[%s4079_s14 + $0x4] sm:$0xf] }
 0x198   : > { %1174 = vmatpush.bf16.msra.mxu1 %v2864_v46  ;;  %v3087_v16 = vld [vmem:[%s4079_s14 + $0x8] sm:$0xf0]  ;;  %v2801_v18 = vld [vmem:[%s4079_s14 + $0xc] sm:$0xf0]  ;;  %v2868_v20 = vor.u32 %v3103_v13, %v2867_v12  ;;  %v4173_v22 = vld [vmem:[#allocation2] sm:$0xff]  ;;  %vm1236_vm13 = vcmask 261120  }
 0x199   : > { %v4171_v19 = vld [vmem:[#allocation2 + $0x10] sm:$0xff]  ;;  %v2800_v21 = vor.u32 %v3087_v16, %v2799_v15  ;;  %v2855_v23 = vld [vmem:[%s4079_s14 + $0x68] sm:$0xf]  ;;  %v3100_v24 = vld [vmem:[%s4079_s14 + $0x70] sm:$0xf0]  ;;  %v2804_v25 = vor.u32 %v3086_v17, %v2801_v18  ;;  %s3806_s3 = smov 96  }
 0x19a   : > { %v991_v26 = vpack.c.bf16 %v4173_v22, %v4171_v19  ;;  %v2856_v27 = vor.u32 %v3100_v24, %v2855_v23  ;;  %v2843_v28 = vld [vmem:[%s4079_s14 + $0x50] sm:$0xf]  ;;  %v3097_v29 = vld [vmem:[%s4079_s14 + $0x58] sm:$0xf0]  ;;  %v2831_v31 = vld [vmem:[%s4079_s14 + $0x38] sm:$0xf] }
 0x19b   : > { %1156 = vmatpush.bf16.msra.mxu0 %v2848_v52  ;;  %1192 = vmatpush.bf16.msra.mxu2 %v2880_v10  ;;  %v2844_v30 = vor.u32 %v3097_v29, %v2843_v28  ;;  %v3094_v32 = vld [vmem:[%s4079_s14 + $0x40] sm:$0xf0]  ;;  %v2819_v34 = vld [vmem:[%s4079_s14 + $0x20] sm:$0xf]  ;;  %v3091_v35 = vld [vmem:[%s4079_s14 + $0x28] sm:$0xf0] }
 0x19c   : > { %1175 = vmatpush.bf16.msra.mxu1 %v2852_v56  ;;  %v2832_v33 = vor.u32 %v3094_v32, %v2831_v31  ;;  %v2820_v36 = vor.u32 %v3091_v35, %v2819_v34  ;;  %v2807_v37 = vld [vmem:[%s4079_s14 + $0x8] sm:$0xf]  ;;  %v3088_v38 = vld [vmem:[%s4079_s14 + $0x10] sm:$0xf0]  ;;  %s3807_s14 = smov 64   ;;  %s3808_s28 = smov 32  }
 0x19d   : > { %v4187_v39 = vld [vmem:[#allocation2 + $0x18] sm:$0xff]  ;;  %v4189_v40 = vld [vmem:[#allocation2 + $0x8] sm:$0xff]  ;;  %v2808_v41 = vor.u32 %v3088_v38, %v2807_v37  ;;  %s4682_s29 = sld [smem:[#allocation33_spill]]  ;;  %vm1257_vm14 = vcmask 130048   ;;  %vm1306_vm15 = vcmask 257024   ;;  %vm1386_vm0 = vcmask 519424  }
 0x19e   : > { %v992_v42 = vpack.c.bf16 %v4189_v40, %v4187_v39  ;;  %vm1466_vm1 = vcmask 781824   ;;  %vm1546_vm2 = vcmask 1044224  }
 0x19f   : > { %1157 = vmatpush.bf16.msra.mxu0 %v2836_v57  ;;  %1193 = vmatpush.bf16.msra.mxu2 %v2868_v20 }
 0x1a0   : > { %1176 = vmatpush.bf16.msra.mxu1 %v2840_v58 }
 0x1a3   : > { %1158 = vmatpush.bf16.msra.mxu0 %v2824_v63  ;;  %1194 = vmatpush.bf16.msra.mxu2 %v2856_v27  ;;  %v4217_v15 = vld [vmem:[%s4682_s29] ss:$0 sm:$0xff] }
 0x1a4   : > { %1177 = vmatpush.bf16.msra.mxu1 %v2828_v3 }
 0x1a7   : > { %1159 = vmatpush.bf16.msra.mxu0 %v2812_v11  ;;  %1195 = vmatpush.bf16.msra.mxu2 %v2844_v30 }
 0x1a8   : > { %1178 = vmatpush.bf16.msra.mxu1 %v2816_v14 }
 0x1ab   : > { %1160 = vmatpush.bf16.msra.mxu0 %v2800_v21  ;;  %1196 = vmatpush.bf16.msra.mxu2 %v2832_v33 }
 0x1ac   : > { %1179 = vmatpush.bf16.msra.mxu1 %v2804_v25 }
 0x1ae   : > { %1161 = vmatmul.bf16.vlgmr.msra.gmra.mxu0 %v991_v26 }
 0x1af   : > { %1180 = vmatmul.bf16.vlgmr.msra.gmra.mxu1 %v991_v26  ;;  %1197 = vmatpush.bf16.msra.mxu2 %v2820_v36 }
 0x1b3   : > { %1198 = vmatpush.bf16.msra.mxu2 %v2808_v41 }
 0x1b6   : > { %1199 = vmatmul.bf16.vlgmr.msra.gmra.mxu2 %v991_v26 }
 0x1be   : > { %1166 = vmatmul.bf16.gmra.mxu0 %v992_v42 }
 0x1bf   : > { %1185 = vmatmul.bf16.gmra.mxu1 %v992_v42 }
 0x1c6   : > { %1204 = vmatmul.bf16.gmra.mxu2 %v992_v42 }
 0x22b   : > { %v1162_v43 = vpop.f32.mrf.mxu0 }
 0x22c   : > { %v1181_v44 = vpop.f32.mrf.mxu1  ;;  %v1210_v51 = vpack.c.bf16 %v1162_v43, %v1162_v43 }
 0x22d   : > { %v1214_v45 = vpack.c.bf16 %v1181_v44, %v1181_v44 }
 0x22e   : > { %v1228_v56 = vunpack.c.l.b16 %v1210_v51 }
 0x22f   : > { %v1233_v49 = vunpack.c.l.b16 %v1214_v45 }
 0x233   : > { %v1164_v48 = vpop.f32.mrf.mxu0 }
 0x234   : > { %v1183_v46 = vpop.f32.mrf.mxu1  ;;  %v1211_v52 = vpack.c.bf16 %v1164_v48, %v1164_v48 }
 0x235   : > { %v1215_v47 = vpack.c.bf16 %v1183_v46, %v1183_v46 }
 0x236   : > { %v1229_v57 = vunpack.c.l.b16 %v1211_v52 }
 0x237   : > { %v1234_v50 = vunpack.c.l.b16 %v1215_v47 }
 0x238   : > { %v4195_v58 = vpack.c.b16 %v1229_v57, %v1228_v56 }
 0x239   : > { %v1235_v53 = vpack.c.b16 %v1234_v50, %v1233_v49  ;;  %v1200_v60 = vpop.f32.mrf.mxu2 }
 0x23a   : > { %v1218_v63 = vpack.c.bf16 %v1200_v60, %v1200_v60 }
 0x23b   : > { %1311 = vrot.lane.b32.xlu2 %v1235_v53, %s3806_s3  ;;  %v1241_v54 = vsel %vm1236_vm13, %v1235_v53, 0  ;;  %v1167_v17 = vpop.f32.mrf.mxu0 }
 0x23c   : > { %1250 = vmatpush.bf16.xpose.msra.mxu3 %v1241_v54  ;;  %v1186_v55 = vpop.f32.mrf.mxu1  ;;  %v1283_v3 = vunpack.c.l.b16 %v1218_v63  ;;  %v1212_v21 = vpack.c.bf16 %v1167_v17, %v1167_v17 }
 0x23d   : > { %v1216_v61 = vpack.c.bf16 %v1186_v55, %v1186_v55 }
 0x23e   : > { %v1556_v26 = vunpack.c.l.b16 %v1212_v21 }
 0x23f   : > { %v1561_v0 = vunpack.c.l.b16 %v1216_v61 }
 0x241   : > { %v1202_v2 = vpop.f32.mrf.mxu2 }
 0x242   : > { %v1219_v4 = vpack.c.bf16 %v1202_v2, %v1202_v2 }
 0x243   : > { %1309 = vrot.lane.b32.xlu2 %v4195_v58, %s3806_s3  ;;  %2893 = vmatmul.msk.bf16.vlgmr.msra.gmra.mxu3 %vm1236_vm13, %v4195_v58  ;;  %v1169_v24 = vpop.f32.mrf.mxu0 }
 0x244   : > { %v1188_v59 = vpop.f32.mrf.mxu1  ;;  %v1284_v6 = vunpack.c.l.b16 %v1219_v4  ;;  %v1213_v27 = vpack.c.bf16 %v1169_v24, %v1169_v24 }
 0x245   : > { %v1217_v62 = vpack.c.bf16 %v1188_v59, %v1188_v59 }
 0x246   : > { %v4202_v7 = vpack.c.b16 %v1284_v6, %v1283_v3  ;;  %v1557_v29 = vunpack.c.l.b16 %v1213_v27 }
 0x247   : > { %v1562_v1 = vunpack.c.l.b16 %v1217_v62 }
 0x248   : > { %1297 = vmatpush.bf16.msrb.mxu3 %v4202_v7  ;;  %v1558_v30 = vpack.c.b16 %v1557_v29, %v1556_v26 }
 0x249   : > { %v1563_v5 = vpack.c.b16 %v1562_v1, %v1561_v0  ;;  %v4250_v1 = vpop.f32.mrf.mxu2 }
 0x24b   : > { %1391 = vrot.lane.b32.xlu2 %v1235_v53, %s3807_s14  ;;  %v1568_v34 = vsel %vm1236_vm13, %v1563_v5, 0 }
 0x24c   : > { %1577 = vmatpush.bf16.xpose.msrb.mxu0 %v1568_v34 }
 0x251   : > { %v4253_v4 = vpop.f32.mrf.mxu2 }
 0x253   : > { %1636 = vrot.lane.b32.xlu2 %v1563_v5, %s3806_s3  ;;  %2902 = vmatmul.msk.bf16.vlgmr.msrb.gmra.mxu0 %vm1236_vm13, %v1558_v30 }
 0x25b   : > { %1389 = vrot.lane.b32.xlu2 %v4195_v58, %s3807_s14 }
 0x263   : > { %1794 = vrot.lane.b32.xlu2 %v1563_v5, %s3808_s28 }
 0x26b   : > { %1713 = vrot.lane.b32.xlu2 %v1558_v30, %s3807_s14 }
 0x295   : > { %v1312_v8 = vpop.permute.xlu2 %1311 }
 0x296   : > { %v1317_v9 = vsel %vm1236_vm13, %v1312_v8, 0 }
 0x297   : > { %1326 = vmatpush.bf16.xpose.msra.mxu3 %v1317_v9 }
 0x29d   : > { %v4210_v10 = vpop.permute.xlu2 %1309 }
 0x2a5   : > { %v1392_v11 = vpop.permute.xlu2 %1391 }
 0x2a6   : > { %v1397_v12 = vsel %vm1236_vm13, %v1392_v11, 0 }
 0x2a7   : > { %1406 = vmatpush.bf16.xpose.msrb.mxu1 %v1397_v12 }
 0x2ad   : > { %v1637_v13 = vpop.permute.xlu2 %1636 }
 0x2ae   : > { %v1642_v47 = vsel %vm1236_vm13, %v1637_v13, 0 }
 0x2b5   : > { %v1390_v14 = vpop.permute.xlu2 %1389 }
 0x2b6   : > { %2897 = vmatmul.msk.bf16.vlgmr.msrb.gmra.mxu1 %vm1236_vm13, %v1390_v14 }
 0x2c6   : > { %v1252_v16 = vpop.f32.mrf.mxu3 }
 0x2c7   : > { %v1253_v18 = vadd.f32 %v4217_v15, %v1252_v16 }
 0x2c9   : > { %v1258_v20 = vsel %vm1257_vm14, %v1253_v18, -inf }
 0x2ca   : > { %1259 = vmax.xlane.f32.xlu0 %v1258_v20 }
 0x2ce   : > { %v1254_v23 = vpop.f32.mrf.mxu3 }
 0x2cf   : > { %v1255_v25 = vadd.f32 %v4217_v15, %v1254_v23 }
 0x2d0   : > { %v1579_v8 = vpop.f32.mrf.mxu0 }
 0x2d1   : > { %v1261_v28 = vsel %vm1257_vm14, %v1255_v25, -inf }
 0x2d2   : > { %1262 = vmax.xlane.f32.xlu0 %v1261_v28 }
 0x2d8   : > { %v1581_v17 = vpop.f32.mrf.mxu0 }
 0x2e6   : > { %1471 = vrot.lane.b32.xlu0 %v1235_v53, %s3808_s28  ;;  %v1795_v53 = vpop.permute.xlu2 %1794 }
 0x2e7   : > { %v1800_v63 = vsel %vm1236_vm13, %v1795_v53, 0 }
 0x2ee   : > { %1634 = vrot.lane.b32.xlu0 %v1558_v30, %s3806_s3  ;;  %v1714_v54 = vpop.permute.xlu2 %1713 }
 0x2f6   : > { %1715 = vrot.lane.b32.xlu0 %v1563_v5, %s3807_s14 }
 0x333   : > { %v1408_v31 = vpop.f32.mrf.mxu1 }
 0x334   : > { %v4228_v32 = vadd.f32 %v4217_v15, %v1408_v31 }
 0x336   : > { %v1413_v33 = vsel %vm1257_vm14, %v4228_v32, -inf }
 0x337   : > { %1414 = vmax.xlane.f32.xlu0 %v1413_v33 }
 0x33b   : > { %v1410_v12 = vpop.f32.mrf.mxu1 }
 0x33c   : > { %v4259_v13 = vadd.f32 %v4217_v15, %v1410_v12 }
 0x33d   : > { %v1260_v35 = vpop.xlane.xlu0 %1259 }
 0x33e   : > { %v1264_v36 = vsub.f32 %v1253_v18, %v1260_v35  ;;  %v3311_v18 = vld [vmem:[%s4682_s29 + $0x1] ss:$0 sm:$0xff]  ;;  %v1416_v20 = vsel %vm1257_vm14, %v4259_v13, -inf }
 0x33f   : > { %v4268_v23 = vadd.f32 %v3311_v18, %v1579_v8  ;;  %v4276_v29 = vadd.f32 %v3311_v18, %v1581_v17 }
 0x340   : > { %v1266_v37 = vmul.f32 1.442695, %v1264_v36 }
 0x341   : > { %v1584_v28 = vsel %vm1257_vm14, %v4268_v23, -inf  ;;  %v1587_v36 = vsel %vm1257_vm14, %v4276_v29, -inf }
 0x342   : > { %3317 = vpow2.f32 %v1266_v37 }
 0x345   : > { %v1263_v38 = vpop.xlane.xlu0 %1262 }
 0x346   : > { %v1265_v41 = vsub.f32 %v1255_v25, %v1263_v38 }
 0x348   : > { %v3318_v42 = vpop.eup %3317  ;;  %v1268_v43 = vmul.f32 1.442695, %v1265_v41 }
 0x349   : > { %v1270_v44 = vsel %vm1257_vm14, %v3318_v42, 0.0 }
 0x34a   : > { %3319 = vpow2.f32 %v1268_v43  ;;  %1271 = vadd.xlane.f32.xlu1 %v1270_v44 }
 0x350   : > { %v3320_v45 = vpop.eup %3319 }
 0x351   : > { %v1273_v46 = vsel %vm1257_vm14, %v3320_v45, 0.0 }
 0x352   : > { %1274 = vadd.xlane.f32.xlu1 %v1273_v46 }
 0x358   : > { %v1472_v48 = vpop.permute.xlu0 %1471 }
 0x359   : > { %v1477_v49 = vsel %vm1236_vm13, %v1472_v48, 0 }
 0x35a   : > { %1486 = vmatpush.bf16.xpose.msrb.mxu2 %v1477_v49 }
 0x360   : > { %v1635_v50 = vpop.permute.xlu0 %1634 }
 0x362   : > { %1651 = vmatpush.bf16.xpose.msra.mxu2 %v1642_v47 }
 0x368   : > { %v1716_v51 = vpop.permute.xlu0 %1715 }
 0x369   : > { %v1721_v52 = vsel %vm1236_vm13, %v1716_v51, 0 }
 0x36a   : > { %1730 = vmatpush.bf16.xpose.msra.mxu0 %v1721_v52 }
 0x36b   : > { %1469 = vrot.lane.b32.xlu1 %v4195_v58, %s3808_s28 }
 0x371   : > { %2906 = vmatmul.msk.bf16.vlgmr.msra.gmra.mxu0 %vm1236_vm13, %v1714_v54 }
 0x373   : > { %1792 = vrot.lane.b32.xlu1 %v1558_v30, %s3808_s28 }
 0x3aa   : > { %v1415_v54 = vpop.xlane.xlu0 %1414 }
 0x3bd   : > { %v1272_v55 = vpop.xlane.xlu1 %1271 }
 0x3be   : > { %3321 = vrcp.f32 %v1272_v55 }
 0x3c4   : > { %v3322_v57 = vpop.eup %3321 }
 0x3c5   : > { %v1275_v56 = vpop.xlane.xlu1 %1274  ;;  %v1278_v60 = vmul.f32 %v3322_v57, %v3318_v42 }
 0x3c6   : > { %3323 = vrcp.f32 %v1275_v56 }
 0x3cc   : > { %v3324_v59 = vpop.eup %3323 }
 0x3cd   : > { %v1279_v61 = vmul.f32 %v3324_v59, %v3320_v45 }
 0x3cf   : > { %v1280_v62 = vpack.c.bf16 %v1279_v61, %v1278_v60 }
 0x3d1   : > { %2894 = vmatmul.msk.bf16.vlgmr.msrb.gmra.mxu3 %vm1257_vm14, %v1280_v62 }
 0x3dd   : > { %v1470_v58 = vpop.permute.xlu1 %1469 }
 0x3de   : > { %2899 = vmatmul.msk.bf16.vlgmr.msrb.gmra.mxu2 %vm1236_vm13, %v1470_v58 }
 0x3df   : > { %1809 = vmatpush.bf16.xpose.msrb.mxu2 %v1800_v63 }
 0x3e1   : > { %2895 = vmatmul.msk.bf16.vlgmr.msra.gmra.mxu3 %vm1236_vm13, %v4210_v10 }
 0x3e5   : > { %v1793_v0 = vpop.permute.xlu1 %1792 }
 0x3ee   : > { %2904 = vmatmul.msk.bf16.vlgmr.msra.gmra.mxu2 %vm1236_vm13, %v1635_v50  ;;  %v1732_v26 = vpop.f32.mrf.mxu0 }
 0x3ef   : > { %v4278_v30 = vadd.f32 %v3311_v18, %v1732_v26  ;;  %v1221_v26 = vpack.c.bf16 %v4253_v4, %v4253_v4 }
 0x3f1   : > { %v1737_v38 = vsel %vm1257_vm14, %v4278_v30, -inf }
 0x3f6   : > { %v1734_v37 = vpop.f32.mrf.mxu0 }
 0x3f7   : > { %v4288_v41 = vadd.f32 %v3311_v18, %v1734_v37 }
 0x3f9   : > { %v1740_v45 = vsel %vm1257_vm14, %v4288_v41, -inf }
 0x3fe   : > { %2908 = vmatmul.msk.bf16.vlgmr.msrb.gmra.mxu2 %vm1236_vm13, %v1793_v0 }
 0x454   : > { %v1299_v2 = vpop.f32.mrf.mxu3 }
 0x455   : > { %v1304_v3 = vpack.c.bf16 %v1299_v2, %v1299_v2 }
 0x457   : > { %1307 = vst.msk [vmem:[#allocation3] sm:$0xf] %vm1306_vm15, %v1304_v3 }
 0x45c   : > { %v1301_v5 = vpop.f32.mrf.mxu3 }
 0x45d   : > { %v1305_v6 = vpack.c.bf16 %v1301_v5, %v1301_v5 }
 0x45f   : > { %1308 = vst.msk [vmem:[#allocation3 + $0x4] sm:$0xf] %vm1306_vm15, %v1305_v6 }
 0x461   : > { %v1488_v9 = vpop.f32.mrf.mxu2 }
 0x462   : > { %v1489_v10 = vadd.f32 %v4217_v15, %v1488_v9 }
 0x464   : > { %v1493_v11 = vsel %vm1257_vm14, %v1489_v10, -inf  ;;  %v1328_v34 = vpop.f32.mrf.mxu3 }
 0x465   : > { %1494 = vmax.xlane.f32.xlu2 %v1493_v11  ;;  %v1329_v47 = vadd.f32 %v4217_v15, %v1328_v34 }
 0x467   : > { %v1333_v52 = vsel %vm1257_vm14, %v1329_v47, -inf }
 0x469   : > { %v1490_v14 = vpop.f32.mrf.mxu2 }
 0x46a   : > { %v1491_v16 = vadd.f32 %v4217_v15, %v1490_v14 }
 0x46c   : > { %v1496_v21 = vsel %vm1257_vm14, %v1491_v16, -inf  ;;  %v1330_v46 = vpop.f32.mrf.mxu3 }
 0x46d   : > { %1417 = vmax.xlane.f32.xlu2 %v1416_v20  ;;  %1497 = vmax.xlane.f32.xlu1 %v1496_v21  ;;  %v1331_v48 = vadd.f32 %v4217_v15, %v1330_v46  ;;  %v1419_v15 = vsub.f32 %v4228_v32, %v1415_v54 }
 0x46f   : > { %v1336_v51 = vsel %vm1257_vm14, %v1331_v48, -inf  ;;  %v1421_v59 = vmul.f32 1.442695, %v1419_v15 }
 0x471   : > { %v1653_v24 = vpop.f32.mrf.mxu2 }
 0x472   : > { %v4270_v25 = vadd.f32 %v3311_v18, %v1653_v24  ;;  %v1220_v24 = vpack.c.bf16 %v4250_v1, %v4250_v1 }
 0x474   : > { %v1658_v27 = vsel %vm1257_vm14, %v4270_v25, -inf  ;;  %v1609_v34 = vunpack.c.l.b16 %v1220_v24 }
 0x475   : > { %1659 = vmax.xlane.f32.xlu1 %v1658_v27  ;;  %1585 = vmax.xlane.f32.xlu2 %v1584_v28 }
 0x479   : > { %v1655_v31 = vpop.f32.mrf.mxu2 }
 0x47a   : > { %v4280_v33 = vadd.f32 %v3311_v18, %v1655_v31 }
 0x47c   : > { %v1661_v35 = vsel %vm1257_vm14, %v4280_v33, -inf }
 0x47d   : > { %1662 = vmax.xlane.f32.xlu0 %v1661_v35  ;;  %1588 = vmax.xlane.f32.xlu1 %v1587_v36  ;;  %v1610_v35 = vunpack.c.l.b16 %v1221_v26 }
 0x47e   : > { %1738 = vmax.xlane.f32.xlu2 %v1737_v38 }
 0x481   : > { %v1811_v42 = vpop.f32.mrf.mxu2 }
 0x482   : > { %v4290_v43 = vadd.f32 %v3311_v18, %v1811_v42  ;;  %v4335_v42 = vpack.c.b16 %v1610_v35, %v1609_v34 }
 0x484   : > { %v1816_v44 = vsel %vm1257_vm14, %v4290_v43, -inf }
 0x485   : > { %1817 = vmax.xlane.f32.xlu0 %v1816_v44  ;;  %1741 = vmax.xlane.f32.xlu1 %v1740_v45 }
 0x489   : > { %v1813_v49 = vpop.f32.mrf.mxu2 }
 0x48a   : > { %v4298_v50 = vadd.f32 %v3311_v18, %v1813_v49 }
 0x48c   : > { %v1819_v53 = vsel %vm1257_vm14, %v4298_v50, -inf }
 0x48d   : > { %1337 = vmax.xlane.f32.xlu0 %v1336_v51  ;;  %1334 = vmax.xlane.f32.xlu1 %v1333_v52 }
 0x48e   : > { %1820 = vmax.xlane.f32.xlu2 %v1819_v53 }
 0x4a1   : > { %1356 = vrot.lane.b32.xlu0 %v4202_v7, %s3806_s3 }
 0x4d8   : > { %v1495_v55 = vpop.xlane.xlu2 %1494 }
 0x4d9   : > { %v1499_v56 = vsub.f32 %v1489_v10, %v1495_v55 }
 0x4db   : > { %v1501_v57 = vmul.f32 1.442695, %v1499_v56 }
 0x4dd   : > { %3325 = vpow2.f32 %v1501_v57 }
 0x4de   : > { %3327 = vpow2.f32 %v1421_v59 }
 0x4e0   : > { %v1498_v60 = vpop.xlane.xlu1 %1497  ;;  %v1418_v61 = vpop.xlane.xlu2 %1417 }
 0x4e1   : > { %v1500_v62 = vsub.f32 %v1491_v16, %v1498_v60  ;;  %v1420_v0 = vsub.f32 %v4259_v13, %v1418_v61 }
 0x4e3   : > { %v4307_v63 = vpop.eup %3325  ;;  %v1503_v58 = vmul.f32 1.442695, %v1500_v62  ;;  %v1423_v3 = vmul.f32 1.442695, %v1420_v0 }
 0x4e4   : > { %v1505_v2 = vsel %vm1257_vm14, %v4307_v63, 0.0  ;;  %v4312_v32 = vpop.eup %3327 }
 0x4e5   : > { %1506 = vadd.xlane.f32.xlu2 %v1505_v2  ;;  %3329 = vpow2.f32 %v1503_v58  ;;  %v1425_v8 = vsel %vm1257_vm14, %v4312_v32, 0.0 }
 0x4e6   : > { %3331 = vpow2.f32 %v1423_v3 }
 0x4e8   : > { %v1660_v5 = vpop.xlane.xlu1 %1659  ;;  %v1586_v37 = vpop.xlane.xlu2 %1585 }
 0x4e9   : > { %v1664_v31 = vsub.f32 %v4270_v25, %v1660_v5  ;;  %v1590_v4 = vsub.f32 %v4268_v23, %v1586_v37 }
 0x4eb   : > { %v4314_v6 = vpop.eup %3329  ;;  %v1666_v36 = vmul.f32 1.442695, %v1664_v31  ;;  %v1592_v45 = vmul.f32 1.442695, %v1590_v4 }
 0x4ec   : > { %v1508_v9 = vsel %vm1257_vm14, %v4314_v6, 0.0  ;;  %v4322_v12 = vpop.eup %3331 }
 0x4ed   : > { %1426 = vadd.xlane.f32.xlu2 %v1425_v8  ;;  %1509 = vadd.xlane.f32.xlu1 %v1508_v9  ;;  %v1428_v13 = vsel %vm1257_vm14, %v4322_v12, 0.0 }
 0x4f0   : > { %v4320_v10 = vpop.xlane.xlu0 %1662  ;;  %v1589_v11 = vpop.xlane.xlu1 %1588 }
 0x4f1   : > { %v1739_v51 = vpop.xlane.xlu2 %1738 }
 0x4f2   : > { %v1743_v15 = vsub.f32 %v4278_v30, %v1739_v51 }
 0x4f5   : > { %1429 = vadd.xlane.f32.xlu1 %v1428_v13 }
 0x4f8   : > { %v1818_v14 = vpop.xlane.xlu0 %1817  ;;  %v1742_v16 = vpop.xlane.xlu1 %1741 }
 0x4f9   : > { %v1822_v53 = vsub.f32 %v4290_v43, %v1818_v14  ;;  %v1745_v43 = vmul.f32 1.442695, %v1743_v15  ;;  %v1744_v62 = vsub.f32 %v4288_v41, %v1742_v16  ;;  %v1665_v41 = vsub.f32 %v4280_v33, %v4320_v10 }
 0x4fb   : > { %v1824_v55 = vmul.f32 1.442695, %v1822_v53  ;;  %v1747_v30 = vmul.f32 1.442695, %v1744_v62  ;;  %v1668_v5 = vmul.f32 1.442695, %v1665_v41 }
 0x500   : > { %v1338_v17 = vpop.xlane.xlu0 %1337  ;;  %v1335_v18 = vpop.xlane.xlu1 %1334 }
 0x501   : > { %v1340_v20 = vsub.f32 %v1331_v48, %v1338_v17  ;;  %v1339_v21 = vsub.f32 %v1329_v47, %v1335_v18  ;;  %v1591_v48 = vsub.f32 %v4276_v29, %v1589_v11  ;;  %v1821_v56 = vpop.xlane.xlu2 %1820 }
 0x502   : > { %v1823_v57 = vsub.f32 %v4298_v50, %v1821_v56 }
 0x503   : > { %v1343_v27 = vmul.f32 1.442695, %v1340_v20  ;;  %v1341_v28 = vmul.f32 1.442695, %v1339_v21  ;;  %v1594_v49 = vmul.f32 1.442695, %v1591_v48 }
 0x504   : > { %v1826_v60 = vmul.f32 1.442695, %v1823_v57 }
 0x505   : > { %3333 = vpow2.f32 %v1343_v27  ;;  %1516 = vrot.lane.b32.xlu2 %v4202_v7, %s3808_s28 }
 0x506   : > { %3335 = vpow2.f32 %v1341_v28 }
 0x507   : > { %3337 = vpow2.f32 %v1666_v36 }
 0x508   : > { %3339 = vpow2.f32 %v1592_v45 }
 0x509   : > { %3341 = vpow2.f32 %v1594_v49 }
 0x50a   : > { %3343 = vpow2.f32 %v1824_v55 }
 0x50b   : > { %v4333_v38 = vpop.eup %3333  ;;  %3345 = vpow2.f32 %v1745_v43 }
 0x50c   : > { %v4337_v1 = vpop.eup %3335  ;;  %v1348_v25 = vsel %vm1257_vm14, %v4333_v38, 0.0  ;;  %3347 = vpow2.f32 %v1826_v60 }
 0x50d   : > { %1349 = vadd.xlane.f32.xlu0 %v1348_v25  ;;  %v1345_v44 = vsel %vm1257_vm14, %v4337_v1, 0.0  ;;  %1681 = vrot.lane.b32.xlu2 %v4335_v42, %s3806_s3  ;;  %v4346_v46 = vpop.eup %3337  ;;  %3349 = vpow2.f32 %v1747_v30 }
 0x50e   : > { %1346 = vadd.xlane.f32.xlu1 %v1345_v44  ;;  %v1670_v23 = vsel %vm1257_vm14, %v4346_v46, 0.0  ;;  %v4351_v52 = vpop.eup %3339  ;;  %3351 = vpow2.f32 %v1668_v5 }
 0x50f   : > { %v1596_v54 = vsel %vm1257_vm14, %v4351_v52, 0.0  ;;  %v4358_v29 = vpop.eup %3341 }
 0x510   : > { %v1599_v59 = vsel %vm1257_vm14, %v4358_v29, 0.0  ;;  %v4364_v61 = vpop.eup %3343 }
 0x511   : > { %v4369_v58 = vpop.eup %3345 }
 0x512   : > { %v4371_v50 = vpop.eup %3347  ;;  %v1749_v0 = vsel %vm1257_vm14, %v4369_v58, 0.0 }
 0x513   : > { %v1357_v47 = vpop.permute.xlu0 %1356  ;;  %v1831_v2 = vsel %vm1257_vm14, %v4371_v50, 0.0  ;;  %v4379_v3 = vpop.eup %3349 }
 0x514   : > { %1369 = vmatpush.bf16.msrb.mxu3 %v1357_v47  ;;  %v1752_v8 = vsel %vm1257_vm14, %v4379_v3, 0.0  ;;  %v4383_v9 = vpop.eup %3351 }
 0x515   : > { %v1673_v11 = vsel %vm1257_vm14, %v4383_v9, 0.0 }
 0x516   : > { %1671 = vadd.xlane.f32.xlu1 %v1670_v23 }
 0x51e   : > { %1597 = vadd.xlane.f32.xlu1 %v1596_v54 }
 0x521   : > { %1436 = vrot.lane.b32.xlu0 %v4202_v7, %s3807_s14  ;;  %v1828_v7 = vsel %vm1257_vm14, %v4364_v61, 0.0 }
 0x526   : > { %1600 = vadd.xlane.f32.xlu1 %v1599_v59 }
 0x52e   : > { %1829 = vadd.xlane.f32.xlu1 %v1828_v7 }
 0x536   : > { %1750 = vadd.xlane.f32.xlu1 %v1749_v0  ;;  %1832 = vadd.xlane.f32.xlu2 %v1831_v2 }
 0x53e   : > { %1753 = vadd.xlane.f32.xlu1 %v1752_v8 }
 0x54b   : > { %1674 = vadd.xlane.f32.xlu0 %v1673_v11 }
 0x557   : > { %1839 = vrot.lane.b32.xlu1 %v4335_v42, %s3808_s28 }
 0x558   : > { %v1507_v13 = vpop.xlane.xlu2 %1506 }
 0x55f   : > { %1760 = vrot.lane.b32.xlu0 %v4335_v42, %s3807_s14 }
 0x560   : > { %v1427_v33 = vpop.xlane.xlu2 %1426  ;;  %v1510_v14 = vpop.xlane.xlu1 %1509 }
 0x568   : > { %v1517_v10 = vpop.permute.xlu2 %1516  ;;  %v1430_v16 = vpop.xlane.xlu1 %1429 }
 0x569   : > { %1529 = vmatpush.bf16.msra.mxu3 %v1517_v10 }
 0x570   : > { %v1682_v31 = vpop.permute.xlu2 %1681 }
 0x580   : > { %v1350_v17 = vpop.xlane.xlu0 %1349 }
 0x581   : > { %3353 = vrcp.f32 %v1350_v17  ;;  %v1347_v18 = vpop.xlane.xlu1 %1346 }
 0x582   : > { %3355 = vrcp.f32 %v1347_v18 }
 0x583   : > { %3357 = vrcp.f32 %v1430_v16 }
 0x584   : > { %3359 = vrcp.f32 %v1427_v33 }
 0x585   : > { %3361 = vrcp.f32 %v1510_v14 }
 0x586   : > { %3363 = vrcp.f32 %v1507_v13 }
 0x587   : > { %v3354_v20 = vpop.eup %3353 }
 0x588   : > { %v3356_v21 = vpop.eup %3355  ;;  %v1354_v24 = vmul.f32 %v3354_v20, %v4333_v38 }
 0x589   : > { %v1353_v26 = vmul.f32 %v3356_v21, %v4337_v1  ;;  %v1672_v27 = vpop.xlane.xlu1 %1671  ;;  %v3358_v34 = vpop.eup %3357 }
 0x58a   : > { %v3360_v35 = vpop.eup %3359  ;;  %v1434_v36 = vmul.f32 %v3358_v34, %v4322_v12 }
 0x58b   : > { %v1355_v28 = vpack.c.bf16 %v1354_v24, %v1353_v26  ;;  %v1433_v4 = vmul.f32 %v3360_v35, %v4312_v32  ;;  %v3362_v38 = vpop.eup %3361 }
 0x58c   : > { %v3364_v44 = vpop.eup %3363  ;;  %v1514_v45 = vmul.f32 %v3362_v38, %v4314_v6 }
 0x58d   : > { %2896 = vmatmul.msk.bf16.vlgmr.msrb.gmra.mxu3 %vm1257_vm14, %v1355_v28  ;;  %v1435_v1 = vpack.c.bf16 %v1434_v36, %v1433_v4  ;;  %v1513_v47 = vmul.f32 %v3364_v44, %v4307_v63 }
 0x58e   : > { %1694 = vmatpush.bf16.msrb.mxu3 %v1682_v31 }
 0x58f   : > { %v1515_v12 = vpack.c.bf16 %v1514_v45, %v1513_v47  ;;  %v3118_v45 = vld [vmem:[%s4109_s7 + $0x30] sm:$0xff]  ;;  %v3117_v47 = vld [vmem:[%s4109_s7 + $0x28] sm:$0xff] }
 0x591   : > { %v1598_v37 = vpop.xlane.xlu1 %1597 }
 0x592   : > { %3365 = vrcp.f32 %v1598_v37 }
 0x593   : > { %v1437_v25 = vpop.permute.xlu0 %1436 }
 0x594   : > { %1449 = vmatpush.bf16.msra.mxu1 %v1437_v25 }
 0x597   : > { %2898 = vmatmul.msk.bf16.vlgmr.msra.gmra.mxu1 %vm1257_vm14, %v1435_v1  ;;  %v3119_v1 = vld [vmem:[%s4109_s7 + $0x38] sm:$0xff] }
 0x598   : > { %1623 = vmatpush.bf16.msrb.mxu1 %v4335_v42  ;;  %v3366_v32 = vpop.eup %3365  ;;  %1951 = vmatpush.bf16.msrb.mxu0 %v3119_v1  ;;  %v3002_v1 = vld [vmem:[%s4113_s11 + $0x68] sm:$0xf0] }
 0x599   : > { %v1601_v48 = vpop.xlane.xlu1 %1600  ;;  %v1604_v51 = vmul.f32 %v3366_v32, %v4351_v52  ;;  %v3115_v32 = vld [vmem:[%s4109_s7 + $0x18] sm:$0xff] }
 0x59a   : > { %3367 = vrcp.f32 %v1601_v48  ;;  %v3116_v48 = vld [vmem:[%s4109_s7 + $0x20] sm:$0xff] }
 0x59b   : > { %3369 = vrcp.f32 %v1672_v27 }
 0x59c   : > { %1952 = vmatpush.bf16.msrb.mxu0 %v3118_v45  ;;  %v2992_v45 = vld [vmem:[%s4113_s11 + $0x50] sm:$0xf] }
 0x59d   : > { %2900 = vmatmul.msk.bf16.vlgmr.msra.gmra.mxu3 %vm1257_vm14, %v1515_v12 }
 0x5a0   : > { %v3368_v23 = vpop.eup %3367  ;;  %1953 = vmatpush.bf16.msrb.mxu0 %v3117_v47  ;;  %v3131_v47 = vld [vmem:[%s4113_s11 + $0x54] sm:$0xf0] }
 0x5a1   : > { %v1605_v49 = vmul.f32 %v3368_v23, %v4358_v29  ;;  %v1830_v6 = vpop.xlane.xlu1 %1829  ;;  %v3370_v55 = vpop.eup %3369  ;;  %v3114_v23 = vld [vmem:[%s4109_s7 + $0x10] sm:$0xff] }
 0x5a2   : > { %v1678_v15 = vmul.f32 %v3370_v55, %v4346_v46 }
 0x5a3   : > { %v1606_v42 = vpack.c.bf16 %v1605_v49, %v1604_v51  ;;  %v3113_v49 = vld [vmem:[%s4109_s7 + $0x8] sm:$0xff]  ;;  %v3112_v51 = vld [vmem:[%s4109_s7] sm:$0xff] }
 0x5a4   : > { %1954 = vmatpush.bf16.msrb.mxu0 %v3116_v48  ;;  %v3130_v48 = vld [vmem:[%s4113_s11 + $0x54] sm:$0xf] }
 0x5a7   : > { %2903 = vmatmul.msk.bf16.vlgmr.msrb.gmra.mxu1 %vm1257_vm14, %v1606_v42 }
 0x5a8   : > { %1955 = vmatpush.bf16.msrb.mxu0 %v3115_v32  ;;  %v2994_v32 = vld [vmem:[%s4113_s11 + $0x58] sm:$0xf0] }
 0x5a9   : > { %v1751_v53 = vpop.xlane.xlu1 %1750  ;;  %v1833_v59 = vpop.xlane.xlu2 %1832 }
 0x5ac   : > { %1956 = vmatpush.bf16.msrb.mxu0 %v3114_v23  ;;  %v2997_v23 = vor.u32 %v3130_v48, %v2994_v32 }
 0x5b0   : > { %1957 = vmatpush.bf16.msrb.mxu0 %v3113_v49  ;;  %v2984_v49 = vld [vmem:[%s4113_s11 + $0x40] sm:$0xf] }
 0x5b1   : > { %v1754_v63 = vpop.xlane.xlu1 %1753 }
 0x5b4   : > { %1958 = vmatpush.bf16.msrb.mxu0 %v3112_v51  ;;  %v3129_v51 = vld [vmem:[%s4113_s11 + $0x44] sm:$0xf0] }
 0x5be   : > { %v1675_v54 = vpop.xlane.xlu0 %1674 }
 0x5bf   : > { %3371 = vrcp.f32 %v1675_v54 }
 0x5c0   : > { %3373 = vrcp.f32 %v1754_v63 }
 0x5c1   : > { %3375 = vrcp.f32 %v1751_v53 }
 0x5c2   : > { %3377 = vrcp.f32 %v1833_v59 }
 0x5c3   : > { %3379 = vrcp.f32 %v1830_v6 }
 0x5c5   : > { %v3372_v56 = vpop.eup %3371 }
 0x5c6   : > { %v1679_v57 = vmul.f32 %v3372_v56, %v4383_v9  ;;  %v3374_v43 = vpop.eup %3373 }
 0x5c7   : > { %v3376_v60 = vpop.eup %3375  ;;  %v1758_v62 = vmul.f32 %v3374_v43, %v4379_v3 }
 0x5c8   : > { %v1680_v29 = vpack.c.bf16 %v1679_v57, %v1678_v15  ;;  %v1757_v7 = vmul.f32 %v3376_v60, %v4369_v58  ;;  %v3378_v46 = vpop.eup %3377 }
 0x5c9   : > { %v1840_v52 = vpop.permute.xlu1 %1839  ;;  %v3380_v2 = vpop.eup %3379  ;;  %v1837_v41 = vmul.f32 %v3378_v46, %v4371_v50 }
 0x5ca   : > { %1852 = vmatpush.bf16.msra.mxu3 %v1840_v52  ;;  %v1759_v0 = vpack.c.bf16 %v1758_v62, %v1757_v7  ;;  %v1836_v5 = vmul.f32 %v3380_v2, %v4364_v61 }
 0x5cb   : > { %2905 = vmatmul.msk.bf16.vlgmr.msrb.gmra.mxu3 %vm1257_vm14, %v1680_v29 }
 0x5cc   : > { %v1838_v8 = vpack.c.bf16 %v1837_v41, %v1836_v5  ;;  %v3809_v5 = vmov 128.0  }
 0x5cd   : > { %3381 = vrcp.f32 %v3809_v5  ;;  %v2952_v5 = vld [vmem:[%s4113_s11] sm:$0xf] }
 0x5d1   : > { %v1761_v30 = vpop.permute.xlu0 %1760 }
 0x5d2   : > { %1773 = vmatpush.bf16.msra.mxu1 %v1761_v30 }
 0x5d5   : > { %2907 = vmatmul.msk.bf16.vlgmr.msra.gmra.mxu1 %vm1257_vm14, %v1759_v0 }
 0x5db   : > { %2909 = vmatmul.msk.bf16.vlgmr.msra.gmra.mxu3 %vm1257_vm14, %v1838_v8  ;;  %v3382_v8 = vpop.eup %3381 }
 0x5dc   : > { %vm1985_vm3 = vweird.f32 %v3382_v8 }
 0x610   : > { %v1371_v9 = vpop.f32.mrf.mxu3 }
 0x611   : > { %v1376_v11 = vpack.c.bf16 %v1371_v9, %v1371_v9  ;;  %v1981_v9 = vmul.f32 128.0, %v3382_v8 }
 0x613   : > { %1380 = vrot.lane.b32.xlu0 %v1376_v11, %s3808_s28  ;;  %v1982_v11 = vsub.f32 1.0, %v1981_v9 }
 0x614   : > { %v1451_v3 = vpop.f32.mrf.mxu1 }
 0x615   : > { %v1456_v58 = vpack.c.bf16 %v1451_v3, %v1451_v3  ;;  %v1983_v3 = vmul.f32 %v3382_v8, %v1982_v11 }
 0x617   : > { %1460 = vrot.lane.b32.xlu1 %v1456_v58, %s3807_s14 }
 0x618   : > { %v1373_v13 = vpop.f32.mrf.mxu3 }
 0x619   : > { %v1377_v33 = vpack.c.bf16 %v1373_v13, %v1373_v13 }
 0x61b   : > { %1382 = vrot.lane.b32.xlu2 %v1377_v33, %s3808_s28 }
 0x61c   : > { %v1453_v50 = vpop.f32.mrf.mxu1 }
 0x61d   : > { %v1457_v10 = vpack.c.bf16 %v1453_v50, %v1453_v50 }
 0x61f   : > { %1462 = vrot.lane.b32.xlu0 %v1457_v10, %s3807_s14 }
 0x620   : > { %v1531_v61 = vpop.f32.mrf.mxu3 }
 0x621   : > { %v1536_v14 = vpack.c.bf16 %v1531_v61, %v1531_v61 }
 0x623   : > { %1540 = vrot.lane.b32.xlu1 %v1536_v14, %s3806_s3 }
 0x624   : > { %v1625_v16 = vpop.f32.mrf.mxu1 }
 0x625   : > { %v1630_v17 = vpack.c.bf16 %v1625_v16, %v1625_v16 }
 0x627   : > { %1632 = vst.msk [vmem:[#allocation3 + $0x8] sm:$0xf] %vm1306_vm15, %v1630_v17 }
 0x628   : > { %v1533_v18 = vpop.f32.mrf.mxu3 }
 0x629   : > { %v1537_v20 = vpack.c.bf16 %v1533_v18, %v1533_v18 }
 0x62b   : > { %1542 = vrot.lane.b32.xlu0 %v1537_v20, %s3806_s3 }
 0x62c   : > { %v1627_v21 = vpop.f32.mrf.mxu1 }
 0x62d   : > { %v1631_v24 = vpack.c.bf16 %v1627_v21, %v1627_v21 }
 0x62f   : > { %1633 = vst.msk [vmem:[#allocation3 + $0xc] sm:$0xf] %vm1306_vm15, %v1631_v24 }
 0x64e   : > { %v1696_v26 = vpop.f32.mrf.mxu3 }
 0x64f   : > { %v1701_v27 = vpack.c.bf16 %v1696_v26, %v1696_v26 }
 0x651   : > { %1705 = vrot.lane.b32.xlu1 %v1701_v27, %s3808_s28  ;;  %v3008_v27 = vld [vmem:[%s4113_s11 + $0x70] sm:$0xf] }
 0x652   : > { %v1775_v28 = vpop.f32.mrf.mxu1 }
 0x653   : > { %v1780_v31 = vpack.c.bf16 %v1775_v28, %v1775_v28  ;;  %v3135_v28 = vld [vmem:[%s4113_s11 + $0x74] sm:$0xf0] }
 0x655   : > { %1784 = vrot.lane.b32.xlu2 %v1780_v31, %s3807_s14  ;;  %v3134_v31 = vld [vmem:[%s4113_s11 + $0x74] sm:$0xf] }
 0x656   : > { %v1698_v34 = vpop.f32.mrf.mxu3 }
 0x657   : > { %v1702_v35 = vpack.c.bf16 %v1698_v34, %v1698_v34  ;;  %v3009_v34 = vor.u32 %v3135_v28, %v3008_v27 }
 0x659   : > { %1707 = vrot.lane.b32.xlu0 %v1702_v35, %s3808_s28  ;;  %v3010_v35 = vld [vmem:[%s4113_s11 + $0x78] sm:$0xf0]  ;;  %2177 = vmatpush.bf16.msrb.mxu1 %v3009_v34 }
 0x65a   : > { %v1777_v36 = vpop.f32.mrf.mxu1 }
 0x65b   : > { %v1781_v37 = vpack.c.bf16 %v1777_v36, %v1777_v36  ;;  %v3013_v36 = vor.u32 %v3134_v31, %v3010_v35 }
 0x65d   : > { %1786 = vrot.lane.b32.xlu1 %v1781_v37, %s3807_s14  ;;  %2196 = vmatpush.bf16.msra.mxu2 %v3013_v36  ;;  %v3000_v37 = vld [vmem:[%s4113_s11 + $0x60] sm:$0xf] }
 0x65e   : > { %v1854_v4 = vpop.f32.mrf.mxu3 }
 0x65f   : > { %v1859_v25 = vpack.c.bf16 %v1854_v4, %v1854_v4  ;;  %v3133_v4 = vld [vmem:[%s4113_s11 + $0x64] sm:$0xf0] }
 0x661   : > { %1863 = vrot.lane.b32.xlu0 %v1859_v25, %s3806_s3  ;;  %v3132_v25 = vld [vmem:[%s4113_s11 + $0x64] sm:$0xf] }
 0x666   : > { %v1856_v38 = vpop.f32.mrf.mxu3 }
 0x667   : > { %v1860_v44 = vpack.c.bf16 %v1856_v38, %v1856_v38  ;;  %v3001_v38 = vor.u32 %v3133_v4, %v3000_v37 }
 0x669   : > { %1865 = vrot.lane.b32.xlu2 %v1860_v44, %s3806_s3  ;;  %v3005_v44 = vor.u32 %v3132_v25, %v3002_v1  ;;  %2178 = vmatpush.bf16.msrb.mxu1 %v3001_v38  ;;  %v3312_v25 = vld [vmem:[%s718_s8] ss:$0 sm:$0xff] }
 0x66b   : > { %2197 = vmatpush.bf16.msra.mxu2 %v3005_v44 }
 0x66f   : > { %2198 = vmatpush.bf16.msra.mxu2 %v2997_v23 }
 0x675   : > { %v1383_v12 = vpop.permute.xlu2 %1382 }
 0x676   : > { %1388 = vst.msk [vmem:[#allocation3 + $0x4] sm:$0xf] %vm1386_vm0, %v1383_v12  ;;  %v2993_v12 = vor.u32 %v3131_v47, %v2992_v45  ;;  %v3313_v47 = vld [vmem:[%s727_s9] ss:$0 sm:$0xff] }
 0x678   : > { %2179 = vmatpush.bf16.msrb.mxu1 %v2993_v12 }
 0x685   : > { %v1381_v42 = vpop.permute.xlu0 %1380 }
 0x686   : > { %1387 = vst.msk [vmem:[#allocation3] sm:$0xf] %vm1386_vm0, %v1381_v42  ;;  %v3128_v42 = vld [vmem:[%s4113_s11 + $0x44] sm:$0xf] }
 0x689   : > { %v1461_v6 = vpop.permute.xlu1 %1460 }
 0x68a   : > { %1467 = vst.msk [vmem:[#allocation3] sm:$0xf] %vm1466_vm1, %v1461_v6  ;;  %v2985_v6 = vor.u32 %v3129_v51, %v2984_v49  ;;  %v3143_v51 = vld [vmem:[%s4115_s18 + $0x38] sm:$0xff] }
 0x68b   : > { %2359 = vmatpush.bf16.msrb.mxu3 %v3143_v51 }
 0x68c   : > { %2180 = vmatpush.bf16.msrb.mxu1 %v2985_v6 }
 0x691   : > { %v1463_v53 = vpop.permute.xlu0 %1462 }
 0x692   : > { %1468 = vst.msk [vmem:[#allocation3 + $0x4] sm:$0xf] %vm1466_vm1, %v1463_v53  ;;  %v2986_v53 = vld [vmem:[%s4113_s11 + $0x48] sm:$0xf0] }
 0x695   : > { %v1541_v54 = vpop.permute.xlu1 %1540 }
 0x696   : > { %1547 = vst.msk [vmem:[#allocation3] sm:$0xf] %vm1546_vm2, %v1541_v54  ;;  %v2989_v54 = vor.u32 %v3128_v42, %v2986_v53  ;;  %v3151_v42 = vld [vmem:[%s4115_s18 + $0x78] sm:$0xff] }
 0x697   : > { %2378 = vmatpush.bf16.msra.mxu0 %v3151_v42 }
 0x698   : > { %2199 = vmatpush.bf16.msra.mxu2 %v2989_v54  ;;  %v3142_v54 = vld [vmem:[%s4115_s18 + $0x30] sm:$0xff] }
 0x699   : > { %2360 = vmatpush.bf16.msrb.mxu3 %v3142_v54 }
 0x69d   : > { %v1543_v63 = vpop.permute.xlu0 %1542 }
 0x69e   : > { %1548 = vst.msk [vmem:[#allocation3 + $0x4] sm:$0xf] %vm1546_vm2, %v1543_v63  ;;  %v2976_v63 = vld [vmem:[%s4113_s11 + $0x30] sm:$0xf] }
 0x6a5   : > { %v3110_v55 = vld [vmem:[#allocation3] sm:$0xff] }
 0x6a6   : > { %1959 = vmatmul.bf16.vlgmr.msrb.gmra.mxu0 %v3110_v55  ;;  %v3127_v55 = vld [vmem:[%s4113_s11 + $0x34] sm:$0xf0] }
 0x6af   : > { %v1785_v15 = vpop.permute.xlu2 %1784 }
 0x6c3   : > { %v1706_v56 = vpop.permute.xlu1 %1705  ;;  %v1866_v59 = vpop.permute.xlu2 %1865 }
 0x6c4   : > { %1711 = vst.msk [vmem:[#allocation3 + $0x8] sm:$0xf] %vm1386_vm0, %v1706_v56  ;;  %v3126_v56 = vld [vmem:[%s4113_s11 + $0x34] sm:$0xf] }
 0x6c5   : > { %1790 = vst.msk [vmem:[#allocation3 + $0x8] sm:$0xf] %vm1466_vm1, %v1785_v15  ;;  %v2977_v15 = vor.u32 %v3127_v55, %v2976_v63  ;;  %v3150_v63 = vld [vmem:[%s4115_s18 + $0x70] sm:$0xff] }
 0x6c6   : > { %2379 = vmatpush.bf16.msra.mxu0 %v3150_v63 }
 0x6c7   : > { %2181 = vmatpush.bf16.msrb.mxu1 %v2977_v15 }
 0x6cb   : > { %v1708_v57 = vpop.permute.xlu0 %1707 }
 0x6cc   : > { %1712 = vst.msk [vmem:[#allocation3 + $0xc] sm:$0xf] %vm1386_vm0, %v1708_v57  ;;  %v2978_v57 = vld [vmem:[%s4113_s11 + $0x38] sm:$0xf0] }
 0x6cf   : > { %v1787_v29 = vpop.permute.xlu1 %1786 }
 0x6d0   : > { %1791 = vst.msk [vmem:[#allocation3 + $0xc] sm:$0xf] %vm1466_vm1, %v1787_v29  ;;  %v2981_v29 = vor.u32 %v3126_v56, %v2978_v57  ;;  %v3141_v57 = vld [vmem:[%s4115_s18 + $0x28] sm:$0xff] }
 0x6d1   : > { %1870 = vst.msk [vmem:[#allocation3 + $0xc] sm:$0xf] %vm1546_vm2, %v1866_v59  ;;  %v2968_v59 = vld [vmem:[%s4113_s11 + $0x20] sm:$0xf]  ;;  %2361 = vmatpush.bf16.msrb.mxu3 %v3141_v57 }
 0x6d2   : > { %2200 = vmatpush.bf16.msra.mxu2 %v2981_v29  ;;  %v3149_v29 = vld [vmem:[%s4115_s18 + $0x68] sm:$0xff] }
 0x6d3   : > { %v1864_v52 = vpop.permute.xlu0 %1863  ;;  %2380 = vmatpush.bf16.msra.mxu0 %v3149_v29  ;;  %v3314_v29 = vld [vmem:[%s842_s12] ss:$0 sm:$0xff] }
 0x6d4   : > { %1869 = vst.msk [vmem:[#allocation3 + $0x8] sm:$0xf] %vm1546_vm2, %v1864_v52  ;;  %v3125_v52 = vld [vmem:[%s4113_s11 + $0x24] sm:$0xf0] }
 0x6db   : > { %v3111_v43 = vld [vmem:[#allocation3 + $0x8] sm:$0xff] }
 0x6dc   : > { %1964 = vmatmul.bf16.gmra.mxu0 %v3111_v43  ;;  %v3124_v43 = vld [vmem:[%s4113_s11 + $0x24] sm:$0xf] }
 0x723   : > { %v1960_v60 = vpop.f32.mrf.mxu0 }
 0x724   : > { %v1961_v62 = vadd.f32 %v1960_v60, %v4171_v19  ;;  %v1984_v19 = vadd.f32 %v3382_v8, %v1983_v3  ;;  %v2969_v60 = vor.u32 %v3125_v52, %v2968_v59  ;;  %v3120_v3 = vld [vmem:[%s4113_s11 + $0x4] sm:$0xf] }
 0x726   : > { %1972 = vadd.xlane.f32.xlu1 %v1961_v62  ;;  %v4451_v58 = vsel %vm1985_vm3, %v3382_v8, %v1984_v19  ;;  %2182 = vmatpush.bf16.msrb.mxu1 %v2969_v60  ;;  %v3121_v8 = vld [vmem:[%s4113_s11 + $0x4] sm:$0xf0]  ;;  %v2954_v19 = vld [vmem:[%s4113_s11 + $0x8] sm:$0xf0] }
 0x72b   : > { %v1962_v7 = vpop.f32.mrf.mxu0 }
 0x72c   : > { %v1963_v30 = vadd.f32 %v1962_v7, %v4173_v22 }
 0x72e   : > { %1974 = vadd.xlane.f32.xlu0 %v1963_v30 }
 0x759   : > { %v1965_v46 = vpop.f32.mrf.mxu0 }
 0x75a   : > { %v1966_v0 = vadd.f32 %v1965_v46, %v4187_v39  ;;  %v3123_v46 = vld [vmem:[%s4113_s11 + $0x14] sm:$0xf0] }
 0x75c   : > { %1976 = vadd.xlane.f32.xlu2 %v1966_v0 }
 0x761   : > { %v1967_v2 = vpop.f32.mrf.mxu0 }
 0x762   : > { %v1968_v41 = vadd.f32 %v1967_v2, %v4189_v40 }
 0x764   : > { %1978 = vadd.xlane.f32.xlu1 %v1968_v41 }
 0x799   : > { %v1973_v22 = vpop.xlane.xlu1 %1972 }
 0x79a   : > { %v1987_v13 = vmul.f32 %v4451_v58, %v1973_v22 }
 0x79c   : > { %v4454_v33 = vsub.f32 %v1961_v62, %v1987_v13  ;;  %v2970_v62 = vld [vmem:[%s4113_s11 + $0x28] sm:$0xf0]  ;;  %v2953_v13 = vor.u32 %v3121_v8, %v2952_v5 }
 0x79d   : > { %v2973_v7 = vor.u32 %v3124_v43, %v2970_v62  ;;  %v3140_v43 = vld [vmem:[%s4115_s18 + $0x20] sm:$0xff] }
 0x79e   : > { %v1995_v39 = vmul.f32 %v4454_v33, %v4454_v33  ;;  %2362 = vmatpush.bf16.msrb.mxu3 %v3140_v43 }
 0x79f   : > { %2201 = vmatpush.bf16.msra.mxu2 %v2973_v7 }
 0x7a0   : > { %1999 = vadd.xlane.f32.xlu0 %v1995_v39  ;;  %v2957_v39 = vor.u32 %v3120_v3, %v2954_v19 }
 0x7a1   : > { %v1975_v40 = vpop.xlane.xlu0 %1974 }
 0x7a2   : > { %v1988_v50 = vmul.f32 %v4451_v58, %v1975_v40 }
 0x7a4   : > { %v4459_v10 = vsub.f32 %v1963_v30, %v1988_v50  ;;  %v2960_v30 = vld [vmem:[%s4113_s11 + $0x10] sm:$0xf] }
 0x7a5   : > { %v2961_v2 = vor.u32 %v3123_v46, %v2960_v30 }
 0x7a6   : > { %v1996_v61 = vmul.f32 %v4459_v10, %v4459_v10 }
 0x7a7   : > { %2183 = vmatpush.bf16.msrb.mxu1 %v2961_v2 }
 0x7a8   : > { %2001 = vadd.xlane.f32.xlu2 %v1996_v61 }
 0x7ab   : > { %2184 = vmatpush.bf16.msrb.mxu1 %v2953_v13 }
 0x7cf   : > { %v1977_v14 = vpop.xlane.xlu2 %1976 }
 0x7d0   : > { %v1989_v16 = vmul.f32 %v4451_v58, %v1977_v14 }
 0x7d2   : > { %v4464_v17 = vsub.f32 %v1966_v0, %v1989_v16  ;;  %v3122_v0 = vld [vmem:[%s4113_s11 + $0x14] sm:$0xf] }
 0x7d4   : > { %v1997_v18 = vmul.f32 %v4464_v17, %v4464_v17 }
 0x7d6   : > { %2003 = vadd.xlane.f32.xlu1 %v1997_v18 }
 0x7d7   : > { %v1979_v20 = vpop.xlane.xlu1 %1978 }
 0x7d8   : > { %v1990_v21 = vmul.f32 %v4451_v58, %v1979_v20 }
 0x7da   : > { %v4469_v24 = vsub.f32 %v1968_v41, %v1990_v21  ;;  %v2962_v41 = vld [vmem:[%s4113_s11 + $0x18] sm:$0xf0] }
 0x7db   : > { %v2965_v11 = vor.u32 %v3122_v0, %v2962_v41 }
 0x7dc   : > { %v1998_v26 = vmul.f32 %v4469_v24, %v4469_v24 }
 0x7dd   : > { %2202 = vmatpush.bf16.msra.mxu2 %v2965_v11 }
 0x7de   : > { %2005 = vadd.xlane.f32.xlu0 %v1998_v26 }
 0x7e1   : > { %2203 = vmatpush.bf16.msra.mxu2 %v2957_v39  ;;  %v3139_v39 = vld [vmem:[%s4115_s18 + $0x18] sm:$0xff] }
 0x7e2   : > { %2363 = vmatpush.bf16.msrb.mxu3 %v3139_v39 }
 0x813   : > { %v2000_v9 = vpop.xlane.xlu0 %1999 }
 0x814   : > { %v2007_v22 = vmul.f32 %v2000_v9, %v4451_v58 }
 0x816   : > { %v2011_v40 = vadd.f32 1e-06, %v2007_v22 }
 0x818   : > { %3383 = vrsqrt.f32 %v2011_v40  ;;  %vm2021_vm5 = vweird.f32 %v2011_v40 }
 0x81b   : > { %v2002_v50 = vpop.xlane.xlu2 %2001 }
 0x81c   : > { %v2008_v61 = vmul.f32 %v2002_v50, %v4451_v58  ;;  %v3147_v50 = vld [vmem:[%s4115_s18 + $0x58] sm:$0xff] }
 0x81e   : > { %v3384_v14 = vpop.eup %3383  ;;  %v2012_v16 = vadd.f32 1e-06, %v2008_v61  ;;  %v3137_v61 = vld [vmem:[%s4115_s18 + $0x8] sm:$0xff] }
 0x81f   : > { %v2016_v18 = vmul.f32 %v3384_v14, %v2011_v40  ;;  %vm2022_vm4 = vweird.f32 %v3384_v14  ;;  %v3148_v40 = vld [vmem:[%s4115_s18 + $0x60] sm:$0xff] }
 0x820   : > { %3385 = vrsqrt.f32 %v2012_v16  ;;  %vm2023_vm6 = vmor %vm2021_vm5, %vm2022_vm4  ;;  %vm2031_vm8 = vweird.f32 %v2012_v16  ;;  %2381 = vmatpush.bf16.msra.mxu0 %v3148_v40 }
 0x821   : > { %v2017_v20 = vmul.f32 %v3384_v14, %v2016_v18  ;;  %v3145_v18 = vld [vmem:[%s4115_s18 + $0x48] sm:$0xff] }
 0x823   : > { %v2018_v21 = vmul.f32 0.5, %v2017_v20  ;;  %v3144_v20 = vld [vmem:[%s4115_s18 + $0x40] sm:$0xff] }
 0x824   : > { %2382 = vmatpush.bf16.msra.mxu0 %v3147_v50 }
 0x825   : > { %v2019_v26 = vsub.f32 1.5, %v2018_v21  ;;  %v2091_v21 = vld [vmem:[%s4099_s5] sm:$0x3] }
 0x826   : > { %v3386_v27 = vpop.eup %3385 }
 0x827   : > { %v2020_v28 = vmul.f32 %v3384_v14, %v2019_v26  ;;  %v2026_v31 = vmul.f32 %v3386_v27, %v2012_v16  ;;  %vm2032_vm7 = vweird.f32 %v3386_v27  ;;  %v3136_v16 = vld [vmem:[%s4115_s18] sm:$0xff] }
 0x828   : > { %vm2033_vm9 = vmor %vm2031_vm8, %vm2032_vm7 }
 0x829   : > { %v2027_v34 = vmul.f32 %v3386_v27, %v2026_v31  ;;  %v2024_v35 = vsel %vm2023_vm6, %v3384_v14, %v2020_v28  ;;  %v3146_v14 = vld [vmem:[%s4115_s18 + $0x50] sm:$0xff] }
 0x82a   : > { %v2055_v4 = vmul.f32 %v2024_v35, %v4454_v33  ;;  %2383 = vmatpush.bf16.msra.mxu0 %v3146_v14  ;;  %v2094_v35 = vperm.slane %v2091_v21, 1 }
 0x82b   : > { %v2028_v36 = vmul.f32 0.5, %v2027_v34 }
 0x82c   : > { %v2062_v45 = vmul.f32 %v3312_v25, %v2055_v4 }
 0x82d   : > { %v2029_v37 = vsub.f32 1.5, %v2028_v36 }
 0x82e   : > { %v4513_v12 = vadd.f32 %v3313_v47, %v2062_v45  ;;  %2384 = vmatpush.bf16.msra.mxu0 %v3145_v18 }
 0x82f   : > { %v2030_v38 = vmul.f32 %v3386_v27, %v2029_v37 }
 0x831   : > { %v2034_v1 = vsel %vm2033_vm9, %v3386_v27, %v2030_v38  ;;  %v2093_v27 = vperm.slane %v2091_v21, 0 }
 0x832   : > { %v2056_v44 = vmul.f32 %v2034_v1, %v4459_v10  ;;  %2385 = vmatpush.bf16.msra.mxu0 %v3144_v20 }
 0x834   : > { %v2063_v48 = vmul.f32 %v3312_v25, %v2056_v44 }
 0x836   : > { %v4515_v32 = vadd.f32 %v3313_v47, %v2063_v48 }
 0x838   : > { %v2073_v33 = vpack.c.bf16 %v4515_v32, %v4513_v12 }
 0x83a   : > { %2185 = vmatmul.bf16.vlgmr.msrb.gmra.mxu1 %v2073_v33  ;;  %2204 = vmatmul.bf16.vlgmr.msra.gmra.mxu2 %v2073_v33 }
 0x849   : > { %v2004_v23 = vpop.xlane.xlu1 %2003 }
 0x84a   : > { %v2009_v49 = vmul.f32 %v2004_v23, %v4451_v58 }
 0x84c   : > { %v2013_v10 = vadd.f32 1e-06, %v2009_v49 }
 0x84e   : > { %3387 = vrsqrt.f32 %v2013_v10  ;;  %vm2041_vm11 = vweird.f32 %v2013_v10 }
 0x851   : > { %v2006_v6 = vpop.xlane.xlu0 %2005 }
 0x852   : > { %v2010_v53 = vmul.f32 %v2006_v6, %v4451_v58 }
 0x854   : > { %v3388_v55 = vpop.eup %3387  ;;  %v2014_v56 = vadd.f32 1e-06, %v2010_v53 }
 0x855   : > { %v2036_v15 = vmul.f32 %v3388_v55, %v2013_v10  ;;  %vm2042_vm10 = vweird.f32 %v3388_v55 }
 0x856   : > { %3389 = vrsqrt.f32 %v2014_v56  ;;  %vm2043_vm12 = vmor %vm2041_vm11, %vm2042_vm10  ;;  %vm2051_vm14 = vweird.f32 %v2014_v56 }
 0x857   : > { %v2037_v59 = vmul.f32 %v3388_v55, %v2036_v15 }
 0x859   : > { %v2038_v52 = vmul.f32 0.5, %v2037_v59 }
 0x85b   : > { %v2039_v60 = vsub.f32 1.5, %v2038_v52 }
 0x85c   : > { %v3390_v62 = vpop.eup %3389 }
 0x85d   : > { %v2040_v7 = vmul.f32 %v3388_v55, %v2039_v60  ;;  %v2046_v30 = vmul.f32 %v3390_v62, %v2014_v56  ;;  %vm2052_vm13 = vweird.f32 %v3390_v62 }
 0x85e   : > { %vm2053_vm15 = vmor %vm2051_vm14, %vm2052_vm13 }
 0x85f   : > { %v2047_v46 = vmul.f32 %v3390_v62, %v2046_v30  ;;  %v2044_v2 = vsel %vm2043_vm12, %v3388_v55, %v2040_v7 }
 0x860   : > { %v2057_v5 = vmul.f32 %v2044_v2, %v4464_v17 }
 0x861   : > { %v2048_v0 = vmul.f32 0.5, %v2047_v46 }
 0x862   : > { %v2064_v3 = vmul.f32 %v3312_v25, %v2057_v5 }
 0x863   : > { %v2049_v41 = vsub.f32 1.5, %v2048_v0 }
 0x864   : > { %v4530_v22 = vadd.f32 %v3313_v47, %v2064_v3 }
 0x865   : > { %v2050_v8 = vmul.f32 %v3390_v62, %v2049_v41 }
 0x867   : > { %v2054_v9 = vsel %vm2053_vm15, %v3390_v62, %v2050_v8 }
 0x868   : > { %v2058_v11 = vmul.f32 %v2054_v9, %v4469_v24  ;;  %v3138_v24 = vld [vmem:[%s4115_s18 + $0x10] sm:$0xff] }
 0x869   : > { %2364 = vmatpush.bf16.msrb.mxu3 %v3138_v24 }
 0x86a   : > { %v2065_v19 = vmul.f32 %v3312_v25, %v2058_v11 }
 0x86c   : > { %v4532_v13 = vadd.f32 %v3313_v47, %v2065_v19 }
 0x86d   : > { %2365 = vmatpush.bf16.msrb.mxu3 %v3137_v61 }
 0x86e   : > { %v2074_v17 = vpack.c.bf16 %v4532_v13, %v4530_v22 }
 0x870   : > { %2190 = vmatmul.bf16.gmra.mxu1 %v2074_v17  ;;  %2209 = vmatmul.bf16.gmra.mxu2 %v2074_v17 }
 0x871   : > { %2366 = vmatpush.bf16.msrb.mxu3 %v3136_v16 }
 0x8b7   : > { %v2186_v26 = vpop.f32.mrf.mxu1 }
 0x8b8   : > { %v2187_v31 = vadd.f32 %v2186_v26, %v2093_v27 }
 0x8ba   : > { %v2215_v37 = vmax.f32 %v2187_v31, 0.0 }
 0x8bd   : > { %v2205_v28 = vpop.f32.mrf.mxu2 }
 0x8be   : > { %v2206_v25 = vadd.f32 %v2205_v28, %v2094_v35 }
 0x8bf   : > { %v2188_v34 = vpop.f32.mrf.mxu1 }
 0x8c0   : > { %v2189_v36 = vadd.f32 %v2188_v34, %v2093_v27  ;;  %v2216_v45 = vmax.f32 %v2206_v25, 0.0 }
 0x8c2   : > { %v2217_v4 = vmax.f32 %v2189_v36, 0.0 }
 0x8c4   : > { %v2223_v38 = vpack.c.bf16 %v2217_v4, %v2215_v37 }
 0x8c5   : > { %v2207_v1 = vpop.f32.mrf.mxu2 }
 0x8c6   : > { %v2208_v44 = vadd.f32 %v2207_v1, %v2094_v35  ;;  %2367 = vmatmul.bf16.vlgmr.msrb.gmra.mxu3 %v2223_v38 }
 0x8c8   : > { %v2218_v47 = vmax.f32 %v2208_v44, 0.0 }
 0x8ca   : > { %v2224_v48 = vpack.c.bf16 %v2218_v47, %v2216_v45 }
 0x8cc   : > { %2386 = vmatmul.bf16.vlgmr.msra.gmra.mxu0 %v2224_v48 }
 0x8ed   : > { %v2191_v33 = vpop.f32.mrf.mxu1 }
 0x8ee   : > { %v2192_v49 = vadd.f32 %v2191_v33, %v2093_v27 }
 0x8f0   : > { %v2219_v42 = vmax.f32 %v2192_v49, 0.0  ;;  %v3315_v49 = vld [vmem:[%s845_s19] ss:$0 sm:$0xff] }
 0x8f3   : > { %v2210_v23 = vpop.f32.mrf.mxu2 }
 0x8f4   : > { %v2211_v53 = vadd.f32 %v2210_v23, %v2094_v35 }
 0x8f5   : > { %v2193_v10 = vpop.f32.mrf.mxu1 }
 0x8f6   : > { %v2194_v51 = vadd.f32 %v2193_v10, %v2093_v27  ;;  %v2220_v56 = vmax.f32 %v2211_v53, 0.0 }
 0x8f8   : > { %v2221_v6 = vmax.f32 %v2194_v51, 0.0 }
 0x8fa   : > { %v2225_v54 = vpack.c.bf16 %v2221_v6, %v2219_v42  ;;  %v3316_v42 = vld [vmem:[%s848_s6] ss:$0 sm:$0xff]  ;;  %s4686_s6 = sld [smem:[#allocation25_spill]] }
 0x8fb   : > { %v2212_v63 = vpop.f32.mrf.mxu2 }
 0x8fc   : > { %v2213_v55 = vadd.f32 %v2212_v63, %v2094_v35  ;;  %2372 = vmatmul.bf16.gmra.mxu3 %v2225_v54 }
 0x8fe   : > { %v2222_v15 = vmax.f32 %v2213_v55, 0.0 }
 0x900   : > { %v2226_v57 = vpack.c.bf16 %v2222_v15, %v2220_v56  ;;  %p3078_p3 = scmp.ne.s32.totalorder %s4686_s6, 1 }
 0x902   : > { %2391 = vmatmul.bf16.gmra.mxu0 %v2226_v57 }
 0x949   : > { %v2368_v59 = vpop.f32.mrf.mxu3  ;;  %v2387_v52 = vpop.f32.mrf.mxu0 }
 0x94a   : > { %v2369_v43 = vadd.f32 %v3314_v29, %v2368_v59 }
 0x94c   : > { %v2388_v60 = vadd.f32 %v2387_v52, %v2369_v43 }
 0x94e   : > { %v2397_v62 = vadd.f32 %v2388_v60, %v4513_v12 }
 0x950   : > { %2403 = vadd.xlane.f32.xlu2 %v2397_v62 }
 0x951   : > { %v2370_v7 = vpop.f32.mrf.mxu3  ;;  %v2389_v46 = vpop.f32.mrf.mxu0 }
 0x952   : > { %v2371_v30 = vadd.f32 %v3314_v29, %v2370_v7 }
 0x954   : > { %v2390_v0 = vadd.f32 %v2389_v46, %v2371_v30 }
 0x956   : > { %v2398_v2 = vadd.f32 %v2390_v0, %v4515_v32 }
 0x958   : > { %2405 = vadd.xlane.f32.xlu1 %v2398_v2 }
 0x97f   : > { %v2373_v41 = vpop.f32.mrf.mxu3  ;;  %v2392_v5 = vpop.f32.mrf.mxu0 }
 0x980   : > { %v2374_v8 = vadd.f32 %v3314_v29, %v2373_v41 }
 0x982   : > { %v2393_v9 = vadd.f32 %v2392_v5, %v2374_v8 }
 0x984   : > { %v2399_v11 = vadd.f32 %v2393_v9, %v4530_v22 }
 0x986   : > { %2407 = vadd.xlane.f32.xlu0 %v2399_v11 }
 0x987   : > { %v2375_v3 = vpop.f32.mrf.mxu3  ;;  %v2394_v17 = vpop.f32.mrf.mxu0 }
 0x988   : > { %v2376_v19 = vadd.f32 %v3314_v29, %v2375_v3 }
 0x98a   : > { %v2395_v39 = vadd.f32 %v2394_v17, %v2376_v19 }
 0x98c   : > { %v2400_v12 = vadd.f32 %v2395_v39, %v4532_v13 }
 0x98e   : > { %2409 = vadd.xlane.f32.xlu2 %v2400_v12 }
 0x9c3   : > { %v2404_v40 = vpop.xlane.xlu2 %2403 }
 0x9c4   : > { %v2411_v24 = vmul.f32 %v2404_v40, %v4451_v58 }
 0x9c6   : > { %v2415_v50 = vsub.f32 %v2397_v62, %v2411_v24 }
 0x9c8   : > { %v2419_v32 = vmul.f32 %v2415_v50, %v2415_v50 }
 0x9ca   : > { %2423 = vadd.xlane.f32.xlu1 %v2419_v32 }
 0x9cb   : > { %v2406_v61 = vpop.xlane.xlu1 %2405 }
 0x9cc   : > { %v2412_v14 = vmul.f32 %v2406_v61, %v4451_v58 }
 0x9ce   : > { %v2416_v16 = vsub.f32 %v2398_v2, %v2412_v14 }
 0x9d0   : > { %v2420_v18 = vmul.f32 %v2416_v16, %v2416_v16 }
 0x9d2   : > { %2425 = vadd.xlane.f32.xlu0 %v2420_v18 }
 0x9f9   : > { %v2408_v22 = vpop.xlane.xlu0 %2407 }
 0x9fa   : > { %v2413_v20 = vmul.f32 %v2408_v22, %v4451_v58 }
 0x9fc   : > { %v4558_v21 = vsub.f32 %v2399_v11, %v2413_v20 }
 0x9fe   : > { %v2421_v13 = vmul.f32 %v4558_v21, %v4558_v21 }
 0xa00   : > { %2427 = vadd.xlane.f32.xlu2 %v2421_v13 }
 0xa01   : > { %v2410_v26 = vpop.xlane.xlu2 %2409 }
 0xa02   : > { %v2414_v27 = vmul.f32 %v2410_v26, %v4451_v58 }
 0xa04   : > { %v4563_v28 = vsub.f32 %v2400_v12, %v2414_v27 }
 0xa06   : > { %v2422_v31 = vmul.f32 %v4563_v28, %v4563_v28 }
 0xa08   : > { %2429 = vadd.xlane.f32.xlu1 %v2422_v31 }
 0xa3d   : > { %v2424_v34 = vpop.xlane.xlu1 %2423 }
 0xa3e   : > { %v2431_v35 = vmul.f32 %v2424_v34, %v4451_v58 }
 0xa40   : > { %v2435_v36 = vadd.f32 1e-06, %v2431_v35 }
 0xa42   : > { %3391 = vrsqrt.f32 %v2435_v36  ;;  %vm2445_vm1 = vweird.f32 %v2435_v36 }
 0xa45   : > { %v2426_v37 = vpop.xlane.xlu0 %2425 }
 0xa46   : > { %v2432_v4 = vmul.f32 %v2426_v37, %v4451_v58 }
 0xa48   : > { %v3392_v25 = vpop.eup %3391  ;;  %v2436_v38 = vadd.f32 1e-06, %v2432_v4 }
 0xa49   : > { %v2440_v1 = vmul.f32 %v3392_v25, %v2435_v36  ;;  %vm2446_vm0 = vweird.f32 %v3392_v25 }
 0xa4a   : > { %3393 = vrsqrt.f32 %v2436_v38  ;;  %vm2447_vm2 = vmor %vm2445_vm1, %vm2446_vm0  ;;  %vm2455_vm4 = vweird.f32 %v2436_v38 }
 0xa4b   : > { %v2441_v44 = vmul.f32 %v3392_v25, %v2440_v1 }
 0xa4d   : > { %v2442_v45 = vmul.f32 0.5, %v2441_v44 }
 0xa4f   : > { %v2443_v47 = vsub.f32 1.5, %v2442_v45 }
 0xa50   : > { %v3394_v48 = vpop.eup %3393 }
 0xa51   : > { %v2444_v33 = vmul.f32 %v3392_v25, %v2443_v47  ;;  %v2450_v23 = vmul.f32 %v3394_v48, %v2436_v38  ;;  %vm2456_vm3 = vweird.f32 %v3394_v48 }
 0xa52   : > { %vm2457_vm5 = vmor %vm2455_vm4, %vm2456_vm3 }
 0xa53   : > { %v2448_v10 = vsel %vm2447_vm2, %v3392_v25, %v2444_v33  ;;  %v2451_v51 = vmul.f32 %v3394_v48, %v2450_v23 }
 0xa54   : > { %v2479_v6 = vmul.f32 %v2448_v10, %v2415_v50 }
 0xa55   : > { %v2452_v53 = vmul.f32 0.5, %v2451_v51 }
 0xa56   : > { %v2486_v54 = vmul.f32 %v3315_v49, %v2479_v6 }
 0xa57   : > { %v2453_v63 = vsub.f32 1.5, %v2452_v53 }
 0xa58   : > { %v2493_v55 = vadd.f32 %v3316_v42, %v2486_v54 }
 0xa59   : > { %v2454_v56 = vmul.f32 %v3394_v48, %v2453_v63 }
 0xa5a   : > { %2497 = vst [vmem:[#allocation2 + $0x10] sm:$0xff] %v2493_v55 }
 0xa5b   : > { %v2458_v15 = vsel %vm2457_vm5, %v3394_v48, %v2454_v56 }
 0xa5c   : > { %v2480_v57 = vmul.f32 %v2458_v15, %v2416_v16 }
 0xa5e   : > { %v2487_v29 = vmul.f32 %v3315_v49, %v2480_v57 }
 0xa60   : > { %v2494_v59 = vadd.f32 %v3316_v42, %v2487_v29 }
 0xa62   : > { %2498 = vst [vmem:[#allocation2] sm:$0xff] %v2494_v59 }
 0xa73   : > { %v2428_v52 = vpop.xlane.xlu2 %2427 }
 0xa74   : > { %v2433_v43 = vmul.f32 %v2428_v52, %v4451_v58 }
 0xa76   : > { %v2437_v60 = vadd.f32 1e-06, %v2433_v43 }
 0xa78   : > { %3395 = vrsqrt.f32 %v2437_v60  ;;  %vm2465_vm7 = vweird.f32 %v2437_v60 }
 0xa7b   : > { %v2430_v62 = vpop.xlane.xlu1 %2429 }
 0xa7c   : > { %v2434_v7 = vmul.f32 %v2430_v62, %v4451_v58 }
 0xa7e   : > { %v3396_v30 = vpop.eup %3395  ;;  %v2438_v46 = vadd.f32 1e-06, %v2434_v7 }
 0xa7f   : > { %v2460_v0 = vmul.f32 %v3396_v30, %v2437_v60  ;;  %vm2466_vm6 = vweird.f32 %v3396_v30 }
 0xa80   : > { %3397 = vrsqrt.f32 %v2438_v46  ;;  %vm2467_vm8 = vmor %vm2465_vm7, %vm2466_vm6  ;;  %vm2475_vm10 = vweird.f32 %v2438_v46 }
 0xa81   : > { %v2461_v2 = vmul.f32 %v3396_v30, %v2460_v0 }
 0xa83   : > { %v2462_v41 = vmul.f32 0.5, %v2461_v2 }
 0xa85   : > { %v2463_v5 = vsub.f32 1.5, %v2462_v41 }
 0xa86   : > { %v3398_v8 = vpop.eup %3397 }
 0xa87   : > { %v2464_v9 = vmul.f32 %v3396_v30, %v2463_v5  ;;  %v2470_v11 = vmul.f32 %v3398_v8, %v2438_v46  ;;  %vm2476_vm9 = vweird.f32 %v3398_v8 }
 0xa88   : > { %vm2477_vm11 = vmor %vm2475_vm10, %vm2476_vm9 }
 0xa89   : > { %v2468_v3 = vsel %vm2467_vm8, %v3396_v30, %v2464_v9  ;;  %v2471_v19 = vmul.f32 %v3398_v8, %v2470_v11 }
 0xa8a   : > { %v2481_v17 = vmul.f32 %v2468_v3, %v4558_v21 }
 0xa8b   : > { %v2472_v39 = vmul.f32 0.5, %v2471_v19 }
 0xa8c   : > { %v2488_v12 = vmul.f32 %v3315_v49, %v2481_v17 }
 0xa8d   : > { %v2473_v58 = vsub.f32 1.5, %v2472_v39 }
 0xa8e   : > { %v2495_v40 = vadd.f32 %v3316_v42, %v2488_v12 }
 0xa8f   : > { %v2474_v24 = vmul.f32 %v3398_v8, %v2473_v58 }
 0xa90   : > { %2499 = vst [vmem:[#allocation2 + $0x18] sm:$0xff] %v2495_v40 }
 0xa91   : > { %v2478_v50 = vsel %vm2477_vm11, %v3398_v8, %v2474_v24 }
 0xa92   : > { %v2482_v32 = vmul.f32 %v2478_v50, %v4563_v28 }
 0xa94   : > { %v2489_v61 = vmul.f32 %v3315_v49, %v2482_v32  ;;  %2504 = sbr.rel (%p3078_p3) target bundleno = 2717 (0xa9d), region = 128 }
 0xa96   : > { %v2496_v14 = vadd.f32 %v3316_v42, %v2489_v61 }
 0xa98   : > { %2500 = vst [vmem:[#allocation2 + $0x8] sm:$0xff] %v2496_v14 }
 0xa99   : > { %2505 = vst [vmem:[#allocation18] sm:$0xff] %v2493_v55 }
 0xa9a   : > { %2506 = vst [vmem:[#allocation18 + $0x8] sm:$0xff] %v2494_v59 }
 0xa9b   : > { %2508 = vst [vmem:[#allocation18 + $0x10] sm:$0xff] %v2495_v40 }
 0xa9c   : > { %2509 = vst [vmem:[#allocation18 + $0x18] sm:$0xff] %v2496_v14 }
 0xa9d PF: > { %p3228_p4 = scmp.eq.s32.totalorder %s3922_s24, 1  ;;  %s4687_s13 = sld [smem:[#allocation44_spill]] }
 0xa9e   : > { %s3810_s2 = smov [#allocation18]   ;;  %s3811_s16 = smov 128  }
 0xa9f   : > { %s2519_s19 = sshll.u32 %s3810_s2, 4  ;;  %s3812_s10 = smov 8   ;;  %s2520_s19 = int_to_ptr.vmem [resolvable:$true] %s2519_s19 }
 0xaa3   : > { %s2521_s1 = sshll.u32 %s4687_s13, 4  ;;  %s2522_s1 = int_to_ptr.hbm [resolvable:$true] %s2521_s1 }
 0xaa4   : > { %3184 = dma.vmem_to_hbm [thread:$0]  (%p3228_p4), %s2520_s19, 512, %s2522_s1, [#allocation6], %s3811_s16, %s3811_s16, %s3812_s10  }
 0xaa5   : > { %3768 = dma.done.wait (%p3228_p4), [#allocation6], 512  }
 0xaa6   : > { %3770 = vsyncadd (%p3228_p4), [#allocation6], 4294966784 }
 0xaa7 PF: > { %s29_s23 = sadd.s32 1, %s3793_s23   ;;  %s4688_s18 = sld [smem:[#allocation24_spill]] }
 0xaa8   : > { %p26_p5 = scmp.ge.s32.totalorder %s29_s23, 4   ;;  %s4689_s24 = sld [smem:[#allocation28_spill]] }
 0xaa9   : > { %s4690_s3 = sld [smem:[#allocation27_spill]]  ;;  %s4691_s19 = smov %s3781_s20 }
 0xaaa   : > { %s4693_s21 = smov %s3789_s22 }
 0xaab   :  { %28 = sbr.rel (!%p26_p5) target bundleno = 23 (0x17), region = 215 }
 0xaae   : > { %s4692_s20 = smov %s4689_s24 }
 0xaaf   : > { %s4694_s22 = smov %s4690_s3 }
 0xab0   :  { %2538 = vsyncpa [#allocation5], 1 }
 0xab1   :  { %2540 = vsyncpa [#allocation5 + $0x1], 1 }
 0xab2   :  { %2541 = vsyncpa [#allocation8], 1 }
 0xab3   :  { %2542 = vsyncpa [#allocation11], 1 }
 0xab4   :  { %2543 = vsyncpa [#allocation6], 1 }
 0xab5   :  { %2545 = vsyncpa [#allocation6 + $0x1], 1 }

// kernel: tpu_custom_call.1
= control target key start
LH: loop header
LB: loop body
LE: loop exit
PB: predicated region body
PF: predicated region fallthrough
CT: control target
= control target key end

     0   :  { %s4606_s0 = inlined_call_operand.hbm [shape: f32[2,16,128], index: 0, kind: input, shape index: {}]   ;;  %s4607_s1 = inlined_call_operand.hbm [shape: f32[16,128], index: 1, kind: input, shape index: {}]   ;;  %s4608_s2 = inlined_call_operand.hbm [shape: f32[1,128], index: 2, kind: input, shape index: {}]   ;;  %s4609_s3 = inlined_call_operand.hbm [shape: f32[1,128], index: 3, kind: input, shape index: {}]   ;;  %s4610_s4 = inlined_call_operand.vmem [shape: f32[2,1,16], index: 4, kind: input, shape index: {}]   ;;  %s4611_s5 = inlined_call_operand.hbm [shape: bf16[2,128,384], index: 5, kind: input, shape index: {}]   ;;  %s4612_s6 = inlined_call_operand.hbm [shape: bf16[2,128,128], index: 6, kind: input, shape index: {}]   ;;  %s4613_s7 = inlined_call_operand.hbm [shape: f32[2,1,128], index: 7, kind: input, shape index: {}]   ;;  %s4614_s8 = inlined_call_operand.hbm [shape: f32[2,1,128], index: 8, kind: input, shape index: {}]   ;;  %s4615_s9 = inlined_call_operand.hbm [shape: bf16[2,128,256], index: 9, kind: input, shape index: {}]   ;;  %s4616_s10 = inlined_call_operand.vmem [shape: f32[2,1,256], index: 10, kind: input, shape index: {}]   ;;  %s4617_s11 = inlined_call_operand.hbm [shape: bf16[2,256,128], index: 11, kind: input, shape index: {}]   ;;  %s4618_s12 = inlined_call_operand.vmem [shape: f32[2,1,128], index: 12, kind: input, shape index: {}]   ;;  %s4619_s13 = inlined_call_operand.vmem [shape: f32[2,1,128], index: 13, kind: input, shape index: {}]   ;;  %s4620_s14 = inlined_call_operand.vmem [shape: f32[2,1,128], index: 14, kind: input, shape index: {}]   ;;  %s4621_s15 = inlined_call_operand.hbm [shape: f32[2,16,128], index: 15, kind: output, shape index: {}]  }
   0x1   :  { %4634 = sst [smem:[#allocation29_spill]] %s4606_s0 }
   0x2   :  { %4635 = sst [smem:[#allocation30_spill]] %s4607_s1 }
   0x3   :  { %4636 = sst [smem:[#allocation31_spill]] %s4608_s2 }
   0x4   :  { %4637 = sst [smem:[#allocation32_spill]] %s4609_s3 }
   0x5   :  { %4638 = sst [smem:[#allocation33_spill]] %s4610_s4 }
   0x6   :  { %4639 = sst [smem:[#allocation34_spill]] %s4611_s5 }
   0x7   :  { %4640 = sst [smem:[#allocation35_spill]] %s4612_s6 }
   0x8   :  { %4641 = sst [smem:[#allocation36_spill]] %s4613_s7 }
   0x9   :  { %4642 = sst [smem:[#allocation37_spill]] %s4614_s8 }
   0xa   :  { %4643 = sst [smem:[#allocation38_spill]] %s4615_s9 }
   0xb   :  { %4644 = sst [smem:[#allocation39_spill]] %s4616_s10 }
   0xc   :  { %4645 = sst [smem:[#allocation40_spill]] %s4617_s11 }
   0xd   :  { %4646 = sst [smem:[#allocation41_spill]] %s4618_s12 }
   0xe   :  { %4647 = sst [smem:[#allocation42_spill]] %s4619_s13 }
   0xf   :  { %4648 = sst [smem:[#allocation43_spill]] %s4620_s14 }
  0x10   :  { %4649 = sst [smem:[#allocation44_spill]] %s4621_s15 }
  0x11   :  { %20 = vsyncpa [#allocation5], 0 }
  0x12   :  { %21 = vsyncpa [#allocation8], 0 }
  0x13   :  { %22 = vsyncpa [#allocation11], 0 }
  0x14   :  { %23 = vsyncpa [#allocation6], 0  ;;  %s3893_s18 = smov 0   ;;  %s3895_s19 = smov 0  }
  0x15   :  { %s3897_s20 = smov 0   ;;  %s3899_s21 = smov 0  }
  0x16   :  { %s3901_s22 = smov 0   ;;  %s3903_s23 = smov 0  }
  0x17 LB: > { %4650 = sst [smem:[#allocation24_spill]] %s3777_s19  ;;  %s3922_s24 = sadd.s32 4294967295, %s3793_s23   ;;  %s3793_s23 = sphi %s3903_s23, %s29_s23   ;;  %s3789_s22 = sphi %s3901_s22, %s4694_s22   ;;  %s3785_s21 = sphi %s3899_s21, %s4693_s21   ;;  %s3781_s20 = sphi %s3897_s20, %s4692_s20   ;;  %s3777_s19 = sphi %s3895_s19, %s4691_s19   ;;  %s3773_s18 = sphi %s3893_s18, %s4688_s18  }
  0x18   : > { %4651 = sst [smem:[#allocation25_spill]] %s3785_s21  ;;  %p170_p0 = scmp.ne.s32.totalorder %s3781_s20, %s3777_s19 }
  0x19   : > { %p171_p1 = scmp.eq.s32.totalorder %s3793_s23, 0  ;;  %p176_p2 = scmp.ne.s32.totalorder %s3777_s19, %s3773_s18 }
  0x1a   : > { %p177_p3 = scmp.eq.s32.totalorder %s3922_s24, 0  ;;  %p2770_p5 = scmp.ge.s32.totalorder %s3793_s23, 1 }
  0x1b   : > { %p3930_p4 = por %p171_p1, %p170_p0  ;;  %p447_p7 = scmp.lt.s32.totalorder %s3793_s23, 3 }
  0x1c   : > { %p3937_p6 = por %p177_p3, %p176_p2  ;;  %s4655_s0 = sld [smem:[#allocation29_spill]] }
  0x1d   : > { %p3945_p8 = pnand %p2770_p5, %p447_p7  ;;  %s3795_s17 = smov [#allocation4]  }
  0x1e   : > { %s4653_s27 = scalar_select %p3937_p6, 1, 0 }
  0x1f   : > { %p3187_p9 = pneg %p3945_p8  ;;  %s464_s18 = sshll.u32 %s3795_s17, 4  ;;  %s465_s18 = int_to_ptr.vmem [resolvable:$true] %s464_s18 }
  0x20   : > { %4654 = sst [smem:[#allocation26_spill]] %s4653_s27  ;;  %p3223_p11 = scmp.lt.s32.totalorder %s3793_s23, 2 }
  0x21   : > { %p3953_p10 = pnand %p3187_p9, %p177_p3  ;;  %s4623_s28 = smov 128  }
  0x22   : > { %s462_s30 = sshll.u32 %s4655_s0, 4  ;;  %s4625_s29 = smov 8   ;;  %s463_s30 = int_to_ptr.hbm [resolvable:$true] %s462_s30 }
  0x23   : > { %3190 = dma.hbm_to_vmem [thread:$0]  (!%p3953_p10), %s463_s30, 512, %s465_s18, [#allocation5], %s4623_s28, %s4623_s28, %s4625_s29  }
  0x24   : > { %s38_s0 = sadd.s32 1, %s3789_s22  ;;  %s524_s17 = sand.u32 1, %s3793_s23  }
  0x25   : > { %p39_p12 = scmp.ge.s32.totalorder %s38_s0, 2  ;;  %s3966_s15 = sand.u32 1, %s3781_s20  }
  0x26   : > { %s3153_s4 = smul.u32 192, %s3789_s22  ;;  %s4659_s5 = sld [smem:[#allocation34_spill]] }
  0x27   : > { %s4696_s0 = smov (%p39_p12, %s38_s0), 0  ;;  %s3152_s14 = smul.u32 192, %s3966_s15 }
  0x28   : > { %4658 = sst [smem:[#allocation27_spill]] %s4696_s0  ;;  %s160_s30 = ssub.s32 %s3789_s22, %s4696_s0 }
  0x29   : > { %p161_p13 = scmp.eq.s32.totalorder %s160_s30, 0  ;;  %s528_s28 = scalar_lea.vmem [#allocation12], %s3152_s14 }
  0x2a   : > { %s536_s29 = sshll.u32 %s528_s28, 4  ;;  %s4660_s21 = sadd.s32 1, %s3781_s20  ;;  %s537_s29 = int_to_ptr.vmem [resolvable:$true] %s536_s29 }
  0x2b   : > { %s3980_s27 = scalar_select %p161_p13, %s3781_s20, %s4660_s21  }
  0x2c   : > { %s533_s12 = scalar_lea.hbm %s4659_s5, %s3153_s4  ;;  %p3986_p0 = pnand %p3223_p11, %p3930_p4 }
  0x2d   : > { %s534_s18 = sshll.u32 %s533_s12, 4  ;;  %4661 = sst [smem:[#allocation28_spill]] %s3980_s27  ;;  %s535_s18 = int_to_ptr.hbm [resolvable:$true] %s534_s18 }
  0x2e   : > { %s2778_s4 = sshll.u32 %s3966_s15, 6  ;;  %s3991_s10 = scalar_lea.sflag [#allocation5], %s524_s17 }
  0x2f   : > { %s3798_s12 = smov 192   ;;  %s3799_s13 = smov 12  }
  0x30   : > { %3203 = dma.hbm_to_vmem [thread:$0]  (!%p3986_p0), %s535_s18, 3072, %s537_s29, %s3991_s10, %s3798_s12, %s3798_s12, %s3799_s13  }
  0x31   : > { %s3083_s14 = sshll.u32 %s3789_s22, 6  ;;  %s4663_s6 = sld [smem:[#allocation35_spill]] }
  0x32   : > { %s550_s30 = scalar_lea.vmem [#allocation13], %s2778_s4  ;;  %s4632_s17 = smov 64  }
  0x33   : > { %s558_s5 = sshll.u32 %s550_s30, 4  ;;  %s4633_s27 = smov 4   ;;  %s559_s5 = int_to_ptr.vmem [resolvable:$true] %s558_s5 }
  0x34   : > { %s4664_s7 = sld [smem:[#allocation36_spill]]  ;;  %s571_s13 = scalar_lea.vmem [#allocation14], %s3966_s15 }
  0x35   : > { %s578_s4 = sshll.u32 %s571_s13, 4  ;;  %s4665_s8 = sld [smem:[#allocation37_spill]]  ;;  %s579_s4 = int_to_ptr.vmem [resolvable:$true] %s578_s4 }
  0x36   : > { %s588_s30 = scalar_lea.vmem [#allocation15], %s3966_s15  ;;  %s4666_s1 = sld [smem:[#allocation30_spill]] }
  0x37   : > { %s555_s28 = scalar_lea.hbm %s4663_s6, %s3083_s14  ;;  %s4667_s21 = smov 8  }
  0x38   : > { %s556_s0 = sshll.u32 %s555_s28, 4  ;;  %s4668_s26 = smov 128   ;;  %s557_s0 = int_to_ptr.hbm [resolvable:$true] %s556_s0 }
  0x39   : > { %3206 = dma.hbm_to_vmem [thread:$0]  (!%p3986_p0), %s557_s0, 1024, %s559_s5, %s3991_s10, %s4632_s17, %s4632_s17, %s4633_s27  }
  0x3a   : > { %s574_s12 = scalar_lea.hbm %s4664_s7, %s3789_s22  ;;  %s595_s0 = sshll.u32 %s588_s30, 4  ;;  %s596_s0 = int_to_ptr.vmem [resolvable:$true] %s595_s0 }
  0x3b   : > { %s576_s14 = sshll.u32 %s574_s12, 4  ;;  %s591_s28 = scalar_lea.hbm %s4665_s8, %s3789_s22  ;;  %s577_s14 = int_to_ptr.hbm [resolvable:$true] %s576_s14 }
  0x3c   : > { %3209 = dma.hbm_to_vmem [thread:$0]  (!%p3986_p0), %s577_s14, 16, %s579_s4, %s3991_s10  }
  0x3d   : > { %s593_s5 = sshll.u32 %s591_s28, 4  ;;  %s476_s13 = sshll.u32 %s4666_s1, 4  ;;  %s594_s5 = int_to_ptr.hbm [resolvable:$true] %s593_s5  ;;  %s477_s13 = int_to_ptr.hbm [resolvable:$true] %s476_s13 }
  0x3e   : > { %3212 = dma.hbm_to_vmem [thread:$0]  (!%p3986_p0), %s594_s5, 16, %s596_s0, %s3991_s10  }
  0x3f   : > { %s3802_s12 = smov [#allocation7]   ;;  %s2781_s14 = sshll.u32 %s3966_s15, 7 }
  0x40   : > { %s478_s4 = sshll.u32 %s3802_s12, 4  ;;  %s3084_s28 = sshll.u32 %s3789_s22, 7  ;;  %s479_s4 = int_to_ptr.vmem [resolvable:$true] %s478_s4 }
  0x41   : > { %3193 = dma.hbm_to_vmem [thread:$0]  (!%p3953_p10), %s477_s13, 256, %s479_s4, [#allocation8], %s4668_s26, %s4668_s26, %s4667_s21  }
  0x42   : > { %s606_s30 = scalar_lea.vmem [#allocation16], %s2781_s14  ;;  %s4669_s9 = sld [smem:[#allocation38_spill]] }
  0x43   : > { %s614_s17 = sshll.u32 %s606_s30, 4  ;;  %s4670_s2 = sld [smem:[#allocation31_spill]]  ;;  %s615_s17 = int_to_ptr.vmem [resolvable:$true] %s614_s17 }
  0x44   : > { %s4671_s3 = sld [smem:[#allocation32_spill]]  ;;  %s3803_s29 = smov [#allocation9]  }
  0x45   : > { %s493_s18 = sshll.u32 %s3803_s29, 4  ;;  %s3804_s27 = smov [#allocation10]   ;;  %s494_s18 = int_to_ptr.vmem [resolvable:$true] %s493_s18 }
  0x46   : > { %s4672_s11 = sld [smem:[#allocation40_spill]]  ;;  %s4674_s13 = smov 64  }
  0x48   : > { %s611_s0 = scalar_lea.hbm %s4669_s9, %s3084_s28 }
  0x49   : > { %s612_s5 = sshll.u32 %s611_s0, 4  ;;  %s491_s15 = sshll.u32 %s4670_s2, 4  ;;  %s613_s5 = int_to_ptr.hbm [resolvable:$true] %s612_s5  ;;  %s492_s15 = int_to_ptr.hbm [resolvable:$true] %s491_s15 }
  0x4a   : > { %3215 = dma.hbm_to_vmem [thread:$0]  (!%p3986_p0), %s613_s5, 2048, %s615_s17, %s3991_s10, %s4668_s26, %s4668_s26, %s4667_s21  }
  0x4b   : > { %s503_s30 = sshll.u32 %s4671_s3, 4  ;;  %s505_s0 = sshll.u32 %s3804_s27, 4  ;;  %s504_s30 = int_to_ptr.hbm [resolvable:$true] %s503_s30  ;;  %s506_s0 = int_to_ptr.vmem [resolvable:$true] %s505_s0 }
  0x4c   : > { %3196 = dma.hbm_to_vmem [thread:$0]  (!%p3953_p10), %s492_s15, 16, %s494_s18, [#allocation8]  }
  0x4d   : > { %s640_s2 = scalar_lea.hbm %s4672_s11, %s3084_s28  ;;  %s635_s21 = scalar_lea.vmem [#allocation17], %s2781_s14 }
  0x4e   : > { %3199 = dma.hbm_to_vmem [thread:$0]  (!%p3953_p10), %s504_s30, 16, %s506_s0, [#allocation11]  }
  0x4f   : > { %s641_s17 = sshll.u32 %s640_s2, 4  ;;  %s643_s26 = sshll.u32 %s635_s21, 4  ;;  %s642_s17 = int_to_ptr.hbm [resolvable:$true] %s641_s17  ;;  %s644_s26 = int_to_ptr.vmem [resolvable:$true] %s643_s26 }
  0x50   : > { %s4673_s5 = smov 4   ;;  %673 = sbr.rel (%p3945_p8) target bundleno = 2727 (0xaa7), region = 80 }
  0x51   : > { %3218 = dma.hbm_to_vmem [thread:$0]  (!%p3986_p0), %s642_s17, 2048, %s644_s26, %s3991_s10, %s4674_s13, %s4674_s13, %s4673_s5  }
  0x55   : > { %3752 = dma.done.wait (%p177_p3), [#allocation5], 512  }
  0x56   : > { %3754 = vsyncadd (%p177_p3), [#allocation5], 4294966784 }
  0x57   : > { %3756 = dma.done.wait (%p177_p3), [#allocation8], 272  }
  0x58   : > { %3758 = vsyncadd (%p177_p3), [#allocation8], 4294967024 }
  0x59   : > { %3760 = dma.done.wait (%p177_p3), [#allocation11], 16  }
  0x5a   : > { %3762 = vsyncadd (%p177_p3), [#allocation11], 4294967280  ;;  %s4675_s1 = sld [smem:[#allocation24_spill]]  ;;  %s695_s19 = sand.u32 1, %s3922_s24  }
  0x5b   : > { %s696_s10 = scalar_lea.sflag [#allocation5], %s695_s19 }
  0x60   : > { %s4076_s25 = sand.u32 1, %s4675_s1  }
  0x61   : > { %s3154_s16 = smul.u32 192, %s4076_s25 }
  0x63   : > { %s4079_s14 = scalar_lea.vmem [#allocation12], %s3154_s16 }
  0x64   : > { %3764 = dma.done.wait (%p3937_p6), %s696_s10, 8224  }
  0x65   : > { %3766 = vsyncadd (%p3937_p6), %s696_s10, 4294959072  ;;  %s4677_s28 = sld [smem:[#allocation25_spill]]  ;;  %s2792_s15 = sshll.u32 %s4076_s25, 6 }
  0x66   : > { %s2793_s4 = sshll.u32 %s4076_s25, 7  ;;  %s4678_s0 = sld [smem:[#allocation41_spill]] }
  0x67   : > { %s4679_s26 = sld [smem:[#allocation39_spill]]  ;;  %s4109_s7 = scalar_lea.vmem [#allocation13], %s2792_s15 }
  0x68   : > { %s4680_s2 = sld [smem:[#allocation42_spill]]  ;;  %s718_s8 = scalar_lea.vmem [#allocation14], %s4076_s25 }
  0x69   : > { %s4681_s3 = sld [smem:[#allocation43_spill]]  ;;  %s727_s9 = scalar_lea.vmem [#allocation15], %s4076_s25 }
  0x6a   : > { %s4113_s11 = scalar_lea.vmem [#allocation16], %s2793_s4  ;;  %s4115_s18 = scalar_lea.vmem [#allocation17], %s2793_s4 }
  0x6b   : > { %p836_p1 = scmp.lt.s32.totalorder %s4677_s28, 1  ;;  %p2796_p2 = scmp.ne.s32.totalorder %s4677_s28, 0 }
  0x6d   : > { %s4089_s30 = scalar_select %p836_p1, %s4677_s28, 1 }
  0x6e   : > { %854 = sbr.rel (%p2796_p2) target bundleno = 396 (0x18c), region = 124 }
  0x6f   : > { %s2795_s29 = sshll.u32 %s4089_s30, 1  ;;  %s842_s12 = scalar_lea.vmem %s4678_s0, %s4089_s30 }
  0x70   : > { %s4099_s5 = scalar_lea.vmem %s4679_s26, %s2795_s29  ;;  %s845_s19 = scalar_lea.vmem %s4680_s2, %s4089_s30 }
  0x71   : > { %s848_s6 = scalar_lea.vmem %s4681_s3, %s4089_s30 }
  0x73   : > { %v925_v0 = vld [vmem:[#allocation4 + $0x10] sm:$0xff]  ;;  %v929_v1 = vld [vmem:[#allocation7] sm:$0xff]  ;;  %v926_v5 = vld [vmem:[#allocation4 + $0x18] sm:$0xff]  ;;  %v3805_v14 = vmov 128.0  }
  0x74   : > { %v855_v2 = vld [vmem:[#allocation4] sm:$0xff]  ;;  %v927_v3 = vmul.f32 11.313708, %v925_v0  ;;  %v856_v6 = vld [vmem:[#allocation4 + $0x8] sm:$0xff]  ;;  %v928_v9 = vmul.f32 11.313708, %v926_v5  ;;  %3300 = vrcp.f32 %v3805_v14 }
  0x75   : > { %v857_v4 = vmul.f32 11.313708, %v855_v2  ;;  %v858_v10 = vmul.f32 11.313708, %v856_v6  ;;  %v930_v11 = vld [vmem:[#allocation7 + $0x8] sm:$0xff] }
  0x76   : > { %v931_v7 = vadd.f32 %v929_v1, %v927_v3  ;;  %v932_v12 = vadd.f32 %v930_v11, %v928_v9  ;;  %v3296_v63 = vld [vmem:[#allocation9] ss:$0 sm:$0xff]  ;;  %v3297_v5 = vld [vmem:[#allocation10] ss:$0 sm:$0xff] }
  0x77   : > { %v861_v8 = vadd.f32 %v929_v1, %v857_v4  ;;  %v862_v13 = vadd.f32 %v930_v11, %v858_v10  ;;  %v3298_v3 = vld [vmem:[#allocation9] ss:$0 sm:$0xff]  ;;  %v3299_v9 = vld [vmem:[#allocation10] ss:$0 sm:$0xff] }
  0x78   : > { %935 = vadd.xlane.f32.xlu1 %v931_v7 }
  0x79   : > { %865 = vadd.xlane.f32.xlu0 %v861_v8 }
  0x7a   : > { %v3301_v15 = vpop.eup %3300 }
  0x7b   : > { %v870_v16 = vmul.f32 128.0, %v3301_v15  ;;  %vm874_vm0 = vweird.f32 %v3301_v15 }
  0x7d   : > { %v871_v17 = vsub.f32 1.0, %v870_v16 }
  0x7f   : > { %v872_v18 = vmul.f32 %v3301_v15, %v871_v17 }
  0x80   : > { %937 = vadd.xlane.f32.xlu1 %v932_v12 }
  0x81   : > { %867 = vadd.xlane.f32.xlu0 %v862_v13  ;;  %v873_v19 = vadd.f32 %v3301_v15, %v872_v18 }
  0x83   : > { %v875_v20 = vsel %vm874_vm0, %v3301_v15, %v873_v19 }
  0xeb   : > { %v936_v21 = vpop.xlane.xlu1 %935 }
  0xec   : > { %v866_v22 = vpop.xlane.xlu0 %865  ;;  %v939_v23 = vmul.f32 %v936_v21, %v875_v20 }
  0xed   : > { %v876_v24 = vmul.f32 %v875_v20, %v866_v22 }
  0xee   : > { %v4118_v25 = vsub.f32 %v931_v7, %v939_v23 }
  0xef   : > { %v878_v26 = vsub.f32 %v861_v8, %v876_v24 }
  0xf0   : > { %v943_v27 = vmul.f32 %v4118_v25, %v4118_v25 }
  0xf1   : > { %v880_v28 = vmul.f32 %v878_v26, %v878_v26 }
  0xf2   : > { %945 = vadd.xlane.f32.xlu0 %v943_v27 }
  0xf3   : > { %882 = vadd.xlane.f32.xlu2 %v880_v28  ;;  %v938_v29 = vpop.xlane.xlu1 %937 }
  0xf4   : > { %v868_v30 = vpop.xlane.xlu0 %867  ;;  %v940_v31 = vmul.f32 %v938_v29, %v875_v20 }
  0xf5   : > { %v877_v32 = vmul.f32 %v875_v20, %v868_v30 }
  0xf6   : > { %v4122_v33 = vsub.f32 %v932_v12, %v940_v31 }
  0xf7   : > { %v4124_v34 = vsub.f32 %v862_v13, %v877_v32 }
  0xf8   : > { %v944_v35 = vmul.f32 %v4122_v33, %v4122_v33 }
  0xf9   : > { %v881_v36 = vmul.f32 %v4124_v34, %v4124_v34 }
  0xfa   : > { %947 = vadd.xlane.f32.xlu1 %v944_v35 }
  0xfb   : > { %884 = vadd.xlane.f32.xlu2 %v881_v36 }
 0x165   : > { %v946_v38 = vpop.xlane.xlu0 %945 }
 0x166   : > { %v883_v37 = vpop.xlane.xlu2 %882  ;;  %v949_v40 = vmul.f32 %v946_v38, %v875_v20 }
 0x167   : > { %v886_v39 = vmul.f32 %v883_v37, %v875_v20 }
 0x168   : > { %v951_v42 = vadd.f32 1e-06, %v949_v40 }
 0x169   : > { %v888_v41 = vadd.f32 1e-06, %v886_v39 }
 0x16a   : > { %vm959_vm5 = vweird.f32 %v951_v42 }
 0x16b   : > { %3302 = vrsqrt.f32 %v888_v41  ;;  %vm896_vm3 = vweird.f32 %v888_v41 }
 0x16c   : > { %3304 = vrsqrt.f32 %v951_v42 }
 0x16d   : > { %v948_v43 = vpop.xlane.xlu1 %947 }
 0x16e   : > { %v885_v44 = vpop.xlane.xlu2 %884  ;;  %v950_v45 = vmul.f32 %v948_v43, %v875_v20 }
 0x16f   : > { %v887_v46 = vmul.f32 %v885_v44, %v875_v20 }
 0x170   : > { %v952_v48 = vadd.f32 1e-06, %v950_v45 }
 0x171   : > { %v3303_v47 = vpop.eup %3302  ;;  %v889_v49 = vadd.f32 1e-06, %v887_v46 }
 0x172   : > { %v3305_v50 = vpop.eup %3304  ;;  %v891_v51 = vmul.f32 %v3303_v47, %v888_v41  ;;  %3306 = vrsqrt.f32 %v952_v48  ;;  %vm897_vm1 = vweird.f32 %v3303_v47  ;;  %vm969_vm9 = vweird.f32 %v952_v48 }
 0x173   : > { %v954_v52 = vmul.f32 %v3305_v50, %v951_v42  ;;  %3308 = vrsqrt.f32 %v889_v49  ;;  %vm960_vm2 = vweird.f32 %v3305_v50  ;;  %vm898_vm4 = vmor %vm896_vm3, %vm897_vm1  ;;  %vm906_vm11 = vweird.f32 %v889_v49 }
 0x174   : > { %v892_v53 = vmul.f32 %v3303_v47, %v891_v51  ;;  %vm961_vm6 = vmor %vm959_vm5, %vm960_vm2 }
 0x175   : > { %v955_v54 = vmul.f32 %v3305_v50, %v954_v52 }
 0x176   : > { %v893_v55 = vmul.f32 0.5, %v892_v53 }
 0x177   : > { %v956_v56 = vmul.f32 0.5, %v955_v54 }
 0x178   : > { %v894_v57 = vsub.f32 1.5, %v893_v55  ;;  %v3307_v58 = vpop.eup %3306 }
 0x179   : > { %v957_v59 = vsub.f32 1.5, %v956_v56  ;;  %v3309_v60 = vpop.eup %3308  ;;  %v964_v62 = vmul.f32 %v3307_v58, %v952_v48  ;;  %vm970_vm7 = vweird.f32 %v3307_v58 }
 0x17a   : > { %v895_v61 = vmul.f32 %v3303_v47, %v894_v57  ;;  %v901_v1 = vmul.f32 %v3309_v60, %v889_v49  ;;  %vm907_vm8 = vweird.f32 %v3309_v60  ;;  %vm971_vm10 = vmor %vm969_vm9, %vm970_vm7 }
 0x17b   : > { %v958_v0 = vmul.f32 %v3305_v50, %v957_v59  ;;  %v965_v4 = vmul.f32 %v3307_v58, %v964_v62  ;;  %vm908_vm12 = vmor %vm906_vm11, %vm907_vm8 }
 0x17c   : > { %v899_v2 = vsel %vm898_vm4, %v3303_v47, %v895_v61  ;;  %v902_v8 = vmul.f32 %v3309_v60, %v901_v1 }
 0x17d   : > { %v910_v6 = vmul.f32 %v899_v2, %v878_v26  ;;  %v962_v7 = vsel %vm961_vm6, %v3305_v50, %v958_v0  ;;  %v966_v11 = vmul.f32 0.5, %v965_v4 }
 0x17e   : > { %v973_v10 = vmul.f32 %v962_v7, %v4118_v25  ;;  %v903_v13 = vmul.f32 0.5, %v902_v8 }
 0x17f   : > { %v915_v12 = vmul.f32 %v3296_v63, %v910_v6  ;;  %v967_v15 = vsub.f32 1.5, %v966_v11 }
 0x180   : > { %v978_v14 = vmul.f32 %v3298_v3, %v973_v10  ;;  %v904_v17 = vsub.f32 1.5, %v903_v13 }
 0x181   : > { %v920_v16 = vadd.f32 %v3297_v5, %v915_v12  ;;  %v968_v19 = vmul.f32 %v3307_v58, %v967_v15 }
 0x182   : > { %v983_v18 = vadd.f32 %v3299_v9, %v978_v14  ;;  %v905_v20 = vmul.f32 %v3309_v60, %v904_v17 }
 0x183   : > { %922 = vst [vmem:[#allocation2 + $0x10] sm:$0xff] %v920_v16  ;;  %v972_v21 = vsel %vm971_vm10, %v3307_v58, %v968_v19 }
 0x184   : > { %985 = vst [vmem:[#allocation2 + $0x18] sm:$0xff] %v983_v18  ;;  %v974_v22 = vmul.f32 %v972_v21, %v4122_v33  ;;  %v909_v23 = vsel %vm908_vm12, %v3309_v60, %v905_v20 }
 0x185   : > { %v911_v24 = vmul.f32 %v909_v23, %v4124_v34 }
 0x186   : > { %v979_v25 = vmul.f32 %v3298_v3, %v974_v22 }
 0x187   : > { %v916_v26 = vmul.f32 %v3296_v63, %v911_v24 }
 0x188   : > { %v984_v27 = vadd.f32 %v3299_v9, %v979_v25 }
 0x189   : > { %v921_v28 = vadd.f32 %v3297_v5, %v916_v26 }
 0x18a   : > { %986 = vst [vmem:[#allocation2 + $0x8] sm:$0xff] %v984_v27 }
 0x18b   : > { %923 = vst [vmem:[#allocation2] sm:$0xff] %v921_v28 }
 0x18c PF: > { %v2883_v29 = vld [vmem:[%s4079_s14 + $0xa8] sm:$0xf]  ;;  %v3108_v30 = vld [vmem:[%s4079_s14 + $0xb0] sm:$0xf0]  ;;  %v3107_v31 = vld [vmem:[%s4079_s14 + $0xac] sm:$0xf] }
 0x18d   : > { %v2884_v32 = vor.u32 %v3108_v30, %v2883_v29  ;;  %v2885_v33 = vld [vmem:[%s4079_s14 + $0xb4] sm:$0xf0]  ;;  %v2871_v34 = vld [vmem:[%s4079_s14 + $0x90] sm:$0xf]  ;;  %v3105_v35 = vld [vmem:[%s4079_s14 + $0x98] sm:$0xf0] }
 0x18e   : > { %v2888_v36 = vor.u32 %v3107_v31, %v2885_v33  ;;  %v3104_v37 = vld [vmem:[%s4079_s14 + $0x94] sm:$0xf]  ;;  %v2873_v38 = vld [vmem:[%s4079_s14 + $0x9c] sm:$0xf0]  ;;  %v2872_v39 = vor.u32 %v3105_v35, %v2871_v34  ;;  %v2859_v41 = vld [vmem:[%s4079_s14 + $0x78] sm:$0xf] }
 0x18f   : > { %1153 = vmatpush.bf16.msra.mxu0 %v2884_v32  ;;  %v2876_v40 = vor.u32 %v3104_v37, %v2873_v38  ;;  %v3102_v42 = vld [vmem:[%s4079_s14 + $0x80] sm:$0xf0]  ;;  %v3101_v43 = vld [vmem:[%s4079_s14 + $0x7c] sm:$0xf]  ;;  %v2861_v44 = vld [vmem:[%s4079_s14 + $0x84] sm:$0xf0] }
 0x190   : > { %1172 = vmatpush.bf16.msra.mxu1 %v2888_v36  ;;  %v2860_v45 = vor.u32 %v3102_v42, %v2859_v41  ;;  %v2864_v46 = vor.u32 %v3101_v43, %v2861_v44  ;;  %v2847_v47 = vld [vmem:[%s4079_s14 + $0x60] sm:$0xf]  ;;  %v3099_v48 = vld [vmem:[%s4079_s14 + $0x68] sm:$0xf0]  ;;  %v3098_v49 = vld [vmem:[%s4079_s14 + $0x64] sm:$0xf] }
 0x191   : > { %v2849_v50 = vld [vmem:[%s4079_s14 + $0x6c] sm:$0xf0]  ;;  %v2835_v51 = vld [vmem:[%s4079_s14 + $0x48] sm:$0xf]  ;;  %v2848_v52 = vor.u32 %v3099_v48, %v2847_v47  ;;  %v3096_v53 = vld [vmem:[%s4079_s14 + $0x50] sm:$0xf0] }
 0x192   : > { %v3095_v54 = vld [vmem:[%s4079_s14 + $0x4c] sm:$0xf]  ;;  %v2837_v55 = vld [vmem:[%s4079_s14 + $0x54] sm:$0xf0]  ;;  %v2852_v56 = vor.u32 %v3098_v49, %v2849_v50  ;;  %v2836_v57 = vor.u32 %v3096_v53, %v2835_v51  ;;  %v2823_v59 = vld [vmem:[%s4079_s14 + $0x30] sm:$0xf] }
 0x193   : > { %1154 = vmatpush.bf16.msra.mxu0 %v2872_v39  ;;  %v2840_v58 = vor.u32 %v3095_v54, %v2837_v55  ;;  %v3093_v60 = vld [vmem:[%s4079_s14 + $0x38] sm:$0xf0]  ;;  %v3092_v61 = vld [vmem:[%s4079_s14 + $0x34] sm:$0xf]  ;;  %v2825_v62 = vld [vmem:[%s4079_s14 + $0x3c] sm:$0xf0] }
 0x194   : > { %1173 = vmatpush.bf16.msra.mxu1 %v2876_v40  ;;  %v2824_v63 = vor.u32 %v3093_v60, %v2823_v59  ;;  %v2891_v0 = vld [vmem:[%s4079_s14 + $0xb0] sm:$0xf]  ;;  %v3109_v1 = vld [vmem:[%s4079_s14 + $0xb8] sm:$0xf0]  ;;  %v2879_v2 = vld [vmem:[%s4079_s14 + $0x98] sm:$0xf]  ;;  %v2828_v3 = vor.u32 %v3092_v61, %v2825_v62 }
 0x195   : > { %v2811_v4 = vld [vmem:[%s4079_s14 + $0x18] sm:$0xf]  ;;  %v3090_v5 = vld [vmem:[%s4079_s14 + $0x20] sm:$0xf0]  ;;  %v2892_v6 = vor.u32 %v3109_v1, %v2891_v0  ;;  %v3089_v8 = vld [vmem:[%s4079_s14 + $0x1c] sm:$0xf] }
 0x196   : > { %v3106_v7 = vld [vmem:[%s4079_s14 + $0xa0] sm:$0xf0]  ;;  %v2813_v9 = vld [vmem:[%s4079_s14 + $0x24] sm:$0xf0]  ;;  %v2812_v11 = vor.u32 %v3090_v5, %v2811_v4  ;;  %v2867_v12 = vld [vmem:[%s4079_s14 + $0x80] sm:$0xf] }
 0x197   : > { %1155 = vmatpush.bf16.msra.mxu0 %v2860_v45  ;;  %1191 = vmatpush.bf16.msra.mxu2 %v2892_v6  ;;  %v2880_v10 = vor.u32 %v3106_v7, %v2879_v2  ;;  %v3103_v13 = vld [vmem:[%s4079_s14 + $0x88] sm:$0xf0]  ;;  %v2816_v14 = vor.u32 %v3089_v8, %v2813_v9  ;;  %v2799_v15 = vld [vmem:[%s4079_s14] sm:$0xf]  ;;  %v3086_v17 = vld [vmem:[%s4079_s14 + $0x4] sm:$0xf] }
 0x198   : > { %1174 = vmatpush.bf16.msra.mxu1 %v2864_v46  ;;  %v3087_v16 = vld [vmem:[%s4079_s14 + $0x8] sm:$0xf0]  ;;  %v2801_v18 = vld [vmem:[%s4079_s14 + $0xc] sm:$0xf0]  ;;  %v2868_v20 = vor.u32 %v3103_v13, %v2867_v12  ;;  %v4173_v22 = vld [vmem:[#allocation2] sm:$0xff]  ;;  %vm1236_vm13 = vcmask 261120  }
 0x199   : > { %v4171_v19 = vld [vmem:[#allocation2 + $0x10] sm:$0xff]  ;;  %v2800_v21 = vor.u32 %v3087_v16, %v2799_v15  ;;  %v2855_v23 = vld [vmem:[%s4079_s14 + $0x68] sm:$0xf]  ;;  %v3100_v24 = vld [vmem:[%s4079_s14 + $0x70] sm:$0xf0]  ;;  %v2804_v25 = vor.u32 %v3086_v17, %v2801_v18  ;;  %s3806_s3 = smov 96  }
 0x19a   : > { %v991_v26 = vpack.c.bf16 %v4173_v22, %v4171_v19  ;;  %v2856_v27 = vor.u32 %v3100_v24, %v2855_v23  ;;  %v2843_v28 = vld [vmem:[%s4079_s14 + $0x50] sm:$0xf]  ;;  %v3097_v29 = vld [vmem:[%s4079_s14 + $0x58] sm:$0xf0]  ;;  %v2831_v31 = vld [vmem:[%s4079_s14 + $0x38] sm:$0xf] }
 0x19b   : > { %1156 = vmatpush.bf16.msra.mxu0 %v2848_v52  ;;  %1192 = vmatpush.bf16.msra.mxu2 %v2880_v10  ;;  %v2844_v30 = vor.u32 %v3097_v29, %v2843_v28  ;;  %v3094_v32 = vld [vmem:[%s4079_s14 + $0x40] sm:$0xf0]  ;;  %v2819_v34 = vld [vmem:[%s4079_s14 + $0x20] sm:$0xf]  ;;  %v3091_v35 = vld [vmem:[%s4079_s14 + $0x28] sm:$0xf0] }
 0x19c   : > { %1175 = vmatpush.bf16.msra.mxu1 %v2852_v56  ;;  %v2832_v33 = vor.u32 %v3094_v32, %v2831_v31  ;;  %v2820_v36 = vor.u32 %v3091_v35, %v2819_v34  ;;  %v2807_v37 = vld [vmem:[%s4079_s14 + $0x8] sm:$0xf]  ;;  %v3088_v38 = vld [vmem:[%s4079_s14 + $0x10] sm:$0xf0]  ;;  %s3807_s14 = smov 64   ;;  %s3808_s28 = smov 32  }
 0x19d   : > { %v4187_v39 = vld [vmem:[#allocation2 + $0x18] sm:$0xff]  ;;  %v4189_v40 = vld [vmem:[#allocation2 + $0x8] sm:$0xff]  ;;  %v2808_v41 = vor.u32 %v3088_v38, %v2807_v37  ;;  %s4682_s29 = sld [smem:[#allocation33_spill]]  ;;  %vm1257_vm14 = vcmask 130048   ;;  %vm1306_vm15 = vcmask 257024   ;;  %vm1386_vm0 = vcmask 519424  }
 0x19e   : > { %v992_v42 = vpack.c.bf16 %v4189_v40, %v4187_v39  ;;  %vm1466_vm1 = vcmask 781824   ;;  %vm1546_vm2 = vcmask 1044224  }
 0x19f   : > { %1157 = vmatpush.bf16.msra.mxu0 %v2836_v57  ;;  %1193 = vmatpush.bf16.msra.mxu2 %v2868_v20 }
 0x1a0   : > { %1176 = vmatpush.bf16.msra.mxu1 %v2840_v58 }
 0x1a3   : > { %1158 = vmatpush.bf16.msra.mxu0 %v2824_v63  ;;  %1194 = vmatpush.bf16.msra.mxu2 %v2856_v27  ;;  %v4217_v15 = vld [vmem:[%s4682_s29] ss:$0 sm:$0xff] }
 0x1a4   : > { %1177 = vmatpush.bf16.msra.mxu1 %v2828_v3 }
 0x1a7   : > { %1159 = vmatpush.bf16.msra.mxu0 %v2812_v11  ;;  %1195 = vmatpush.bf16.msra.mxu2 %v2844_v30 }
 0x1a8   : > { %1178 = vmatpush.bf16.msra.mxu1 %v2816_v14 }
 0x1ab   : > { %1160 = vmatpush.bf16.msra.mxu0 %v2800_v21  ;;  %1196 = vmatpush.bf16.msra.mxu2 %v2832_v33 }
 0x1ac   : > { %1179 = vmatpush.bf16.msra.mxu1 %v2804_v25 }
 0x1ae   : > { %1161 = vmatmul.bf16.vlgmr.msra.gmra.mxu0 %v991_v26 }
 0x1af   : > { %1180 = vmatmul.bf16.vlgmr.msra.gmra.mxu1 %v991_v26  ;;  %1197 = vmatpush.bf16.msra.mxu2 %v2820_v36 }
 0x1b3   : > { %1198 = vmatpush.bf16.msra.mxu2 %v2808_v41 }
 0x1b6   : > { %1199 = vmatmul.bf16.vlgmr.msra.gmra.mxu2 %v991_v26 }
 0x1be   : > { %1166 = vmatmul.bf16.gmra.mxu0 %v992_v42 }
 0x1bf   : > { %1185 = vmatmul.bf16.gmra.mxu1 %v992_v42 }
 0x1c6   : > { %1204 = vmatmul.bf16.gmra.mxu2 %v992_v42 }
 0x22b   : > { %v1162_v43 = vpop.f32.mrf.mxu0 }
 0x22c   : > { %v1181_v44 = vpop.f32.mrf.mxu1  ;;  %v1210_v51 = vpack.c.bf16 %v1162_v43, %v1162_v43 }
 0x22d   : > { %v1214_v45 = vpack.c.bf16 %v1181_v44, %v1181_v44 }
 0x22e   : > { %v1228_v56 = vunpack.c.l.b16 %v1210_v51 }
 0x22f   : > { %v1233_v49 = vunpack.c.l.b16 %v1214_v45 }
 0x233   : > { %v1164_v48 = vpop.f32.mrf.mxu0 }
 0x234   : > { %v1183_v46 = vpop.f32.mrf.mxu1  ;;  %v1211_v52 = vpack.c.bf16 %v1164_v48, %v1164_v48 }
 0x235   : > { %v1215_v47 = vpack.c.bf16 %v1183_v46, %v1183_v46 }
 0x236   : > { %v1229_v57 = vunpack.c.l.b16 %v1211_v52 }
 0x237   : > { %v1234_v50 = vunpack.c.l.b16 %v1215_v47 }
 0x238   : > { %v4195_v58 = vpack.c.b16 %v1229_v57, %v1228_v56 }
 0x239   : > { %v1235_v53 = vpack.c.b16 %v1234_v50, %v1233_v49  ;;  %v1200_v60 = vpop.f32.mrf.mxu2 }
 0x23a   : > { %v1218_v63 = vpack.c.bf16 %v1200_v60, %v1200_v60 }
 0x23b   : > { %1311 = vrot.lane.b32.xlu2 %v1235_v53, %s3806_s3  ;;  %v1241_v54 = vsel %vm1236_vm13, %v1235_v53, 0  ;;  %v1167_v17 = vpop.f32.mrf.mxu0 }
 0x23c   : > { %1250 = vmatpush.bf16.xpose.msra.mxu3 %v1241_v54  ;;  %v1186_v55 = vpop.f32.mrf.mxu1  ;;  %v1283_v3 = vunpack.c.l.b16 %v1218_v63  ;;  %v1212_v21 = vpack.c.bf16 %v1167_v17, %v1167_v17 }
 0x23d   : > { %v1216_v61 = vpack.c.bf16 %v1186_v55, %v1186_v55 }
 0x23e   : > { %v1556_v26 = vunpack.c.l.b16 %v1212_v21 }
 0x23f   : > { %v1561_v0 = vunpack.c.l.b16 %v1216_v61 }
 0x241   : > { %v1202_v2 = vpop.f32.mrf.mxu2 }
 0x242   : > { %v1219_v4 = vpack.c.bf16 %v1202_v2, %v1202_v2 }
 0x243   : > { %1309 = vrot.lane.b32.xlu2 %v4195_v58, %s3806_s3  ;;  %2893 = vmatmul.msk.bf16.vlgmr.msra.gmra.mxu3 %vm1236_vm13, %v4195_v58  ;;  %v1169_v24 = vpop.f32.mrf.mxu0 }
 0x244   : > { %v1188_v59 = vpop.f32.mrf.mxu1  ;;  %v1284_v6 = vunpack.c.l.b16 %v1219_v4  ;;  %v1213_v27 = vpack.c.bf16 %v1169_v24, %v1169_v24 }
 0x245   : > { %v1217_v62 = vpack.c.bf16 %v1188_v59, %v1188_v59 }
 0x246   : > { %v4202_v7 = vpack.c.b16 %v1284_v6, %v1283_v3  ;;  %v1557_v29 = vunpack.c.l.b16 %v1213_v27 }
 0x247   : > { %v1562_v1 = vunpack.c.l.b16 %v1217_v62 }
 0x248   : > { %1297 = vmatpush.bf16.msrb.mxu3 %v4202_v7  ;;  %v1558_v30 = vpack.c.b16 %v1557_v29, %v1556_v26 }
 0x249   : > { %v1563_v5 = vpack.c.b16 %v1562_v1, %v1561_v0  ;;  %v4250_v1 = vpop.f32.mrf.mxu2 }
 0x24b   : > { %1391 = vrot.lane.b32.xlu2 %v1235_v53, %s3807_s14  ;;  %v1568_v34 = vsel %vm1236_vm13, %v1563_v5, 0 }
 0x24c   : > { %1577 = vmatpush.bf16.xpose.msrb.mxu0 %v1568_v34 }
 0x251   : > { %v4253_v4 = vpop.f32.mrf.mxu2 }
 0x253   : > { %1636 = vrot.lane.b32.xlu2 %v1563_v5, %s3806_s3  ;;  %2902 = vmatmul.msk.bf16.vlgmr.msrb.gmra.mxu0 %vm1236_vm13, %v1558_v30 }
 0x25b   : > { %1389 = vrot.lane.b32.xlu2 %v4195_v58, %s3807_s14 }
 0x263   : > { %1794 = vrot.lane.b32.xlu2 %v1563_v5, %s3808_s28 }
 0x26b   : > { %1713 = vrot.lane.b32.xlu2 %v1558_v30, %s3807_s14 }
 0x295   : > { %v1312_v8 = vpop.permute.xlu2 %1311 }
 0x296   : > { %v1317_v9 = vsel %vm1236_vm13, %v1312_v8, 0 }
 0x297   : > { %1326 = vmatpush.bf16.xpose.msra.mxu3 %v1317_v9 }
 0x29d   : > { %v4210_v10 = vpop.permute.xlu2 %1309 }
 0x2a5   : > { %v1392_v11 = vpop.permute.xlu2 %1391 }
 0x2a6   : > { %v1397_v12 = vsel %vm1236_vm13, %v1392_v11, 0 }
 0x2a7   : > { %1406 = vmatpush.bf16.xpose.msrb.mxu1 %v1397_v12 }
 0x2ad   : > { %v1637_v13 = vpop.permute.xlu2 %1636 }
 0x2ae   : > { %v1642_v47 = vsel %vm1236_vm13, %v1637_v13, 0 }
 0x2b5   : > { %v1390_v14 = vpop.permute.xlu2 %1389 }
 0x2b6   : > { %2897 = vmatmul.msk.bf16.vlgmr.msrb.gmra.mxu1 %vm1236_vm13, %v1390_v14 }
 0x2c6   : > { %v1252_v16 = vpop.f32.mrf.mxu3 }
 0x2c7   : > { %v1253_v18 = vadd.f32 %v4217_v15, %v1252_v16 }
 0x2c9   : > { %v1258_v20 = vsel %vm1257_vm14, %v1253_v18, -inf }
 0x2ca   : > { %1259 = vmax.xlane.f32.xlu0 %v1258_v20 }
 0x2ce   : > { %v1254_v23 = vpop.f32.mrf.mxu3 }
 0x2cf   : > { %v1255_v25 = vadd.f32 %v4217_v15, %v1254_v23 }
 0x2d0   : > { %v1579_v8 = vpop.f32.mrf.mxu0 }
 0x2d1   : > { %v1261_v28 = vsel %vm1257_vm14, %v1255_v25, -inf }
 0x2d2   : > { %1262 = vmax.xlane.f32.xlu0 %v1261_v28 }
 0x2d8   : > { %v1581_v17 = vpop.f32.mrf.mxu0 }
 0x2e6   : > { %1471 = vrot.lane.b32.xlu0 %v1235_v53, %s3808_s28  ;;  %v1795_v53 = vpop.permute.xlu2 %1794 }
 0x2e7   : > { %v1800_v63 = vsel %vm1236_vm13, %v1795_v53, 0 }
 0x2ee   : > { %1634 = vrot.lane.b32.xlu0 %v1558_v30, %s3806_s3  ;;  %v1714_v54 = vpop.permute.xlu2 %1713 }
 0x2f6   : > { %1715 = vrot.lane.b32.xlu0 %v1563_v5, %s3807_s14 }
 0x333   : > { %v1408_v31 = vpop.f32.mrf.mxu1 }
 0x334   : > { %v4228_v32 = vadd.f32 %v4217_v15, %v1408_v31 }
 0x336   : > { %v1413_v33 = vsel %vm1257_vm14, %v4228_v32, -inf }
 0x337   : > { %1414 = vmax.xlane.f32.xlu0 %v1413_v33 }
 0x33b   : > { %v1410_v12 = vpop.f32.mrf.mxu1 }
 0x33c   : > { %v4259_v13 = vadd.f32 %v4217_v15, %v1410_v12 }
 0x33d   : > { %v1260_v35 = vpop.xlane.xlu0 %1259 }
 0x33e   : > { %v1264_v36 = vsub.f32 %v1253_v18, %v1260_v35  ;;  %v3311_v18 = vld [vmem:[%s4682_s29 + $0x1] ss:$0 sm:$0xff]  ;;  %v1416_v20 = vsel %vm1257_vm14, %v4259_v13, -inf }
 0x33f   : > { %v4268_v23 = vadd.f32 %v3311_v18, %v1579_v8  ;;  %v4276_v29 = vadd.f32 %v3311_v18, %v1581_v17 }
 0x340   : > { %v1266_v37 = vmul.f32 1.442695, %v1264_v36 }
 0x341   : > { %v1584_v28 = vsel %vm1257_vm14, %v4268_v23, -inf  ;;  %v1587_v36 = vsel %vm1257_vm14, %v4276_v29, -inf }
 0x342   : > { %3317 = vpow2.f32 %v1266_v37 }
 0x345   : > { %v1263_v38 = vpop.xlane.xlu0 %1262 }
 0x346   : > { %v1265_v41 = vsub.f32 %v1255_v25, %v1263_v38 }
 0x348   : > { %v3318_v42 = vpop.eup %3317  ;;  %v1268_v43 = vmul.f32 1.442695, %v1265_v41 }
 0x349   : > { %v1270_v44 = vsel %vm1257_vm14, %v3318_v42, 0.0 }
 0x34a   : > { %3319 = vpow2.f32 %v1268_v43  ;;  %1271 = vadd.xlane.f32.xlu1 %v1270_v44 }
 0x350   : > { %v3320_v45 = vpop.eup %3319 }
 0x351   : > { %v1273_v46 = vsel %vm1257_vm14, %v3320_v45, 0.0 }
 0x352   : > { %1274 = vadd.xlane.f32.xlu1 %v1273_v46 }
 0x358   : > { %v1472_v48 = vpop.permute.xlu0 %1471 }
 0x359   : > { %v1477_v49 = vsel %vm1236_vm13, %v1472_v48, 0 }
 0x35a   : > { %1486 = vmatpush.bf16.xpose.msrb.mxu2 %v1477_v49 }
 0x360   : > { %v1635_v50 = vpop.permute.xlu0 %1634 }
 0x362   : > { %1651 = vmatpush.bf16.xpose.msra.mxu2 %v1642_v47 }
 0x368   : > { %v1716_v51 = vpop.permute.xlu0 %1715 }
 0x369   : > { %v1721_v52 = vsel %vm1236_vm13, %v1716_v51, 0 }
 0x36a   : > { %1730 = vmatpush.bf16.xpose.msra.mxu0 %v1721_v52 }
 0x36b   : > { %1469 = vrot.lane.b32.xlu1 %v4195_v58, %s3808_s28 }
 0x371   : > { %2906 = vmatmul.msk.bf16.vlgmr.msra.gmra.mxu0 %vm1236_vm13, %v1714_v54 }
 0x373   : > { %1792 = vrot.lane.b32.xlu1 %v1558_v30, %s3808_s28 }
 0x3aa   : > { %v1415_v54 = vpop.xlane.xlu0 %1414 }
 0x3bd   : > { %v1272_v55 = vpop.xlane.xlu1 %1271 }
 0x3be   : > { %3321 = vrcp.f32 %v1272_v55 }
 0x3c4   : > { %v3322_v57 = vpop.eup %3321 }
 0x3c5   : > { %v1275_v56 = vpop.xlane.xlu1 %1274  ;;  %v1278_v60 = vmul.f32 %v3322_v57, %v3318_v42 }
 0x3c6   : > { %3323 = vrcp.f32 %v1275_v56 }
 0x3cc   : > { %v3324_v59 = vpop.eup %3323 }
 0x3cd   : > { %v1279_v61 = vmul.f32 %v3324_v59, %v3320_v45 }
 0x3cf   : > { %v1280_v62 = vpack.c.bf16 %v1279_v61, %v1278_v60 }
 0x3d1   : > { %2894 = vmatmul.msk.bf16.vlgmr.msrb.gmra.mxu3 %vm1257_vm14, %v1280_v62 }
 0x3dd   : > { %v1470_v58 = vpop.permute.xlu1 %1469 }
 0x3de   : > { %2899 = vmatmul.msk.bf16.vlgmr.msrb.gmra.mxu2 %vm1236_vm13, %v1470_v58 }
 0x3df   : > { %1809 = vmatpush.bf16.xpose.msrb.mxu2 %v1800_v63 }
 0x3e1   : > { %2895 = vmatmul.msk.bf16.vlgmr.msra.gmra.mxu3 %vm1236_vm13, %v4210_v10 }
 0x3e5   : > { %v1793_v0 = vpop.permute.xlu1 %1792 }
 0x3ee   : > { %2904 = vmatmul.msk.bf16.vlgmr.msra.gmra.mxu2 %vm1236_vm13, %v1635_v50  ;;  %v1732_v26 = vpop.f32.mrf.mxu0 }
 0x3ef   : > { %v4278_v30 = vadd.f32 %v3311_v18, %v1732_v26  ;;  %v1221_v26 = vpack.c.bf16 %v4253_v4, %v4253_v4 }
 0x3f1   : > { %v1737_v38 = vsel %vm1257_vm14, %v4278_v30, -inf }
 0x3f6   : > { %v1734_v37 = vpop.f32.mrf.mxu0 }
 0x3f7   : > { %v4288_v41 = vadd.f32 %v3311_v18, %v1734_v37 }
 0x3f9   : > { %v1740_v45 = vsel %vm1257_vm14, %v4288_v41, -inf }
 0x3fe   : > { %2908 = vmatmul.msk.bf16.vlgmr.msrb.gmra.mxu2 %vm1236_vm13, %v1793_v0 }
 0x454   : > { %v1299_v2 = vpop.f32.mrf.mxu3 }
 0x455   : > { %v1304_v3 = vpack.c.bf16 %v1299_v2, %v1299_v2 }
 0x457   : > { %1307 = vst.msk [vmem:[#allocation3] sm:$0xf] %vm1306_vm15, %v1304_v3 }
 0x45c   : > { %v1301_v5 = vpop.f32.mrf.mxu3 }
 0x45d   : > { %v1305_v6 = vpack.c.bf16 %v1301_v5, %v1301_v5 }
 0x45f   : > { %1308 = vst.msk [vmem:[#allocation3 + $0x4] sm:$0xf] %vm1306_vm15, %v1305_v6 }
 0x461   : > { %v1488_v9 = vpop.f32.mrf.mxu2 }
 0x462   : > { %v1489_v10 = vadd.f32 %v4217_v15, %v1488_v9 }
 0x464   : > { %v1493_v11 = vsel %vm1257_vm14, %v1489_v10, -inf  ;;  %v1328_v34 = vpop.f32.mrf.mxu3 }
 0x465   : > { %1494 = vmax.xlane.f32.xlu2 %v1493_v11  ;;  %v1329_v47 = vadd.f32 %v4217_v15, %v1328_v34 }
 0x467   : > { %v1333_v52 = vsel %vm1257_vm14, %v1329_v47, -inf }
 0x469   : > { %v1490_v14 = vpop.f32.mrf.mxu2 }
 0x46a   : > { %v1491_v16 = vadd.f32 %v4217_v15, %v1490_v14 }
 0x46c   : > { %v1496_v21 = vsel %vm1257_vm14, %v1491_v16, -inf  ;;  %v1330_v46 = vpop.f32.mrf.mxu3 }
 0x46d   : > { %1417 = vmax.xlane.f32.xlu2 %v1416_v20  ;;  %1497 = vmax.xlane.f32.xlu1 %v1496_v21  ;;  %v1331_v48 = vadd.f32 %v4217_v15, %v1330_v46  ;;  %v1419_v15 = vsub.f32 %v4228_v32, %v1415_v54 }
 0x46f   : > { %v1336_v51 = vsel %vm1257_vm14, %v1331_v48, -inf  ;;  %v1421_v59 = vmul.f32 1.442695, %v1419_v15 }
 0x471   : > { %v1653_v24 = vpop.f32.mrf.mxu2 }
 0x472   : > { %v4270_v25 = vadd.f32 %v3311_v18, %v1653_v24  ;;  %v1220_v24 = vpack.c.bf16 %v4250_v1, %v4250_v1 }
 0x474   : > { %v1658_v27 = vsel %vm1257_vm14, %v4270_v25, -inf  ;;  %v1609_v34 = vunpack.c.l.b16 %v1220_v24 }
 0x475   : > { %1659 = vmax.xlane.f32.xlu1 %v1658_v27  ;;  %1585 = vmax.xlane.f32.xlu2 %v1584_v28 }
 0x479   : > { %v1655_v31 = vpop.f32.mrf.mxu2 }
 0x47a   : > { %v4280_v33 = vadd.f32 %v3311_v18, %v1655_v31 }
 0x47c   : > { %v1661_v35 = vsel %vm1257_vm14, %v4280_v33, -inf }
 0x47d   : > { %1662 = vmax.xlane.f32.xlu0 %v1661_v35  ;;  %1588 = vmax.xlane.f32.xlu1 %v1587_v36  ;;  %v1610_v35 = vunpack.c.l.b16 %v1221_v26 }
 0x47e   : > { %1738 = vmax.xlane.f32.xlu2 %v1737_v38 }
 0x481   : > { %v1811_v42 = vpop.f32.mrf.mxu2 }
 0x482   : > { %v4290_v43 = vadd.f32 %v3311_v18, %v1811_v42  ;;  %v4335_v42 = vpack.c.b16 %v1610_v35, %v1609_v34 }
 0x484   : > { %v1816_v44 = vsel %vm1257_vm14, %v4290_v43, -inf }
 0x485   : > { %1817 = vmax.xlane.f32.xlu0 %v1816_v44  ;;  %1741 = vmax.xlane.f32.xlu1 %v1740_v45 }
 0x489   : > { %v1813_v49 = vpop.f32.mrf.mxu2 }
 0x48a   : > { %v4298_v50 = vadd.f32 %v3311_v18, %v1813_v49 }
 0x48c   : > { %v1819_v53 = vsel %vm1257_vm14, %v4298_v50, -inf }
 0x48d   : > { %1337 = vmax.xlane.f32.xlu0 %v1336_v51  ;;  %1334 = vmax.xlane.f32.xlu1 %v1333_v52 }
 0x48e   : > { %1820 = vmax.xlane.f32.xlu2 %v1819_v53 }
 0x4a1   : > { %1356 = vrot.lane.b32.xlu0 %v4202_v7, %s3806_s3 }
 0x4d8   : > { %v1495_v55 = vpop.xlane.xlu2 %1494 }
 0x4d9   : > { %v1499_v56 = vsub.f32 %v1489_v10, %v1495_v55 }
 0x4db   : > { %v1501_v57 = vmul.f32 1.442695, %v1499_v56 }
 0x4dd   : > { %3325 = vpow2.f32 %v1501_v57 }
 0x4de   : > { %3327 = vpow2.f32 %v1421_v59 }
 0x4e0   : > { %v1498_v60 = vpop.xlane.xlu1 %1497  ;;  %v1418_v61 = vpop.xlane.xlu2 %1417 }
 0x4e1   : > { %v1500_v62 = vsub.f32 %v1491_v16, %v1498_v60  ;;  %v1420_v0 = vsub.f32 %v4259_v13, %v1418_v61 }
 0x4e3   : > { %v4307_v63 = vpop.eup %3325  ;;  %v1503_v58 = vmul.f32 1.442695, %v1500_v62  ;;  %v1423_v3 = vmul.f32 1.442695, %v1420_v0 }
 0x4e4   : > { %v1505_v2 = vsel %vm1257_vm14, %v4307_v63, 0.0  ;;  %v4312_v32 = vpop.eup %3327 }
 0x4e5   : > { %1506 = vadd.xlane.f32.xlu2 %v1505_v2  ;;  %3329 = vpow2.f32 %v1503_v58  ;;  %v1425_v8 = vsel %vm1257_vm14, %v4312_v32, 0.0 }
 0x4e6   : > { %3331 = vpow2.f32 %v1423_v3 }
 0x4e8   : > { %v1660_v5 = vpop.xlane.xlu1 %1659  ;;  %v1586_v37 = vpop.xlane.xlu2 %1585 }
 0x4e9   : > { %v1664_v31 = vsub.f32 %v4270_v25, %v1660_v5  ;;  %v1590_v4 = vsub.f32 %v4268_v23, %v1586_v37 }
 0x4eb   : > { %v4314_v6 = vpop.eup %3329  ;;  %v1666_v36 = vmul.f32 1.442695, %v1664_v31  ;;  %v1592_v45 = vmul.f32 1.442695, %v1590_v4 }
 0x4ec   : > { %v1508_v9 = vsel %vm1257_vm14, %v4314_v6, 0.0  ;;  %v4322_v12 = vpop.eup %3331 }
 0x4ed   : > { %1426 = vadd.xlane.f32.xlu2 %v1425_v8  ;;  %1509 = vadd.xlane.f32.xlu1 %v1508_v9  ;;  %v1428_v13 = vsel %vm1257_vm14, %v4322_v12, 0.0 }
 0x4f0   : > { %v4320_v10 = vpop.xlane.xlu0 %1662  ;;  %v1589_v11 = vpop.xlane.xlu1 %1588 }
 0x4f1   : > { %v1739_v51 = vpop.xlane.xlu2 %1738 }
 0x4f2   : > { %v1743_v15 = vsub.f32 %v4278_v30, %v1739_v51 }
 0x4f5   : > { %1429 = vadd.xlane.f32.xlu1 %v1428_v13 }
 0x4f8   : > { %v1818_v14 = vpop.xlane.xlu0 %1817  ;;  %v1742_v16 = vpop.xlane.xlu1 %1741 }
 0x4f9   : > { %v1822_v53 = vsub.f32 %v4290_v43, %v1818_v14  ;;  %v1745_v43 = vmul.f32 1.442695, %v1743_v15  ;;  %v1744_v62 = vsub.f32 %v4288_v41, %v1742_v16  ;;  %v1665_v41 = vsub.f32 %v4280_v33, %v4320_v10 }
 0x4fb   : > { %v1824_v55 = vmul.f32 1.442695, %v1822_v53  ;;  %v1747_v30 = vmul.f32 1.442695, %v1744_v62  ;;  %v1668_v5 = vmul.f32 1.442695, %v1665_v41 }
 0x500   : > { %v1338_v17 = vpop.xlane.xlu0 %1337  ;;  %v1335_v18 = vpop.xlane.xlu1 %1334 }
 0x501   : > { %v1340_v20 = vsub.f32 %v1331_v48, %v1338_v17  ;;  %v1339_v21 = vsub.f32 %v1329_v47, %v1335_v18  ;;  %v1591_v48 = vsub.f32 %v4276_v29, %v1589_v11  ;;  %v1821_v56 = vpop.xlane.xlu2 %1820 }
 0x502   : > { %v1823_v57 = vsub.f32 %v4298_v50, %v1821_v56 }
 0x503   : > { %v1343_v27 = vmul.f32 1.442695, %v1340_v20  ;;  %v1341_v28 = vmul.f32 1.442695, %v1339_v21  ;;  %v1594_v49 = vmul.f32 1.442695, %v1591_v48 }
 0x504   : > { %v1826_v60 = vmul.f32 1.442695, %v1823_v57 }
 0x505   : > { %3333 = vpow2.f32 %v1343_v27  ;;  %1516 = vrot.lane.b32.xlu2 %v4202_v7, %s3808_s28 }
 0x506   : > { %3335 = vpow2.f32 %v1341_v28 }
 0x507   : > { %3337 = vpow2.f32 %v1666_v36 }
 0x508   : > { %3339 = vpow2.f32 %v1592_v45 }
 0x509   : > { %3341 = vpow2.f32 %v1594_v49 }
 0x50a   : > { %3343 = vpow2.f32 %v1824_v55 }
 0x50b   : > { %v4333_v38 = vpop.eup %3333  ;;  %3345 = vpow2.f32 %v1745_v43 }
 0x50c   : > { %v4337_v1 = vpop.eup %3335  ;;  %v1348_v25 = vsel %vm1257_vm14, %v4333_v38, 0.0  ;;  %3347 = vpow2.f32 %v1826_v60 }
 0x50d   : > { %1349 = vadd.xlane.f32.xlu0 %v1348_v25  ;;  %v1345_v44 = vsel %vm1257_vm14, %v4337_v1, 0.0  ;;  %1681 = vrot.lane.b32.xlu2 %v4335_v42, %s3806_s3  ;;  %v4346_v46 = vpop.eup %3337  ;;  %3349 = vpow2.f32 %v1747_v30 }
 0x50e   : > { %1346 = vadd.xlane.f32.xlu1 %v1345_v44  ;;  %v1670_v23 = vsel %vm1257_vm14, %v4346_v46, 0.0  ;;  %v4351_v52 = vpop.eup %3339  ;;  %3351 = vpow2.f32 %v1668_v5 }
 0x50f   : > { %v1596_v54 = vsel %vm1257_vm14, %v4351_v52, 0.0  ;;  %v4358_v29 = vpop.eup %3341 }
 0x510   : > { %v1599_v59 = vsel %vm1257_vm14, %v4358_v29, 0.0  ;;  %v4364_v61 = vpop.eup %3343 }
 0x511   : > { %v4369_v58 = vpop.eup %3345 }
 0x512   : > { %v4371_v50 = vpop.eup %3347  ;;  %v1749_v0 = vsel %vm1257_vm14, %v4369_v58, 0.0 }
 0x513   : > { %v1357_v47 = vpop.permute.xlu0 %1356  ;;  %v1831_v2 = vsel %vm1257_vm14, %v4371_v50, 0.0  ;;  %v4379_v3 = vpop.eup %3349 }
 0x514   : > { %1369 = vmatpush.bf16.msrb.mxu3 %v1357_v47  ;;  %v1752_v8 = vsel %vm1257_vm14, %v4379_v3, 0.0  ;;  %v4383_v9 = vpop.eup %3351 }
 0x515   : > { %v1673_v11 = vsel %vm1257_vm14, %v4383_v9, 0.0 }
 0x516   : > { %1671 = vadd.xlane.f32.xlu1 %v1670_v23 }
 0x51e   : > { %1597 = vadd.xlane.f32.xlu1 %v1596_v54 }
 0x521   : > { %1436 = vrot.lane.b32.xlu0 %v4202_v7, %s3807_s14  ;;  %v1828_v7 = vsel %vm1257_vm14, %v4364_v61, 0.0 }
 0x526   : > { %1600 = vadd.xlane.f32.xlu1 %v1599_v59 }
 0x52e   : > { %1829 = vadd.xlane.f32.xlu1 %v1828_v7 }
 0x536   : > { %1750 = vadd.xlane.f32.xlu1 %v1749_v0  ;;  %1832 = vadd.xlane.f32.xlu2 %v1831_v2 }
 0x53e   : > { %1753 = vadd.xlane.f32.xlu1 %v1752_v8 }
 0x54b   : > { %1674 = vadd.xlane.f32.xlu0 %v1673_v11 }
 0x557   : > { %1839 = vrot.lane.b32.xlu1 %v4335_v42, %s3808_s28 }
 0x558   : > { %v1507_v13 = vpop.xlane.xlu2 %1506 }
 0x55f   : > { %1760 = vrot.lane.b32.xlu0 %v4335_v42, %s3807_s14 }
 0x560   : > { %v1427_v33 = vpop.xlane.xlu2 %1426  ;;  %v1510_v14 = vpop.xlane.xlu1 %1509 }
 0x568   : > { %v1517_v10 = vpop.permute.xlu2 %1516  ;;  %v1430_v16 = vpop.xlane.xlu1 %1429 }
 0x569   : > { %1529 = vmatpush.bf16.msra.mxu3 %v1517_v10 }
 0x570   : > { %v1682_v31 = vpop.permute.xlu2 %1681 }
 0x580   : > { %v1350_v17 = vpop.xlane.xlu0 %1349 }
 0x581   : > { %3353 = vrcp.f32 %v1350_v17  ;;  %v1347_v18 = vpop.xlane.xlu1 %1346 }
 0x582   : > { %3355 = vrcp.f32 %v1347_v18 }
 0x583   : > { %3357 = vrcp.f32 %v1430_v16 }
 0x584   : > { %3359 = vrcp.f32 %v1427_v33 }
 0x585   : > { %3361 = vrcp.f32 %v1510_v14 }
 0x586   : > { %3363 = vrcp.f32 %v1507_v13 }
 0x587   : > { %v3354_v20 = vpop.eup %3353 }
 0x588   : > { %v3356_v21 = vpop.eup %3355  ;;  %v1354_v24 = vmul.f32 %v3354_v20, %v4333_v38 }
 0x589   : > { %v1353_v26 = vmul.f32 %v3356_v21, %v4337_v1  ;;  %v1672_v27 = vpop.xlane.xlu1 %1671  ;;  %v3358_v34 = vpop.eup %3357 }
 0x58a   : > { %v3360_v35 = vpop.eup %3359  ;;  %v1434_v36 = vmul.f32 %v3358_v34, %v4322_v12 }
 0x58b   : > { %v1355_v28 = vpack.c.bf16 %v1354_v24, %v1353_v26  ;;  %v1433_v4 = vmul.f32 %v3360_v35, %v4312_v32  ;;  %v3362_v38 = vpop.eup %3361 }
 0x58c   : > { %v3364_v44 = vpop.eup %3363  ;;  %v1514_v45 = vmul.f32 %v3362_v38, %v4314_v6 }
 0x58d   : > { %2896 = vmatmul.msk.bf16.vlgmr.msrb.gmra.mxu3 %vm1257_vm14, %v1355_v28  ;;  %v1435_v1 = vpack.c.bf16 %v1434_v36, %v1433_v4  ;;  %v1513_v47 = vmul.f32 %v3364_v44, %v4307_v63 }
 0x58e   : > { %1694 = vmatpush.bf16.msrb.mxu3 %v1682_v31 }
 0x58f   : > { %v1515_v12 = vpack.c.bf16 %v1514_v45, %v1513_v47  ;;  %v3118_v45 = vld [vmem:[%s4109_s7 + $0x30] sm:$0xff]  ;;  %v3117_v47 = vld [vmem:[%s4109_s7 + $0x28] sm:$0xff] }
 0x591   : > { %v1598_v37 = vpop.xlane.xlu1 %1597 }
 0x592   : > { %3365 = vrcp.f32 %v1598_v37 }
 0x593   : > { %v1437_v25 = vpop.permute.xlu0 %1436 }
 0x594   : > { %1449 = vmatpush.bf16.msra.mxu1 %v1437_v25 }
 0x597   : > { %2898 = vmatmul.msk.bf16.vlgmr.msra.gmra.mxu1 %vm1257_vm14, %v1435_v1  ;;  %v3119_v1 = vld [vmem:[%s4109_s7 + $0x38] sm:$0xff] }
 0x598   : > { %1623 = vmatpush.bf16.msrb.mxu1 %v4335_v42  ;;  %v3366_v32 = vpop.eup %3365  ;;  %1951 = vmatpush.bf16.msrb.mxu0 %v3119_v1  ;;  %v3002_v1 = vld [vmem:[%s4113_s11 + $0x68] sm:$0xf0] }
 0x599   : > { %v1601_v48 = vpop.xlane.xlu1 %1600  ;;  %v1604_v51 = vmul.f32 %v3366_v32, %v4351_v52  ;;  %v3115_v32 = vld [vmem:[%s4109_s7 + $0x18] sm:$0xff] }
 0x59a   : > { %3367 = vrcp.f32 %v1601_v48  ;;  %v3116_v48 = vld [vmem:[%s4109_s7 + $0x20] sm:$0xff] }
 0x59b   : > { %3369 = vrcp.f32 %v1672_v27 }
 0x59c   : > { %1952 = vmatpush.bf16.msrb.mxu0 %v3118_v45  ;;  %v2992_v45 = vld [vmem:[%s4113_s11 + $0x50] sm:$0xf] }
 0x59d   : > { %2900 = vmatmul.msk.bf16.vlgmr.msra.gmra.mxu3 %vm1257_vm14, %v1515_v12 }
 0x5a0   : > { %v3368_v23 = vpop.eup %3367  ;;  %1953 = vmatpush.bf16.msrb.mxu0 %v3117_v47  ;;  %v3131_v47 = vld [vmem:[%s4113_s11 + $0x54] sm:$0xf0] }
 0x5a1   : > { %v1605_v49 = vmul.f32 %v3368_v23, %v4358_v29  ;;  %v1830_v6 = vpop.xlane.xlu1 %1829  ;;  %v3370_v55 = vpop.eup %3369  ;;  %v3114_v23 = vld [vmem:[%s4109_s7 + $0x10] sm:$0xff] }
 0x5a2   : > { %v1678_v15 = vmul.f32 %v3370_v55, %v4346_v46 }
 0x5a3   : > { %v1606_v42 = vpack.c.bf16 %v1605_v49, %v1604_v51  ;;  %v3113_v49 = vld [vmem:[%s4109_s7 + $0x8] sm:$0xff]  ;;  %v3112_v51 = vld [vmem:[%s4109_s7] sm:$0xff] }
 0x5a4   : > { %1954 = vmatpush.bf16.msrb.mxu0 %v3116_v48  ;;  %v3130_v48 = vld [vmem:[%s4113_s11 + $0x54] sm:$0xf] }
 0x5a7   : > { %2903 = vmatmul.msk.bf16.vlgmr.msrb.gmra.mxu1 %vm1257_vm14, %v1606_v42 }
 0x5a8   : > { %1955 = vmatpush.bf16.msrb.mxu0 %v3115_v32  ;;  %v2994_v32 = vld [vmem:[%s4113_s11 + $0x58] sm:$0xf0] }
 0x5a9   : > { %v1751_v53 = vpop.xlane.xlu1 %1750  ;;  %v1833_v59 = vpop.xlane.xlu2 %1832 }
 0x5ac   : > { %1956 = vmatpush.bf16.msrb.mxu0 %v3114_v23  ;;  %v2997_v23 = vor.u32 %v3130_v48, %v2994_v32 }
 0x5b0   : > { %1957 = vmatpush.bf16.msrb.mxu0 %v3113_v49  ;;  %v2984_v49 = vld [vmem:[%s4113_s11 + $0x40] sm:$0xf] }
 0x5b1   : > { %v1754_v63 = vpop.xlane.xlu1 %1753 }
 0x5b4   : > { %1958 = vmatpush.bf16.msrb.mxu0 %v3112_v51  ;;  %v3129_v51 = vld [vmem:[%s4113_s11 + $0x44] sm:$0xf0] }
 0x5be   : > { %v1675_v54 = vpop.xlane.xlu0 %1674 }
 0x5bf   : > { %3371 = vrcp.f32 %v1675_v54 }
 0x5c0   : > { %3373 = vrcp.f32 %v1754_v63 }
 0x5c1   : > { %3375 = vrcp.f32 %v1751_v53 }
 0x5c2   : > { %3377 = vrcp.f32 %v1833_v59 }
 0x5c3   : > { %3379 = vrcp.f32 %v1830_v6 }
 0x5c5   : > { %v3372_v56 = vpop.eup %3371 }
 0x5c6   : > { %v1679_v57 = vmul.f32 %v3372_v56, %v4383_v9  ;;  %v3374_v43 = vpop.eup %3373 }
 0x5c7   : > { %v3376_v60 = vpop.eup %3375  ;;  %v1758_v62 = vmul.f32 %v3374_v43, %v4379_v3 }
 0x5c8   : > { %v1680_v29 = vpack.c.bf16 %v1679_v57, %v1678_v15  ;;  %v1757_v7 = vmul.f32 %v3376_v60, %v4369_v58  ;;  %v3378_v46 = vpop.eup %3377 }
 0x5c9   : > { %v1840_v52 = vpop.permute.xlu1 %1839  ;;  %v3380_v2 = vpop.eup %3379  ;;  %v1837_v41 = vmul.f32 %v3378_v46, %v4371_v50 }
 0x5ca   : > { %1852 = vmatpush.bf16.msra.mxu3 %v1840_v52  ;;  %v1759_v0 = vpack.c.bf16 %v1758_v62, %v1757_v7  ;;  %v1836_v5 = vmul.f32 %v3380_v2, %v4364_v61 }
 0x5cb   : > { %2905 = vmatmul.msk.bf16.vlgmr.msrb.gmra.mxu3 %vm1257_vm14, %v1680_v29 }
 0x5cc   : > { %v1838_v8 = vpack.c.bf16 %v1837_v41, %v1836_v5  ;;  %v3809_v5 = vmov 128.0  }
 0x5cd   : > { %3381 = vrcp.f32 %v3809_v5  ;;  %v2952_v5 = vld [vmem:[%s4113_s11] sm:$0xf] }
 0x5d1   : > { %v1761_v30 = vpop.permute.xlu0 %1760 }
 0x5d2   : > { %1773 = vmatpush.bf16.msra.mxu1 %v1761_v30 }
 0x5d5   : > { %2907 = vmatmul.msk.bf16.vlgmr.msra.gmra.mxu1 %vm1257_vm14, %v1759_v0 }
 0x5db   : > { %2909 = vmatmul.msk.bf16.vlgmr.msra.gmra.mxu3 %vm1257_vm14, %v1838_v8  ;;  %v3382_v8 = vpop.eup %3381 }
 0x5dc   : > { %vm1985_vm3 = vweird.f32 %v3382_v8 }
 0x610   : > { %v1371_v9 = vpop.f32.mrf.mxu3 }
 0x611   : > { %v1376_v11 = vpack.c.bf16 %v1371_v9, %v1371_v9  ;;  %v1981_v9 = vmul.f32 128.0, %v3382_v8 }
 0x613   : > { %1380 = vrot.lane.b32.xlu0 %v1376_v11, %s3808_s28  ;;  %v1982_v11 = vsub.f32 1.0, %v1981_v9 }
 0x614   : > { %v1451_v3 = vpop.f32.mrf.mxu1 }
 0x615   : > { %v1456_v58 = vpack.c.bf16 %v1451_v3, %v1451_v3  ;;  %v1983_v3 = vmul.f32 %v3382_v8, %v1982_v11 }
 0x617   : > { %1460 = vrot.lane.b32.xlu1 %v1456_v58, %s3807_s14 }
 0x618   : > { %v1373_v13 = vpop.f32.mrf.mxu3 }
 0x619   : > { %v1377_v33 = vpack.c.bf16 %v1373_v13, %v1373_v13 }
 0x61b   : > { %1382 = vrot.lane.b32.xlu2 %v1377_v33, %s3808_s28 }
 0x61c   : > { %v1453_v50 = vpop.f32.mrf.mxu1 }
 0x61d   : > { %v1457_v10 = vpack.c.bf16 %v1453_v50, %v1453_v50 }
 0x61f   : > { %1462 = vrot.lane.b32.xlu0 %v1457_v10, %s3807_s14 }
 0x620   : > { %v1531_v61 = vpop.f32.mrf.mxu3 }
 0x621   : > { %v1536_v14 = vpack.c.bf16 %v1531_v61, %v1531_v61 }
 0x623   : > { %1540 = vrot.lane.b32.xlu1 %v1536_v14, %s3806_s3 }
 0x624   : > { %v1625_v16 = vpop.f32.mrf.mxu1 }
 0x625   : > { %v1630_v17 = vpack.c.bf16 %v1625_v16, %v1625_v16 }
 0x627   : > { %1632 = vst.msk [vmem:[#allocation3 + $0x8] sm:$0xf] %vm1306_vm15, %v1630_v17 }
 0x628   : > { %v1533_v18 = vpop.f32.mrf.mxu3 }
 0x629   : > { %v1537_v20 = vpack.c.bf16 %v1533_v18, %v1533_v18 }
 0x62b   : > { %1542 = vrot.lane.b32.xlu0 %v1537_v20, %s3806_s3 }
 0x62c   : > { %v1627_v21 = vpop.f32.mrf.mxu1 }
 0x62d   : > { %v1631_v24 = vpack.c.bf16 %v1627_v21, %v1627_v21 }
 0x62f   : > { %1633 = vst.msk [vmem:[#allocation3 + $0xc] sm:$0xf] %vm1306_vm15, %v1631_v24 }
 0x64e   : > { %v1696_v26 = vpop.f32.mrf.mxu3 }
 0x64f   : > { %v1701_v27 = vpack.c.bf16 %v1696_v26, %v1696_v26 }
 0x651   : > { %1705 = vrot.lane.b32.xlu1 %v1701_v27, %s3808_s28  ;;  %v3008_v27 = vld [vmem:[%s4113_s11 + $0x70] sm:$0xf] }
 0x652   : > { %v1775_v28 = vpop.f32.mrf.mxu1 }
 0x653   : > { %v1780_v31 = vpack.c.bf16 %v1775_v28, %v1775_v28  ;;  %v3135_v28 = vld [vmem:[%s4113_s11 + $0x74] sm:$0xf0] }
 0x655   : > { %1784 = vrot.lane.b32.xlu2 %v1780_v31, %s3807_s14  ;;  %v3134_v31 = vld [vmem:[%s4113_s11 + $0x74] sm:$0xf] }
 0x656   : > { %v1698_v34 = vpop.f32.mrf.mxu3 }
 0x657   : > { %v1702_v35 = vpack.c.bf16 %v1698_v34, %v1698_v34  ;;  %v3009_v34 = vor.u32 %v3135_v28, %v3008_v27 }
 0x659   : > { %1707 = vrot.lane.b32.xlu0 %v1702_v35, %s3808_s28  ;;  %v3010_v35 = vld [vmem:[%s4113_s11 + $0x78] sm:$0xf0]  ;;  %2177 = vmatpush.bf16.msrb.mxu1 %v3009_v34 }
 0x65a   : > { %v1777_v36 = vpop.f32.mrf.mxu1 }
 0x65b   : > { %v1781_v37 = vpack.c.bf16 %v1777_v36, %v1777_v36  ;;  %v3013_v36 = vor.u32 %v3134_v31, %v3010_v35 }
 0x65d   : > { %1786 = vrot.lane.b32.xlu1 %v1781_v37, %s3807_s14  ;;  %2196 = vmatpush.bf16.msra.mxu2 %v3013_v36  ;;  %v3000_v37 = vld [vmem:[%s4113_s11 + $0x60] sm:$0xf] }
 0x65e   : > { %v1854_v4 = vpop.f32.mrf.mxu3 }
 0x65f   : > { %v1859_v25 = vpack.c.bf16 %v1854_v4, %v1854_v4  ;;  %v3133_v4 = vld [vmem:[%s4113_s11 + $0x64] sm:$0xf0] }
 0x661   : > { %1863 = vrot.lane.b32.xlu0 %v1859_v25, %s3806_s3  ;;  %v3132_v25 = vld [vmem:[%s4113_s11 + $0x64] sm:$0xf] }
 0x666   : > { %v1856_v38 = vpop.f32.mrf.mxu3 }
 0x667   : > { %v1860_v44 = vpack.c.bf16 %v1856_v38, %v1856_v38  ;;  %v3001_v38 = vor.u32 %v3133_v4, %v3000_v37 }
 0x669   : > { %1865 = vrot.lane.b32.xlu2 %v1860_v44, %s3806_s3  ;;  %v3005_v44 = vor.u32 %v3132_v25, %v3002_v1  ;;  %2178 = vmatpush.bf16.msrb.mxu1 %v3001_v38  ;;  %v3312_v25 = vld [vmem:[%s718_s8] ss:$0 sm:$0xff] }
 0x66b   : > { %2197 = vmatpush.bf16.msra.mxu2 %v3005_v44 }
 0x66f   : > { %2198 = vmatpush.bf16.msra.mxu2 %v2997_v23 }
 0x675   : > { %v1383_v12 = vpop.permute.xlu2 %1382 }
 0x676   : > { %1388 = vst.msk [vmem:[#allocation3 + $0x4] sm:$0xf] %vm1386_vm0, %v1383_v12  ;;  %v2993_v12 = vor.u32 %v3131_v47, %v2992_v45  ;;  %v3313_v47 = vld [vmem:[%s727_s9] ss:$0 sm:$0xff] }
 0x678   : > { %2179 = vmatpush.bf16.msrb.mxu1 %v2993_v12 }
 0x685   : > { %v1381_v42 = vpop.permute.xlu0 %1380 }
 0x686   : > { %1387 = vst.msk [vmem:[#allocation3] sm:$0xf] %vm1386_vm0, %v1381_v42  ;;  %v3128_v42 = vld [vmem:[%s4113_s11 + $0x44] sm:$0xf] }
 0x689   : > { %v1461_v6 = vpop.permute.xlu1 %1460 }
 0x68a   : > { %1467 = vst.msk [vmem:[#allocation3] sm:$0xf] %vm1466_vm1, %v1461_v6  ;;  %v2985_v6 = vor.u32 %v3129_v51, %v2984_v49  ;;  %v3143_v51 = vld [vmem:[%s4115_s18 + $0x38] sm:$0xff] }
 0x68b   : > { %2359 = vmatpush.bf16.msrb.mxu3 %v3143_v51 }
 0x68c   : > { %2180 = vmatpush.bf16.msrb.mxu1 %v2985_v6 }
 0x691   : > { %v1463_v53 = vpop.permute.xlu0 %1462 }
 0x692   : > { %1468 = vst.msk [vmem:[#allocation3 + $0x4] sm:$0xf] %vm1466_vm1, %v1463_v53  ;;  %v2986_v53 = vld [vmem:[%s4113_s11 + $0x48] sm:$0xf0] }
 0x695   : > { %v1541_v54 = vpop.permute.xlu1 %1540 }
 0x696   : > { %1547 = vst.msk [vmem:[#allocation3] sm:$0xf] %vm1546_vm2, %v1541_v54  ;;  %v2989_v54 = vor.u32 %v3128_v42, %v2986_v53  ;;  %v3151_v42 = vld [vmem:[%s4115_s18 + $0x78] sm:$0xff] }
 0x697   : > { %2378 = vmatpush.bf16.msra.mxu0 %v3151_v42 }
 0x698   : > { %2199 = vmatpush.bf16.msra.mxu2 %v2989_v54  ;;  %v3142_v54 = vld [vmem:[%s4115_s18 + $0x30] sm:$0xff] }
 0x699   : > { %2360 = vmatpush.bf16.msrb.mxu3 %v3142_v54 }
 0x69d   : > { %v1543_v63 = vpop.permute.xlu0 %1542 }
 0x69e   : > { %1548 = vst.msk [vmem:[#allocation3 + $0x4] sm:$0xf] %vm1546_vm2, %v1543_v63  ;;  %v2976_v63 = vld [vmem:[%s4113_s11 + $0x30] sm:$0xf] }
 0x6a5   : > { %v3110_v55 = vld [vmem:[#allocation3] sm:$0xff] }
 0x6a6   : > { %1959 = vmatmul.bf16.vlgmr.msrb.gmra.mxu0 %v3110_v55  ;;  %v3127_v55 = vld [vmem:[%s4113_s11 + $0x34] sm:$0xf0] }
 0x6af   : > { %v1785_v15 = vpop.permute.xlu2 %1784 }
 0x6c3   : > { %v1706_v56 = vpop.permute.xlu1 %1705  ;;  %v1866_v59 = vpop.permute.xlu2 %1865 }
 0x6c4   : > { %1711 = vst.msk [vmem:[#allocation3 + $0x8] sm:$0xf] %vm1386_vm0, %v1706_v56  ;;  %v3126_v56 = vld [vmem:[%s4113_s11 + $0x34] sm:$0xf] }
 0x6c5   : > { %1790 = vst.msk [vmem:[#allocation3 + $0x8] sm:$0xf] %vm1466_vm1, %v1785_v15  ;;  %v2977_v15 = vor.u32 %v3127_v55, %v2976_v63  ;;  %v3150_v63 = vld [vmem:[%s4115_s18 + $0x70] sm:$0xff] }
 0x6c6   : > { %2379 = vmatpush.bf16.msra.mxu0 %v3150_v63 }
 0x6c7   : > { %2181 = vmatpush.bf16.msrb.mxu1 %v2977_v15 }
 0x6cb   : > { %v1708_v57 = vpop.permute.xlu0 %1707 }
 0x6cc   : > { %1712 = vst.msk [vmem:[#allocation3 + $0xc] sm:$0xf] %vm1386_vm0, %v1708_v57  ;;  %v2978_v57 = vld [vmem:[%s4113_s11 + $0x38] sm:$0xf0] }
 0x6cf   : > { %v1787_v29 = vpop.permute.xlu1 %1786 }
 0x6d0   : > { %1791 = vst.msk [vmem:[#allocation3 + $0xc] sm:$0xf] %vm1466_vm1, %v1787_v29  ;;  %v2981_v29 = vor.u32 %v3126_v56, %v2978_v57  ;;  %v3141_v57 = vld [vmem:[%s4115_s18 + $0x28] sm:$0xff] }
 0x6d1   : > { %1870 = vst.msk [vmem:[#allocation3 + $0xc] sm:$0xf] %vm1546_vm2, %v1866_v59  ;;  %v2968_v59 = vld [vmem:[%s4113_s11 + $0x20] sm:$0xf]  ;;  %2361 = vmatpush.bf16.msrb.mxu3 %v3141_v57 }
 0x6d2   : > { %2200 = vmatpush.bf16.msra.mxu2 %v2981_v29  ;;  %v3149_v29 = vld [vmem:[%s4115_s18 + $0x68] sm:$0xff] }
 0x6d3   : > { %v1864_v52 = vpop.permute.xlu0 %1863  ;;  %2380 = vmatpush.bf16.msra.mxu0 %v3149_v29  ;;  %v3314_v29 = vld [vmem:[%s842_s12] ss:$0 sm:$0xff] }
 0x6d4   : > { %1869 = vst.msk [vmem:[#allocation3 + $0x8] sm:$0xf] %vm1546_vm2, %v1864_v52  ;;  %v3125_v52 = vld [vmem:[%s4113_s11 + $0x24] sm:$0xf0] }
 0x6db   : > { %v3111_v43 = vld [vmem:[#allocation3 + $0x8] sm:$0xff] }
 0x6dc   : > { %1964 = vmatmul.bf16.gmra.mxu0 %v3111_v43  ;;  %v3124_v43 = vld [vmem:[%s4113_s11 + $0x24] sm:$0xf] }
 0x723   : > { %v1960_v60 = vpop.f32.mrf.mxu0 }
 0x724   : > { %v1961_v62 = vadd.f32 %v1960_v60, %v4171_v19  ;;  %v1984_v19 = vadd.f32 %v3382_v8, %v1983_v3  ;;  %v2969_v60 = vor.u32 %v3125_v52, %v2968_v59  ;;  %v3120_v3 = vld [vmem:[%s4113_s11 + $0x4] sm:$0xf] }
 0x726   : > { %1972 = vadd.xlane.f32.xlu1 %v1961_v62  ;;  %v4451_v58 = vsel %vm1985_vm3, %v3382_v8, %v1984_v19  ;;  %2182 = vmatpush.bf16.msrb.mxu1 %v2969_v60  ;;  %v3121_v8 = vld [vmem:[%s4113_s11 + $0x4] sm:$0xf0]  ;;  %v2954_v19 = vld [vmem:[%s4113_s11 + $0x8] sm:$0xf0] }
 0x72b   : > { %v1962_v7 = vpop.f32.mrf.mxu0 }
 0x72c   : > { %v1963_v30 = vadd.f32 %v1962_v7, %v4173_v22 }
 0x72e   : > { %1974 = vadd.xlane.f32.xlu0 %v1963_v30 }
 0x759   : > { %v1965_v46 = vpop.f32.mrf.mxu0 }
 0x75a   : > { %v1966_v0 = vadd.f32 %v1965_v46, %v4187_v39  ;;  %v3123_v46 = vld [vmem:[%s4113_s11 + $0x14] sm:$0xf0] }
 0x75c   : > { %1976 = vadd.xlane.f32.xlu2 %v1966_v0 }
 0x761   : > { %v1967_v2 = vpop.f32.mrf.mxu0 }
 0x762   : > { %v1968_v41 = vadd.f32 %v1967_v2, %v4189_v40 }
 0x764   : > { %1978 = vadd.xlane.f32.xlu1 %v1968_v41 }
 0x799   : > { %v1973_v22 = vpop.xlane.xlu1 %1972 }
 0x79a   : > { %v1987_v13 = vmul.f32 %v4451_v58, %v1973_v22 }
 0x79c   : > { %v4454_v33 = vsub.f32 %v1961_v62, %v1987_v13  ;;  %v2970_v62 = vld [vmem:[%s4113_s11 + $0x28] sm:$0xf0]  ;;  %v2953_v13 = vor.u32 %v3121_v8, %v2952_v5 }
 0x79d   : > { %v2973_v7 = vor.u32 %v3124_v43, %v2970_v62  ;;  %v3140_v43 = vld [vmem:[%s4115_s18 + $0x20] sm:$0xff] }
 0x79e   : > { %v1995_v39 = vmul.f32 %v4454_v33, %v4454_v33  ;;  %2362 = vmatpush.bf16.msrb.mxu3 %v3140_v43 }
 0x79f   : > { %2201 = vmatpush.bf16.msra.mxu2 %v2973_v7 }
 0x7a0   : > { %1999 = vadd.xlane.f32.xlu0 %v1995_v39  ;;  %v2957_v39 = vor.u32 %v3120_v3, %v2954_v19 }
 0x7a1   : > { %v1975_v40 = vpop.xlane.xlu0 %1974 }
 0x7a2   : > { %v1988_v50 = vmul.f32 %v4451_v58, %v1975_v40 }
 0x7a4   : > { %v4459_v10 = vsub.f32 %v1963_v30, %v1988_v50  ;;  %v2960_v30 = vld [vmem:[%s4113_s11 + $0x10] sm:$0xf] }
 0x7a5   : > { %v2961_v2 = vor.u32 %v3123_v46, %v2960_v30 }
 0x7a6   : > { %v1996_v61 = vmul.f32 %v4459_v10, %v4459_v10 }
 0x7a7   : > { %2183 = vmatpush.bf16.msrb.mxu1 %v2961_v2 }
 0x7a8   : > { %2001 = vadd.xlane.f32.xlu2 %v1996_v61 }
 0x7ab   : > { %2184 = vmatpush.bf16.msrb.mxu1 %v2953_v13 }
 0x7cf   : > { %v1977_v14 = vpop.xlane.xlu2 %1976 }
 0x7d0   : > { %v1989_v16 = vmul.f32 %v4451_v58, %v1977_v14 }
 0x7d2   : > { %v4464_v17 = vsub.f32 %v1966_v0, %v1989_v16  ;;  %v3122_v0 = vld [vmem:[%s4113_s11 + $0x14] sm:$0xf] }
 0x7d4   : > { %v1997_v18 = vmul.f32 %v4464_v17, %v4464_v17 }
 0x7d6   : > { %2003 = vadd.xlane.f32.xlu1 %v1997_v18 }
 0x7d7   : > { %v1979_v20 = vpop.xlane.xlu1 %1978 }
 0x7d8   : > { %v1990_v21 = vmul.f32 %v4451_v58, %v1979_v20 }
 0x7da   : > { %v4469_v24 = vsub.f32 %v1968_v41, %v1990_v21  ;;  %v2962_v41 = vld [vmem:[%s4113_s11 + $0x18] sm:$0xf0] }
 0x7db   : > { %v2965_v11 = vor.u32 %v3122_v0, %v2962_v41 }
 0x7dc   : > { %v1998_v26 = vmul.f32 %v4469_v24, %v4469_v24 }
 0x7dd   : > { %2202 = vmatpush.bf16.msra.mxu2 %v2965_v11 }
 0x7de   : > { %2005 = vadd.xlane.f32.xlu0 %v1998_v26 }
 0x7e1   : > { %2203 = vmatpush.bf16.msra.mxu2 %v2957_v39  ;;  %v3139_v39 = vld [vmem:[%s4115_s18 + $0x18] sm:$0xff] }
 0x7e2   : > { %2363 = vmatpush.bf16.msrb.mxu3 %v3139_v39 }
 0x813   : > { %v2000_v9 = vpop.xlane.xlu0 %1999 }
 0x814   : > { %v2007_v22 = vmul.f32 %v2000_v9, %v4451_v58 }
 0x816   : > { %v2011_v40 = vadd.f32 1e-06, %v2007_v22 }
 0x818   : > { %3383 = vrsqrt.f32 %v2011_v40  ;;  %vm2021_vm5 = vweird.f32 %v2011_v40 }
 0x81b   : > { %v2002_v50 = vpop.xlane.xlu2 %2001 }
 0x81c   : > { %v2008_v61 = vmul.f32 %v2002_v50, %v4451_v58  ;;  %v3147_v50 = vld [vmem:[%s4115_s18 + $0x58] sm:$0xff] }
 0x81e   : > { %v3384_v14 = vpop.eup %3383  ;;  %v2012_v16 = vadd.f32 1e-06, %v2008_v61  ;;  %v3137_v61 = vld [vmem:[%s4115_s18 + $0x8] sm:$0xff] }
 0x81f   : > { %v2016_v18 = vmul.f32 %v3384_v14, %v2011_v40  ;;  %vm2022_vm4 = vweird.f32 %v3384_v14  ;;  %v3148_v40 = vld [vmem:[%s4115_s18 + $0x60] sm:$0xff] }
 0x820   : > { %3385 = vrsqrt.f32 %v2012_v16  ;;  %vm2023_vm6 = vmor %vm2021_vm5, %vm2022_vm4  ;;  %vm2031_vm8 = vweird.f32 %v2012_v16  ;;  %2381 = vmatpush.bf16.msra.mxu0 %v3148_v40 }
 0x821   : > { %v2017_v20 = vmul.f32 %v3384_v14, %v2016_v18  ;;  %v3145_v18 = vld [vmem:[%s4115_s18 + $0x48] sm:$0xff] }
 0x823   : > { %v2018_v21 = vmul.f32 0.5, %v2017_v20  ;;  %v3144_v20 = vld [vmem:[%s4115_s18 + $0x40] sm:$0xff] }
 0x824   : > { %2382 = vmatpush.bf16.msra.mxu0 %v3147_v50 }
 0x825   : > { %v2019_v26 = vsub.f32 1.5, %v2018_v21  ;;  %v2091_v21 = vld [vmem:[%s4099_s5] sm:$0x3] }
 0x826   : > { %v3386_v27 = vpop.eup %3385 }
 0x827   : > { %v2020_v28 = vmul.f32 %v3384_v14, %v2019_v26  ;;  %v2026_v31 = vmul.f32 %v3386_v27, %v2012_v16  ;;  %vm2032_vm7 = vweird.f32 %v3386_v27  ;;  %v3136_v16 = vld [vmem:[%s4115_s18] sm:$0xff] }
 0x828   : > { %vm2033_vm9 = vmor %vm2031_vm8, %vm2032_vm7 }
 0x829   : > { %v2027_v34 = vmul.f32 %v3386_v27, %v2026_v31  ;;  %v2024_v35 = vsel %vm2023_vm6, %v3384_v14, %v2020_v28  ;;  %v3146_v14 = vld [vmem:[%s4115_s18 + $0x50] sm:$0xff] }
 0x82a   : > { %v2055_v4 = vmul.f32 %v2024_v35, %v4454_v33  ;;  %2383 = vmatpush.bf16.msra.mxu0 %v3146_v14  ;;  %v2094_v35 = vperm.slane %v2091_v21, 1 }
 0x82b   : > { %v2028_v36 = vmul.f32 0.5, %v2027_v34 }
 0x82c   : > { %v2062_v45 = vmul.f32 %v3312_v25, %v2055_v4 }
 0x82d   : > { %v2029_v37 = vsub.f32 1.5, %v2028_v36 }
 0x82e   : > { %v4513_v12 = vadd.f32 %v3313_v47, %v2062_v45  ;;  %2384 = vmatpush.bf16.msra.mxu0 %v3145_v18 }
 0x82f   : > { %v2030_v38 = vmul.f32 %v3386_v27, %v2029_v37 }
 0x831   : > { %v2034_v1 = vsel %vm2033_vm9, %v3386_v27, %v2030_v38  ;;  %v2093_v27 = vperm.slane %v2091_v21, 0 }
 0x832   : > { %v2056_v44 = vmul.f32 %v2034_v1, %v4459_v10  ;;  %2385 = vmatpush.bf16.msra.mxu0 %v3144_v20 }
 0x834   : > { %v2063_v48 = vmul.f32 %v3312_v25, %v2056_v44 }
 0x836   : > { %v4515_v32 = vadd.f32 %v3313_v47, %v2063_v48 }
 0x838   : > { %v2073_v33 = vpack.c.bf16 %v4515_v32, %v4513_v12 }
 0x83a   : > { %2185 = vmatmul.bf16.vlgmr.msrb.gmra.mxu1 %v2073_v33  ;;  %2204 = vmatmul.bf16.vlgmr.msra.gmra.mxu2 %v2073_v33 }
 0x849   : > { %v2004_v23 = vpop.xlane.xlu1 %2003 }
 0x84a   : > { %v2009_v49 = vmul.f32 %v2004_v23, %v4451_v58 }
 0x84c   : > { %v2013_v10 = vadd.f32 1e-06, %v2009_v49 }
 0x84e   : > { %3387 = vrsqrt.f32 %v2013_v10  ;;  %vm2041_vm11 = vweird.f32 %v2013_v10 }
 0x851   : > { %v2006_v6 = vpop.xlane.xlu0 %2005 }
 0x852   : > { %v2010_v53 = vmul.f32 %v2006_v6, %v4451_v58 }
 0x854   : > { %v3388_v55 = vpop.eup %3387  ;;  %v2014_v56 = vadd.f32 1e-06, %v2010_v53 }
 0x855   : > { %v2036_v15 = vmul.f32 %v3388_v55, %v2013_v10  ;;  %vm2042_vm10 = vweird.f32 %v3388_v55 }
 0x856   : > { %3389 = vrsqrt.f32 %v2014_v56  ;;  %vm2043_vm12 = vmor %vm2041_vm11, %vm2042_vm10  ;;  %vm2051_vm14 = vweird.f32 %v2014_v56 }
 0x857   : > { %v2037_v59 = vmul.f32 %v3388_v55, %v2036_v15 }
 0x859   : > { %v2038_v52 = vmul.f32 0.5, %v2037_v59 }
 0x85b   : > { %v2039_v60 = vsub.f32 1.5, %v2038_v52 }
 0x85c   : > { %v3390_v62 = vpop.eup %3389 }
 0x85d   : > { %v2040_v7 = vmul.f32 %v3388_v55, %v2039_v60  ;;  %v2046_v30 = vmul.f32 %v3390_v62, %v2014_v56  ;;  %vm2052_vm13 = vweird.f32 %v3390_v62 }
 0x85e   : > { %vm2053_vm15 = vmor %vm2051_vm14, %vm2052_vm13 }
 0x85f   : > { %v2047_v46 = vmul.f32 %v3390_v62, %v2046_v30  ;;  %v2044_v2 = vsel %vm2043_vm12, %v3388_v55, %v2040_v7 }
 0x860   : > { %v2057_v5 = vmul.f32 %v2044_v2, %v4464_v17 }
 0x861   : > { %v2048_v0 = vmul.f32 0.5, %v2047_v46 }
 0x862   : > { %v2064_v3 = vmul.f32 %v3312_v25, %v2057_v5 }
 0x863   : > { %v2049_v41 = vsub.f32 1.5, %v2048_v0 }
 0x864   : > { %v4530_v22 = vadd.f32 %v3313_v47, %v2064_v3 }
 0x865   : > { %v2050_v8 = vmul.f32 %v3390_v62, %v2049_v41 }
 0x867   : > { %v2054_v9 = vsel %vm2053_vm15, %v3390_v62, %v2050_v8 }
 0x868   : > { %v2058_v11 = vmul.f32 %v2054_v9, %v4469_v24  ;;  %v3138_v24 = vld [vmem:[%s4115_s18 + $0x10] sm:$0xff] }
 0x869   : > { %2364 = vmatpush.bf16.msrb.mxu3 %v3138_v24 }
 0x86a   : > { %v2065_v19 = vmul.f32 %v3312_v25, %v2058_v11 }
 0x86c   : > { %v4532_v13 = vadd.f32 %v3313_v47, %v2065_v19 }
 0x86d   : > { %2365 = vmatpush.bf16.msrb.mxu3 %v3137_v61 }
 0x86e   : > { %v2074_v17 = vpack.c.bf16 %v4532_v13, %v4530_v22 }
 0x870   : > { %2190 = vmatmul.bf16.gmra.mxu1 %v2074_v17  ;;  %2209 = vmatmul.bf16.gmra.mxu2 %v2074_v17 }
 0x871   : > { %2366 = vmatpush.bf16.msrb.mxu3 %v3136_v16 }
 0x8b7   : > { %v2186_v26 = vpop.f32.mrf.mxu1 }
 0x8b8   : > { %v2187_v31 = vadd.f32 %v2186_v26, %v2093_v27 }
 0x8ba   : > { %v2215_v37 = vmax.f32 %v2187_v31, 0.0 }
 0x8bd   : > { %v2205_v28 = vpop.f32.mrf.mxu2 }
 0x8be   : > { %v2206_v25 = vadd.f32 %v2205_v28, %v2094_v35 }
 0x8bf   : > { %v2188_v34 = vpop.f32.mrf.mxu1 }
 0x8c0   : > { %v2189_v36 = vadd.f32 %v2188_v34, %v2093_v27  ;;  %v2216_v45 = vmax.f32 %v2206_v25, 0.0 }
 0x8c2   : > { %v2217_v4 = vmax.f32 %v2189_v36, 0.0 }
 0x8c4   : > { %v2223_v38 = vpack.c.bf16 %v2217_v4, %v2215_v37 }
 0x8c5   : > { %v2207_v1 = vpop.f32.mrf.mxu2 }
 0x8c6   : > { %v2208_v44 = vadd.f32 %v2207_v1, %v2094_v35  ;;  %2367 = vmatmul.bf16.vlgmr.msrb.gmra.mxu3 %v2223_v38 }
 0x8c8   : > { %v2218_v47 = vmax.f32 %v2208_v44, 0.0 }
 0x8ca   : > { %v2224_v48 = vpack.c.bf16 %v2218_v47, %v2216_v45 }
 0x8cc   : > { %2386 = vmatmul.bf16.vlgmr.msra.gmra.mxu0 %v2224_v48 }
 0x8ed   : > { %v2191_v33 = vpop.f32.mrf.mxu1 }
 0x8ee   : > { %v2192_v49 = vadd.f32 %v2191_v33, %v2093_v27 }
 0x8f0   : > { %v2219_v42 = vmax.f32 %v2192_v49, 0.0  ;;  %v3315_v49 = vld [vmem:[%s845_s19] ss:$0 sm:$0xff] }
 0x8f3   : > { %v2210_v23 = vpop.f32.mrf.mxu2 }
 0x8f4   : > { %v2211_v53 = vadd.f32 %v2210_v23, %v2094_v35 }
 0x8f5   : > { %v2193_v10 = vpop.f32.mrf.mxu1 }
 0x8f6   : > { %v2194_v51 = vadd.f32 %v2193_v10, %v2093_v27  ;;  %v2220_v56 = vmax.f32 %v2211_v53, 0.0 }
 0x8f8   : > { %v2221_v6 = vmax.f32 %v2194_v51, 0.0 }
 0x8fa   : > { %v2225_v54 = vpack.c.bf16 %v2221_v6, %v2219_v42  ;;  %v3316_v42 = vld [vmem:[%s848_s6] ss:$0 sm:$0xff]  ;;  %s4686_s6 = sld [smem:[#allocation25_spill]] }
 0x8fb   : > { %v2212_v63 = vpop.f32.mrf.mxu2 }
 0x8fc   : > { %v2213_v55 = vadd.f32 %v2212_v63, %v2094_v35  ;;  %2372 = vmatmul.bf16.gmra.mxu3 %v2225_v54 }
 0x8fe   : > { %v2222_v15 = vmax.f32 %v2213_v55, 0.0 }
 0x900   : > { %v2226_v57 = vpack.c.bf16 %v2222_v15, %v2220_v56  ;;  %p3078_p3 = scmp.ne.s32.totalorder %s4686_s6, 1 }
 0x902   : > { %2391 = vmatmul.bf16.gmra.mxu0 %v2226_v57 }
 0x949   : > { %v2368_v59 = vpop.f32.mrf.mxu3  ;;  %v2387_v52 = vpop.f32.mrf.mxu0 }
 0x94a   : > { %v2369_v43 = vadd.f32 %v3314_v29, %v2368_v59 }
 0x94c   : > { %v2388_v60 = vadd.f32 %v2387_v52, %v2369_v43 }
 0x94e   : > { %v2397_v62 = vadd.f32 %v2388_v60, %v4513_v12 }
 0x950   : > { %2403 = vadd.xlane.f32.xlu2 %v2397_v62 }
 0x951   : > { %v2370_v7 = vpop.f32.mrf.mxu3  ;;  %v2389_v46 = vpop.f32.mrf.mxu0 }
 0x952   : > { %v2371_v30 = vadd.f32 %v3314_v29, %v2370_v7 }
 0x954   : > { %v2390_v0 = vadd.f32 %v2389_v46, %v2371_v30 }
 0x956   : > { %v2398_v2 = vadd.f32 %v2390_v0, %v4515_v32 }
 0x958   : > { %2405 = vadd.xlane.f32.xlu1 %v2398_v2 }
 0x97f   : > { %v2373_v41 = vpop.f32.mrf.mxu3  ;;  %v2392_v5 = vpop.f32.mrf.mxu0 }
 0x980   : > { %v2374_v8 = vadd.f32 %v3314_v29, %v2373_v41 }
 0x982   : > { %v2393_v9 = vadd.f32 %v2392_v5, %v2374_v8 }
 0x984   : > { %v2399_v11 = vadd.f32 %v2393_v9, %v4530_v22 }
 0x986   : > { %2407 = vadd.xlane.f32.xlu0 %v2399_v11 }
 0x987   : > { %v2375_v3 = vpop.f32.mrf.mxu3  ;;  %v2394_v17 = vpop.f32.mrf.mxu0 }
 0x988   : > { %v2376_v19 = vadd.f32 %v3314_v29, %v2375_v3 }
 0x98a   : > { %v2395_v39 = vadd.f32 %v2394_v17, %v2376_v19 }
 0x98c   : > { %v2400_v12 = vadd.f32 %v2395_v39, %v4532_v13 }
 0x98e   : > { %2409 = vadd.xlane.f32.xlu2 %v2400_v12 }
 0x9c3   : > { %v2404_v40 = vpop.xlane.xlu2 %2403 }
 0x9c4   : > { %v2411_v24 = vmul.f32 %v2404_v40, %v4451_v58 }
 0x9c6   : > { %v2415_v50 = vsub.f32 %v2397_v62, %v2411_v24 }
 0x9c8   : > { %v2419_v32 = vmul.f32 %v2415_v50, %v2415_v50 }
 0x9ca   : > { %2423 = vadd.xlane.f32.xlu1 %v2419_v32 }
 0x9cb   : > { %v2406_v61 = vpop.xlane.xlu1 %2405 }
 0x9cc   : > { %v2412_v14 = vmul.f32 %v2406_v61, %v4451_v58 }
 0x9ce   : > { %v2416_v16 = vsub.f32 %v2398_v2, %v2412_v14 }
 0x9d0   : > { %v2420_v18 = vmul.f32 %v2416_v16, %v2416_v16 }
 0x9d2   : > { %2425 = vadd.xlane.f32.xlu0 %v2420_v18 }
 0x9f9   : > { %v2408_v22 = vpop.xlane.xlu0 %2407 }
 0x9fa   : > { %v2413_v20 = vmul.f32 %v2408_v22, %v4451_v58 }
 0x9fc   : > { %v4558_v21 = vsub.f32 %v2399_v11, %v2413_v20 }
 0x9fe   : > { %v2421_v13 = vmul.f32 %v4558_v21, %v4558_v21 }
 0xa00   : > { %2427 = vadd.xlane.f32.xlu2 %v2421_v13 }
 0xa01   : > { %v2410_v26 = vpop.xlane.xlu2 %2409 }
 0xa02   : > { %v2414_v27 = vmul.f32 %v2410_v26, %v4451_v58 }
 0xa04   : > { %v4563_v28 = vsub.f32 %v2400_v12, %v2414_v27 }
 0xa06   : > { %v2422_v31 = vmul.f32 %v4563_v28, %v4563_v28 }
 0xa08   : > { %2429 = vadd.xlane.f32.xlu1 %v2422_v31 }
 0xa3d   : > { %v2424_v34 = vpop.xlane.xlu1 %2423 }
 0xa3e   : > { %v2431_v35 = vmul.f32 %v2424_v34, %v4451_v58 }
 0xa40   : > { %v2435_v36 = vadd.f32 1e-06, %v2431_v35 }
 0xa42   : > { %3391 = vrsqrt.f32 %v2435_v36  ;;  %vm2445_vm1 = vweird.f32 %v2435_v36 }
 0xa45   : > { %v2426_v37 = vpop.xlane.xlu0 %2425 }
 0xa46   : > { %v2432_v4 = vmul.f32 %v2426_v37, %v4451_v58 }
 0xa48   : > { %v3392_v25 = vpop.eup %3391  ;;  %v2436_v38 = vadd.f32 1e-06, %v2432_v4 }
 0xa49   : > { %v2440_v1 = vmul.f32 %v3392_v25, %v2435_v36  ;;  %vm2446_vm0 = vweird.f32 %v3392_v25 }
 0xa4a   : > { %3393 = vrsqrt.f32 %v2436_v38  ;;  %vm2447_vm2 = vmor %vm2445_vm1, %vm2446_vm0  ;;  %vm2455_vm4 = vweird.f32 %v2436_v38 }
 0xa4b   : > { %v2441_v44 = vmul.f32 %v3392_v25, %v2440_v1 }
 0xa4d   : > { %v2442_v45 = vmul.f32 0.5, %v2441_v44 }
 0xa4f   : > { %v2443_v47 = vsub.f32 1.5, %v2442_v45 }
 0xa50   : > { %v3394_v48 = vpop.eup %3393 }
 0xa51   : > { %v2444_v33 = vmul.f32 %v3392_v25, %v2443_v47  ;;  %v2450_v23 = vmul.f32 %v3394_v48, %v2436_v38  ;;  %vm2456_vm3 = vweird.f32 %v3394_v48 }
 0xa52   : > { %vm2457_vm5 = vmor %vm2455_vm4, %vm2456_vm3 }
 0xa53   : > { %v2448_v10 = vsel %vm2447_vm2, %v3392_v25, %v2444_v33  ;;  %v2451_v51 = vmul.f32 %v3394_v48, %v2450_v23 }
 0xa54   : > { %v2479_v6 = vmul.f32 %v2448_v10, %v2415_v50 }
 0xa55   : > { %v2452_v53 = vmul.f32 0.5, %v2451_v51 }
 0xa56   : > { %v2486_v54 = vmul.f32 %v3315_v49, %v2479_v6 }
 0xa57   : > { %v2453_v63 = vsub.f32 1.5, %v2452_v53 }
 0xa58   : > { %v2493_v55 = vadd.f32 %v3316_v42, %v2486_v54 }
 0xa59   : > { %v2454_v56 = vmul.f32 %v3394_v48, %v2453_v63 }
 0xa5a   : > { %2497 = vst [vmem:[#allocation2 + $0x10] sm:$0xff] %v2493_v55 }
 0xa5b   : > { %v2458_v15 = vsel %vm2457_vm5, %v3394_v48, %v2454_v56 }
 0xa5c   : > { %v2480_v57 = vmul.f32 %v2458_v15, %v2416_v16 }
 0xa5e   : > { %v2487_v29 = vmul.f32 %v3315_v49, %v2480_v57 }
 0xa60   : > { %v2494_v59 = vadd.f32 %v3316_v42, %v2487_v29 }
 0xa62   : > { %2498 = vst [vmem:[#allocation2] sm:$0xff] %v2494_v59 }
 0xa73   : > { %v2428_v52 = vpop.xlane.xlu2 %2427 }
 0xa74   : > { %v2433_v43 = vmul.f32 %v2428_v52, %v4451_v58 }
 0xa76   : > { %v2437_v60 = vadd.f32 1e-06, %v2433_v43 }
 0xa78   : > { %3395 = vrsqrt.f32 %v2437_v60  ;;  %vm2465_vm7 = vweird.f32 %v2437_v60 }
 0xa7b   : > { %v2430_v62 = vpop.xlane.xlu1 %2429 }
 0xa7c   : > { %v2434_v7 = vmul.f32 %v2430_v62, %v4451_v58 }
 0xa7e   : > { %v3396_v30 = vpop.eup %3395  ;;  %v2438_v46 = vadd.f32 1e-06, %v2434_v7 }
 0xa7f   : > { %v2460_v0 = vmul.f32 %v3396_v30, %v2437_v60  ;;  %vm2466_vm6 = vweird.f32 %v3396_v30 }
 0xa80   : > { %3397 = vrsqrt.f32 %v2438_v46  ;;  %vm2467_vm8 = vmor %vm2465_vm7, %vm2466_vm6  ;;  %vm2475_vm10 = vweird.f32 %v2438_v46 }
 0xa81   : > { %v2461_v2 = vmul.f32 %v3396_v30, %v2460_v0 }
 0xa83   : > { %v2462_v41 = vmul.f32 0.5, %v2461_v2 }
 0xa85   : > { %v2463_v5 = vsub.f32 1.5, %v2462_v41 }
 0xa86   : > { %v3398_v8 = vpop.eup %3397 }
 0xa87   : > { %v2464_v9 = vmul.f32 %v3396_v30, %v2463_v5  ;;  %v2470_v11 = vmul.f32 %v3398_v8, %v2438_v46  ;;  %vm2476_vm9 = vweird.f32 %v3398_v8 }
 0xa88   : > { %vm2477_vm11 = vmor %vm2475_vm10, %vm2476_vm9 }
 0xa89   : > { %v2468_v3 = vsel %vm2467_vm8, %v3396_v30, %v2464_v9  ;;  %v2471_v19 = vmul.f32 %v3398_v8, %v2470_v11 }
 0xa8a   : > { %v2481_v17 = vmul.f32 %v2468_v3, %v4558_v21 }
 0xa8b   : > { %v2472_v39 = vmul.f32 0.5, %v2471_v19 }
 0xa8c   : > { %v2488_v12 = vmul.f32 %v3315_v49, %v2481_v17 }
 0xa8d   : > { %v2473_v58 = vsub.f32 1.5, %v2472_v39 }
 0xa8e   : > { %v2495_v40 = vadd.f32 %v3316_v42, %v2488_v12 }
 0xa8f   : > { %v2474_v24 = vmul.f32 %v3398_v8, %v2473_v58 }
 0xa90   : > { %2499 = vst [vmem:[#allocation2 + $0x18] sm:$0xff] %v2495_v40 }
 0xa91   : > { %v2478_v50 = vsel %vm2477_vm11, %v3398_v8, %v2474_v24 }
 0xa92   : > { %v2482_v32 = vmul.f32 %v2478_v50, %v4563_v28 }
 0xa94   : > { %v2489_v61 = vmul.f32 %v3315_v49, %v2482_v32  ;;  %2504 = sbr.rel (%p3078_p3) target bundleno = 2717 (0xa9d), region = 128 }
 0xa96   : > { %v2496_v14 = vadd.f32 %v3316_v42, %v2489_v61 }
 0xa98   : > { %2500 = vst [vmem:[#allocation2 + $0x8] sm:$0xff] %v2496_v14 }
 0xa99   : > { %2505 = vst [vmem:[#allocation18] sm:$0xff] %v2493_v55 }
 0xa9a   : > { %2506 = vst [vmem:[#allocation18 + $0x8] sm:$0xff] %v2494_v59 }
 0xa9b   : > { %2508 = vst [vmem:[#allocation18 + $0x10] sm:$0xff] %v2495_v40 }
 0xa9c   : > { %2509 = vst [vmem:[#allocation18 + $0x18] sm:$0xff] %v2496_v14 }
 0xa9d PF: > { %p3228_p4 = scmp.eq.s32.totalorder %s3922_s24, 1  ;;  %s4687_s13 = sld [smem:[#allocation44_spill]] }
 0xa9e   : > { %s3810_s2 = smov [#allocation18]   ;;  %s3811_s16 = smov 128  }
 0xa9f   : > { %s2519_s19 = sshll.u32 %s3810_s2, 4  ;;  %s3812_s10 = smov 8   ;;  %s2520_s19 = int_to_ptr.vmem [resolvable:$true] %s2519_s19 }
 0xaa3   : > { %s2521_s1 = sshll.u32 %s4687_s13, 4  ;;  %s2522_s1 = int_to_ptr.hbm [resolvable:$true] %s2521_s1 }
 0xaa4   : > { %3184 = dma.vmem_to_hbm [thread:$0]  (%p3228_p4), %s2520_s19, 512, %s2522_s1, [#allocation6], %s3811_s16, %s3811_s16, %s3812_s10  }
 0xaa5   : > { %3768 = dma.done.wait (%p3228_p4), [#allocation6], 512  }
 0xaa6   : > { %3770 = vsyncadd (%p3228_p4), [#allocation6], 4294966784 }
 0xaa7 PF: > { %s29_s23 = sadd.s32 1, %s3793_s23   ;;  %s4688_s18 = sld [smem:[#allocation24_spill]] }
 0xaa8   : > { %p26_p5 = scmp.ge.s32.totalorder %s29_s23, 4   ;;  %s4689_s24 = sld [smem:[#allocation28_spill]] }
 0xaa9   : > { %s4690_s3 = sld [smem:[#allocation27_spill]]  ;;  %s4691_s19 = smov %s3781_s20 }
 0xaaa   : > { %s4693_s21 = smov %s3789_s22 }
 0xaab   :  { %28 = sbr.rel (!%p26_p5) target bundleno = 23 (0x17), region = 215 }
 0xaae   : > { %s4692_s20 = smov %s4689_s24 }
 0xaaf   : > { %s4694_s22 = smov %s4690_s3 }
 0xab0   :  { %2538 = vsyncpa [#allocation5], 1 }
 0xab1   :  { %2540 = vsyncpa [#allocation5 + $0x1], 1 }
 0xab2   :  { %2541 = vsyncpa [#allocation8], 1 }
 0xab3   :  { %2542 = vsyncpa [#allocation11], 1 }
 0xab4   :  { %2543 = vsyncpa [#allocation6], 1 }
 0xab5   :  { %2545 = vsyncpa [#allocation6 + $0x1], 1 }

</bundles_post_ra>
